<compile_context>
chip_gen: v7x
topology: tpu7x:2x2x1
jax: 0.10.0
libtpu: 0.0.40
codegen_flags: <defaults>
</compile_context>

<pallas_src>
import jax
import jax.numpy as jnp
from jax.experimental import pallas as pl
from jax.experimental.pallas import tpu as pltpu

NEG_SLOPE = 0.01            # nn.LeakyReLU default
EMB = 128                   # embedding_dimension (layout assumes 128 lanes)
VMEM_LIMIT = 32 * 1024 * 1024


def _round_up(x, m):
    return ((x + m - 1) // m) * m


def _leaky(x):
    return jnp.where(x > 0, x, NEG_SLOPE * x)


# ----------------------------- kernels -------------------------------------

def encoder_kernel(feat_ref, wb_ref, bb_ref, wi_ref, bi_ref, wg1_ref, z1_ref):
    f32, bf16 = jnp.float32, jnp.bfloat16
    # Fused four-branch Linear + LeakyReLU (block-positioned weights -> one dot).
    h = jnp.dot(feat_ref[...], wb_ref[...], preferred_element_type=f32) + bb_ref[...]
    h = _leaky(h)
    # linear_relu_input
    x = jnp.dot(h.astype(bf16), wi_ref[...], preferred_element_type=f32) + bi_ref[...]
    x = _leaky(x)
    # Pre-apply GCNConv1 weight so the propagation kernel only streams adj.
    z1_ref[...] = jnp.dot(x.astype(bf16), wg1_ref[...],
                          preferred_element_type=f32).astype(z1_ref.dtype)


def prop_transform_kernel(adj_ref, z_ref, b_ref, wnext_ref, out_ref, acc_ref):
    """out = ((A_hat @ Z) + b) @ W_next, reducing over adjacency column tiles."""
    @pl.when(pl.program_id(1) == 0)
    def _():
        acc_ref[...] = jnp.zeros_like(acc_ref)

    acc_ref[...] += jnp.dot(adj_ref[...], z_ref[...],
                            preferred_element_type=jnp.float32)

    @pl.when(pl.program_id(1) == pl.num_programs(1) - 1)
    def _():
        h = acc_ref[...] + b_ref[...]
        # TODO(synk): training-mode F.dropout(p=0.3) between the GCN layers is
        # omitted (eval semantics: identity).
        out_ref[...] = jnp.dot(h.astype(jnp.bfloat16), wnext_ref[...],
                               preferred_element_type=jnp.float32).astype(out_ref.dtype)


def prop_head_kernel(adj_ref, z_ref, b_ref, wo1_ref, bo1_ref, wo2_ref, bo2_ref,
                     out_ref, acc_ref):
    """out = output head applied to (A_hat @ Z) + b; final Linear is 128-lane padded."""
    @pl.when(pl.program_id(1) == 0)
    def _():
        acc_ref[...] = jnp.zeros_like(acc_ref)

    acc_ref[...] += jnp.dot(adj_ref[...], z_ref[...],
                            preferred_element_type=jnp.float32)

    @pl.when(pl.program_id(1) == pl.num_programs(1) - 1)
    def _():
        h = acc_ref[...] + b_ref[...]
        y = _leaky(jnp.dot(h.astype(jnp.bfloat16), wo1_ref[...],
                           preferred_element_type=jnp.float32) + bo1_ref[...])
        out_ref[...] = (jnp.dot(y.astype(jnp.bfloat16), wo2_ref[...],
                                preferred_element_type=jnp.float32) + bo2_ref[...])


# --------------------------- JAX-side glue ----------------------------------

def build_gcn_adj(edge_index, num_nodes):
    """Dense D^-1/2 (A + I) D^-1/2, matching PyG GCNConv gcn_norm semantics (f32)."""
    src, dst = edge_index[0], edge_index[1]
    a = jnp.zeros((num_nodes, num_nodes), jnp.float32)
    a = a.at[dst, src].add(1.0)                       # message src -> dst (row = target)
    a = a + jnp.eye(num_nodes, dtype=jnp.float32)     # self loops
    deg = a.sum(axis=1)
    dinv = jax.lax.rsqrt(deg)
    return a * dinv[:, None] * dinv[None, :]


def init_params(key, des_size=768, tweet_size=768, num_prop_size=4,
                cat_prop_size=3, emb=EMB):
    q = emb // 4
    keys = jax.random.split(key, 9)

    def lin(k, fan_in, fan_out):
        kw, kb = jax.random.split(k)
        bound = 1.0 / jnp.sqrt(jnp.float32(fan_in))
        w = jax.random.uniform(kw, (fan_in, fan_out), jnp.float32, -bound, bound)
        b = jax.random.uniform(kb, (1, fan_out), jnp.float32, -bound, bound)
        return w, b

    p = {}
    p["wd"], p["bd"] = lin(keys[0], des_size, q)
    p["wt"], p["bt"] = lin(keys[1], tweet_size, q)
    p["wn"], p["bn"] = lin(keys[2], num_prop_size, q)
    p["wc"], p["bc"] = lin(keys[3], cat_prop_size, q)
    p["wi"], p["bi"] = lin(keys[4], emb, emb)
    p["wg1"], p["bg1"] = lin(keys[5], emb, emb)
    p["wg2"], p["bg2"] = lin(keys[6], emb, emb)
    p["wo1"], p["bo1"] = lin(keys[7], emb, emb)
    p["wo2"], p["bo2"] = lin(keys[8], emb, 2)
    return p


def botgcn_single2_forward(des, tweet, num_prop, cat_prop, edge_index, params,
                           *, tm=256, tk=512):
    """Tiled Pallas forward. tm = row tile, tk = adjacency-column (reduction) tile."""
    assert tk % tm == 0, "tk must be a multiple of tm so padded N divides both"
    n = des.shape[0]
    np_ = _round_up(n, tk)

    f_des, f_tw = des.shape[1], tweet.shape[1]
    f_num, f_cat = num_prop.shape[1], cat_prop.shape[1]
    f_raw = f_des + f_tw + f_num + f_cat
    fp = _round_up(f_raw, 128)
    q = EMB // 4

    # ---- packed/padded inputs (rows padded to np_, features padded to fp).
    feat = jnp.concatenate([des, tweet, num_prop, cat_prop], axis=1)
    feat = jnp.pad(feat, ((0, np_ - n), (0, fp - f_raw))).astype(jnp.bfloat16)

    # ---- block-positioned fused branch weight + packed branch bias.
    wb = jnp.zeros((fp, EMB), jnp.float32)
    wb = wb.at[0:f_des, 0 * q:1 * q].set(params["wd"])
    wb = wb.at[f_des:f_des + f_tw, 1 * q:2 * q].set(params["wt"])
    o = f_des + f_tw
    wb = wb.at[o:o + f_num, 2 * q:3 * q].set(params["wn"])
    wb = wb.at[o + f_num:o + f_num + f_cat, 3 * q:4 * q].set(params["wc"])
    wb = wb.astype(jnp.bfloat16)
    bb = jnp.concatenate([params["bd"], params["bt"], params["bn"], params["bc"]],
                         axis=1).astype(jnp.float32)

    wi = params["wi"].astype(jnp.bfloat16)
    bi = params["bi"].astype(jnp.float32)
    wg1 = params["wg1"].astype(jnp.bfloat16)
    bg1 = params["bg1"].astype(jnp.float32)
    wg2 = params["wg2"].astype(jnp.bfloat16)
    bg2 = params["bg2"].astype(jnp.float32)
    wo1 = params["wo1"].astype(jnp.bfloat16)
    bo1 = params["bo1"].astype(jnp.float32)
    # final Linear(emb -> 2) padded to 128 output lanes (lane-dense store).
    wo2 = jnp.zeros((EMB, EMB), jnp.float32).at[:, :2].set(params["wo2"]).astype(jnp.bfloat16)
    bo2 = jnp.zeros((1, EMB), jnp.float32).at[:, :2].set(params["bo2"])

    # ---- normalized dense adjacency, zero-padded, bf16 for streaming.
    # TODO(synk): for large sparse graphs replace dense A_hat with a scalar-prefetch
    # driven sparse aggregation (O(E*emb) instead of O(N^2)).
    adj = build_gcn_adj(edge_index, n)
    adj = jnp.pad(adj, ((0, np_ - n), (0, np_ - n))).astype(jnp.bfloat16)

    const = lambda *_: (0, 0)
    w_spec = pl.BlockSpec((EMB, EMB), const)
    b_spec = pl.BlockSpec((1, EMB), const)

    # ---- stage 1: encoder (row tiled) -> Z1 = X0 @ W_gcn1
    z1 = pl.pallas_call(
        encoder_kernel,
        out_shape=jax.ShapeDtypeStruct((np_, EMB), jnp.bfloat16),
        grid_spec=pltpu.PrefetchScalarGridSpec(
            num_scalar_prefetch=0,
            grid=(np_ // tm,),
            in_specs=[
                pl.BlockSpec((tm, fp), lambda i: (i, 0)),   # features
                pl.BlockSpec((fp, EMB), const),             # fused branch weight
                b_spec, w_spec, b_spec, w_spec,             # bb, wi, bi, wg1
            ],
            out_specs=pl.BlockSpec((tm, EMB), lambda i: (i, 0)),
        ),
        compiler_params=pltpu.CompilerParams(
            dimension_semantics=("parallel",),
            vmem_limit_bytes=VMEM_LIMIT),
    )(feat, wb, bb, wi, bi, wg1)

    # ---- shared specs for the two adjacency-streaming passes.
    grid2 = (np_ // tm, np_ // tk)
    prop_cparams = pltpu.CompilerParams(
        dimension_semantics=("parallel", "arbitrary"),
        vmem_limit_bytes=VMEM_LIMIT)
    adj_spec = pl.BlockSpec((tm, tk), lambda i, k: (i, k))
    z_spec = pl.BlockSpec((tk, EMB), lambda i, k: (k, 0))
    out_spec = pl.BlockSpec((tm, EMB), lambda i, k: (i, 0))
    acc_scratch = [pltpu.VMEM((tm, EMB), jnp.float32)]

    # ---- stage 2: GCNConv1 propagation fused with GCNConv2 weight -> Z2
    z2 = pl.pallas_call(
        prop_transform_kernel,
        out_shape=jax.ShapeDtypeStruct((np_, EMB), jnp.bfloat16),
        grid_spec=pltpu.PrefetchScalarGridSpec(
            num_scalar_prefetch=0,
            grid=grid2,
            in_specs=[adj_spec, z_spec, b_spec, w_spec],
            out_specs=out_spec,
            scratch_shapes=acc_scratch,
        ),
        compiler_params=prop_cparams,
    )(adj, z1, bg1, wg2)

    # ---- stage 3: GCNConv2 propagation fused with the output head
    logits_pad = pl.pallas_call(
        prop_head_kernel,
        out_shape=jax.ShapeDtypeStruct((np_, EMB), jnp.float32),
        grid_spec=pltpu.PrefetchScalarGridSpec(
            num_scalar_prefetch=0,
            grid=grid2,
            in_specs=[adj_spec, z_spec, b_spec, w_spec, b_spec, w_spec, b_spec],
            out_specs=out_spec,
            scratch_shapes=acc_scratch,
        ),
        compiler_params=prop_cparams,
    )(adj, z2, bg2, wo1, bo1, wo2, bo2)

    return logits_pad[:n, :2]


def botgcn_reference(des, tweet, num_prop, cat_prop, edge_index, p):
    """Pure-JAX f32 eval-mode reference matching the PyTorch module."""
    adj = build_gcn_adj(edge_index, des.shape[0])
    d = _leaky(des @ p["wd"] + p["bd"])
    t = _leaky(tweet @ p["wt"] + p["bt"])
    nn_ = _leaky(num_prop @ p["wn"] + p["bn"])
    c = _leaky(cat_prop @ p["wc"] + p["bc"])
    x = jnp.concatenate([d, t, nn_, c], axis=1)
    x = _leaky(x @ p["wi"] + p["bi"])
    x = adj @ (x @ p["wg1"]) + p["bg1"]
    x = adj @ (x @ p["wg2"]) + p["bg2"]      # dropout is identity in eval
    x = _leaky(x @ p["wo1"] + p["bo1"])
    return x @ p["wo2"] + p["bo2"]


if __name__ == "__main__":
    N_NODES = 16
    DES, TWEET, NUMP, CATP = 768, 768, 4, 3
    N_EDGES = 48

    key = jax.random.PRNGKey(0)
    k_des, k_tw, k_num, k_cat, k_e1, k_e2, k_par = jax.random.split(key, 7)

    des = jax.random.normal(k_des, (N_NODES, DES), jnp.float32)
    tweet = jax.random.normal(k_tw, (N_NODES, TWEET), jnp.float32)
    num_prop = jax.random.normal(k_num, (N_NODES, NUMP), jnp.float32)
    cat_prop = jax.random.normal(k_cat, (N_NODES, CATP), jnp.float32)

    # Random directed edges with src != dst (PyG adds the self-loops itself).
    src = jax.random.randint(k_e1, (N_EDGES,), 0, N_NODES)
    off = jax.random.randint(k_e2, (N_EDGES,), 1, N_NODES)
    dst = (src + off) % N_NODES
    edge_index = jnp.stack([src, dst], axis=0).astype(jnp.int32)

    params = init_params(k_par, DES, TWEET, NUMP, CATP, EMB)

    out = botgcn_single2_forward(des, tweet, num_prop, cat_prop, edge_index, params)
    out = jax.block_until_ready(out)
    assert out.shape == (N_NODES, 2) and out.dtype == jnp.float32

    ref = botgcn_reference(des, tweet, num_prop, cat_prop, edge_index, params)
    max_err = float(jnp.max(jnp.abs(out - ref)))
    assert jnp.allclose(out, ref, atol=1e-1, rtol=1e-1), f"max abs err {max_err}"
    print("KERNEL_OK")
</pallas_src>

<mosaic_0001>
module attributes {stable_mosaic.version = 11 : i64} {
  func.func @encoder_kernel(%arg0: i32, %arg1: memref<256x1664xbf16, #tpu.memory_space<vmem>>, %arg2: memref<1664x128xbf16, #tpu.memory_space<vmem>>, %arg3: memref<1x128xf32, #tpu.memory_space<vmem>>, %arg4: memref<128x128xbf16, #tpu.memory_space<vmem>>, %arg5: memref<1x128xf32, #tpu.memory_space<vmem>>, %arg6: memref<128x128xbf16, #tpu.memory_space<vmem>>, %arg7: memref<256x128xbf16, #tpu.memory_space<vmem>>) attributes {dimension_semantics = [#tpu.dimension_semantics<parallel>], iteration_bounds = array<i64: 2>, scalar_prefetch = 0 : i64, scratch_operands = 0 : i64, tpu.core_type = #tpu.core_type<tc>, window_params = [{transform_indices = @transform_0, window_bounds = array<i64: 256, 1664>}, {pipeline_mode = #tpu.pipeline_mode<synchronous>, transform_indices = @transform_1, window_bounds = array<i64: 1664, 128>}, {pipeline_mode = #tpu.pipeline_mode<synchronous>, transform_indices = @transform_2, window_bounds = array<i64: 1, 128>}, {pipeline_mode = #tpu.pipeline_mode<synchronous>, transform_indices = @transform_3, window_bounds = array<i64: 128, 128>}, {pipeline_mode = #tpu.pipeline_mode<synchronous>, transform_indices = @transform_4, window_bounds = array<i64: 1, 128>}, {pipeline_mode = #tpu.pipeline_mode<synchronous>, transform_indices = @transform_5, window_bounds = array<i64: 128, 128>}, {transform_indices = @transform_6, window_bounds = array<i64: 256, 128>}]} {
    %c0 = arith.constant 0 : index
    %c0_0 = arith.constant 0 : index
    %0 = vector.load %arg1[%c0, %c0_0] : memref<256x1664xbf16, #tpu.memory_space<vmem>>, vector<256x1664xbf16>
    %c0_1 = arith.constant 0 : index
    %c0_2 = arith.constant 0 : index
    %1 = vector.load %arg2[%c0_1, %c0_2] : memref<1664x128xbf16, #tpu.memory_space<vmem>>, vector<1664x128xbf16>
    %cst = arith.constant dense<0.000000e+00> : vector<256x128xf32>
    %2 = tpu.matmul %0, %1, %cst {dimension_numbers = #tpu.dot_dimension_numbers<[1], [0], [0], [1], [0, 0, 1, 1], [], []>} : vector<256x1664xbf16>, vector<1664x128xbf16>, vector<256x128xf32> -> vector<256x128xf32>
    %c0_3 = arith.constant 0 : index
    %c0_4 = arith.constant 0 : index
    %3 = vector.load %arg3[%c0_3, %c0_4] : memref<1x128xf32, #tpu.memory_space<vmem>>, vector<1x128xf32>
    %4 = vector.broadcast %3 : vector<1x128xf32> to vector<256x128xf32>
    %5 = arith.addf %2, %4 : vector<256x128xf32>
    %cst_5 = arith.constant 0.000000e+00 : f32
    %6 = vector.broadcast %cst_5 : f32 to vector<256x128xf32>
    %7 = arith.cmpf ogt, %5, %6 : vector<256x128xf32>
    %cst_6 = arith.constant 0.00999999977 : f32
    %8 = vector.broadcast %cst_6 : f32 to vector<256x128xf32>
    %9 = arith.mulf %8, %5 : vector<256x128xf32>
    %10 = arith.select %7, %5, %9 : vector<256x128xi1>, vector<256x128xf32>
    %11 = arith.truncf %10 : vector<256x128xf32> to vector<256x128xbf16>
    %c0_7 = arith.constant 0 : index
    %c0_8 = arith.constant 0 : index
    %12 = vector.load %arg4[%c0_7, %c0_8] : memref<128x128xbf16, #tpu.memory_space<vmem>>, vector<128x128xbf16>
    %cst_9 = arith.constant dense<0.000000e+00> : vector<256x128xf32>
    %13 = tpu.matmul %11, %12, %cst_9 {dimension_numbers = #tpu.dot_dimension_numbers<[1], [0], [0], [1], [0, 0, 1, 1], [], []>} : vector<256x128xbf16>, vector<128x128xbf16>, vector<256x128xf32> -> vector<256x128xf32>
    %c0_10 = arith.constant 0 : index
    %c0_11 = arith.constant 0 : index
    %14 = vector.load %arg5[%c0_10, %c0_11] : memref<1x128xf32, #tpu.memory_space<vmem>>, vector<1x128xf32>
    %15 = vector.broadcast %14 : vector<1x128xf32> to vector<256x128xf32>
    %16 = arith.addf %13, %15 : vector<256x128xf32>
    %cst_12 = arith.constant 0.000000e+00 : f32
    %17 = vector.broadcast %cst_12 : f32 to vector<256x128xf32>
    %18 = arith.cmpf ogt, %16, %17 : vector<256x128xf32>
    %cst_13 = arith.constant 0.00999999977 : f32
    %19 = vector.broadcast %cst_13 : f32 to vector<256x128xf32>
    %20 = arith.mulf %19, %16 : vector<256x128xf32>
    %21 = arith.select %18, %16, %20 : vector<256x128xi1>, vector<256x128xf32>
    %22 = arith.truncf %21 : vector<256x128xf32> to vector<256x128xbf16>
    %c0_14 = arith.constant 0 : index
    %c0_15 = arith.constant 0 : index
    %23 = vector.load %arg6[%c0_14, %c0_15] : memref<128x128xbf16, #tpu.memory_space<vmem>>, vector<128x128xbf16>
    %cst_16 = arith.constant dense<0.000000e+00> : vector<256x128xf32>
    %24 = tpu.matmul %22, %23, %cst_16 {dimension_numbers = #tpu.dot_dimension_numbers<[1], [0], [0], [1], [0, 0, 1, 1], [], []>} : vector<256x128xbf16>, vector<128x128xbf16>, vector<256x128xf32> -> vector<256x128xf32>
    %25 = arith.truncf %24 : vector<256x128xf32> to vector<256x128xbf16>
    %c0_17 = arith.constant 0 : index
    %c0_18 = arith.constant 0 : index
    %26 = vector.load %arg7[%c0_17, %c0_18] : memref<256x128xbf16, #tpu.memory_space<vmem>>, vector<256x128xbf16>
    tpu.vector_store %arg7[%c0_17, %c0_18], %25 {strides = array<i32>} : memref<256x128xbf16, #tpu.memory_space<vmem>>, vector<256x128xbf16>,
    return
  }
  func.func @transform_0(%arg0: i32) -> (i32, i32) {
    %c0_i32 = arith.constant 0 : i32
    %c0_i32_0 = arith.constant 0 : i32
    return %arg0, %c0_i32 : i32, i32
  }
  func.func @transform_1(%arg0: i32) -> (i32, i32) {
    %c0_i32 = arith.constant 0 : i32
    %c0_i32_0 = arith.constant 0 : i32
    %c0_i32_1 = arith.constant 0 : i32
    return %c0_i32, %c0_i32_0 : i32, i32
  }
  func.func @transform_2(%arg0: i32) -> (i32, i32) {
    %c0_i32 = arith.constant 0 : i32
    %c0_i32_0 = arith.constant 0 : i32
    %c0_i32_1 = arith.constant 0 : i32
    return %c0_i32, %c0_i32_0 : i32, i32
  }
  func.func @transform_3(%arg0: i32) -> (i32, i32) {
    %c0_i32 = arith.constant 0 : i32
    %c0_i32_0 = arith.constant 0 : i32
    %c0_i32_1 = arith.constant 0 : i32
    return %c0_i32, %c0_i32_0 : i32, i32
  }
  func.func @transform_4(%arg0: i32) -> (i32, i32) {
    %c0_i32 = arith.constant 0 : i32
    %c0_i32_0 = arith.constant 0 : i32
    %c0_i32_1 = arith.constant 0 : i32
    return %c0_i32, %c0_i32_0 : i32, i32
  }
  func.func @transform_5(%arg0: i32) -> (i32, i32) {
    %c0_i32 = arith.constant 0 : i32
    %c0_i32_0 = arith.constant 0 : i32
    %c0_i32_1 = arith.constant 0 : i32
    return %c0_i32, %c0_i32_0 : i32, i32
  }
  func.func @transform_6(%arg0: i32) -> (i32, i32) {
    %c0_i32 = arith.constant 0 : i32
    %c0_i32_0 = arith.constant 0 : i32
    return %arg0, %c0_i32 : i32, i32
  }
}

</mosaic_0001>

<bundles_post_ra>
// kernel: tpu_custom_call.1
= control target key start
LH: loop header
LB: loop body
LE: loop exit
PB: predicated region body
PF: predicated region fallthrough
CT: control target
= control target key end

     0   :  { %11 = vsyncpa [#allocation3], 0  ;;  %s7969_s0 = inlined_call_operand.hbm [shape: bf16[512,1664], index: 0, kind: input, shape index: {}]   ;;  %s7970_s1 = inlined_call_operand.hbm [shape: bf16[1664,128], index: 1, kind: input, shape index: {}]   ;;  %s7971_s2 = inlined_call_operand.hbm [shape: f32[1,128], index: 2, kind: input, shape index: {}]   ;;  %s7972_s3 = inlined_call_operand.hbm [shape: bf16[128,128], index: 3, kind: input, shape index: {}]   ;;  %s7973_s4 = inlined_call_operand.hbm [shape: f32[1,128], index: 4, kind: input, shape index: {}]   ;;  %s7974_s5 = inlined_call_operand.hbm [shape: bf16[128,128], index: 5, kind: input, shape index: {}]   ;;  %s7975_s6 = inlined_call_operand.hbm [shape: bf16[512,128], index: 6, kind: output, shape index: {}]  }
   0x1   :  { %13 = vsyncpa [#allocation3 + $0x1], 0 }
   0x2   :  { %14 = vsyncpa [#allocation6], 0 }
   0x3   :  { %15 = vsyncpa [#allocation9], 0 }
   0x4   :  { %16 = vsyncpa [#allocation12], 0 }
   0x5   :  { %17 = vsyncpa [#allocation4], 0 }
   0x6   :  { %19 = vsyncpa [#allocation4 + $0x1], 0  ;;  %s6810_s21 = smov 0   ;;  %s6812_s22 = smov 0  }
   0x7   :  { %s6814_s23 = smov 0   ;;  %s6816_s24 = smov 0  }
   0x8 LB: > { %s6762_s25 = smov [#allocation5]   ;;  %s6831_s27 = sadd.s32 4294967295, %s6760_s24   ;;  %s6760_s24 = sphi %s6816_s24, %s8000_s24   ;;  %s6756_s23 = sphi %s6814_s23, %s7999_s23   ;;  %s6752_s22 = sphi %s6812_s22, %s7998_s22   ;;  %s6748_s21 = sphi %s6810_s21, %s7997_s21  }
   0x9   : > { %s199_s26 = sshll.u32 %s6762_s25, 4  ;;  %p4566_p0 = scmp.ge.s32.totalorder %s6760_s24, 1  ;;  %s6836_s26 = int_to_ptr.vmem [resolvable:$true] %s199_s26 }
   0xa   : > { %p7976_p1 = scmp.eq.s32.totalorder %s6831_s27, 0  ;;  %p187_p2 = scmp.lt.s32.totalorder %s6760_s24, 3 }
   0xb   : > { %s6763_s29 = smov [#allocation8]   ;;  %s6764_s8 = smov [#allocation7]  }
   0xc   : > { %p6838_p3 = pnand %p4566_p0, %p187_p2  ;;  %s223_s30 = sshll.u32 %s6763_s29, 4  ;;  %s6851_s30 = int_to_ptr.vmem [resolvable:$true] %s223_s30 }
   0xd   : > { %s213_s9 = sshll.u32 %s6764_s8, 4  ;;  %s6512_s12 = scalar_lea.hbm %s7970_s1, 13312  ;;  %s6853_s9 = int_to_ptr.vmem [resolvable:$true] %s213_s9 }
   0xe   : > { %s7979_s28 = scalar_select %p6838_p3, 1, 0 }
   0xf   : > { %p6009_p5 = pneg %p6838_p3  ;;  %p6513_p7 = scmp.ne.s32.totalorder %s7970_s1, %s6512_s12 }
  0x10   : > { %p6519_p11 = scmp.lt.u32.totalorder %s6512_s12, %s7970_s1 }
  0x11   : > { %p6847_p6 = pnand %p6009_p5, %p7976_p1 }
  0x13   : > { %p6863_p8 = pneg %p6847_p6 }
  0x15   : > { %p6515_p9 = pnand %p6863_p8, %p6513_p7 }
  0x17   : > { %p6516_p10 = pneg %p6515_p9 }
  0x19   : > { %p6521_p12 = pnand %p6519_p11, %p6516_p10 }
  0x1b   : > { %6524 = shalt.err (!%p6521_p12)
}
  0x1c   : > { %s6525_s18 = scalar_lea.vmem %s6836_s26, 13312  ;;  %p6533_p5 = scmp.lt.s32.totalorder %s6836_s26, %s6836_s26 }
  0x1d   : > { %p6526_p13 = scmp.ne.s32.totalorder %s6836_s26, %s6525_s18  ;;  %p6534_p4 = scmp.lt.s32.totalorder %s6525_s18, %s6525_s18 }
  0x1f   : > { %p6528_p0 = pnand %p6526_p13, %p6863_p8  ;;  %p6535_p7 = por %p6534_p4, %p6533_p5 }
  0x21   : > { %p6529_p2 = pneg %p6528_p0 }
  0x23   : > { %p6536_p9 = pnand %p6535_p7, %p6529_p2 }
  0x25   : > { %6539 = shalt.err (!%p6536_p9)
}
  0x26   : > { %s6765_s19 = smov 64   ;;  %s6766_s20 = smov 4  }
  0x27   : > { %6012 = dma.hbm_to_vmem [thread:$0]  (!%p6847_p6), %s7970_s1, 13312, %s6836_s26, [#allocation6], %s6765_s19, %s6765_s19, %s6766_s20  }
  0x28   : > { %s6540_s11 = scalar_lea.hbm %s7972_s3, 1024 }
  0x29   : > { %p6541_p4 = scmp.ne.s32.totalorder %s7972_s3, %s6540_s11  ;;  %p6547_p12 = scmp.lt.u32.totalorder %s6540_s11, %s7972_s3 }
  0x2b   : > { %p6543_p10 = pnand %p6541_p4, %p6863_p8 }
  0x2d   : > { %p6544_p11 = pneg %p6543_p10 }
  0x2f   : > { %p6549_p13 = pnand %p6547_p12, %p6544_p11 }
  0x31   : > { %6552 = shalt.err (!%p6549_p13)
}
  0x32   : > { %s6553_s26 = scalar_lea.vmem %s6851_s30, 1024  ;;  %p6561_p7 = scmp.lt.s32.totalorder %s6851_s30, %s6851_s30 }
  0x33   : > { %p6554_p0 = scmp.ne.s32.totalorder %s6851_s30, %s6553_s26  ;;  %p6562_p9 = scmp.lt.s32.totalorder %s6553_s26, %s6553_s26 }
  0x35   : > { %p6556_p2 = pnand %p6554_p0, %p6863_p8  ;;  %p6563_p4 = por %p6562_p9, %p6561_p7 }
  0x37   : > { %p6557_p5 = pneg %p6556_p2 }
  0x39   : > { %p6564_p10 = pnand %p6563_p4, %p6557_p5 }
  0x3b   : > { %6567 = shalt.err (!%p6564_p10)
}
  0x3c   : > { %6018 = dma.hbm_to_vmem [thread:$0]  (!%p6847_p6), %s7972_s3, 1024, %s6851_s30, [#allocation9], %s6765_s19, %s6765_s19, %s6766_s20  }
  0x3d   : > { %s6568_s8 = scalar_lea.hbm %s7971_s2, 16 }
  0x3e   : > { %p6569_p11 = scmp.ne.s32.totalorder %s7971_s2, %s6568_s8  ;;  %p6575_p0 = scmp.lt.u32.totalorder %s6568_s8, %s7971_s2 }
  0x40   : > { %p6571_p12 = pnand %p6569_p11, %p6863_p8 }
  0x42   : > { %p6572_p13 = pneg %p6571_p12 }
  0x44   : > { %p6577_p2 = pnand %p6575_p0, %p6572_p13 }
  0x46   : > { %6580 = shalt.err (!%p6577_p2)
}
  0x47   : > { %s6581_s30 = scalar_lea.vmem %s6853_s9, 16  ;;  %s6588_s14 = scalar_lea.vmem %s6853_s9, 32 }
  0x48   : > { %p6582_p5 = scmp.ne.s32.totalorder %s6853_s9, %s6581_s30  ;;  %p6589_p4 = scmp.lt.s32.totalorder %s6853_s9, %s6853_s9 }
  0x49   : > { %p6590_p10 = scmp.lt.s32.totalorder %s6588_s14, %s6581_s30 }
  0x4a   : > { %p6584_p7 = pnand %p6582_p5, %p6863_p8 }
  0x4b   : > { %p6591_p11 = por %p6590_p10, %p6589_p4 }
  0x4c   : > { %p6585_p9 = pneg %p6584_p7 }
  0x4e   : > { %p6592_p12 = pnand %p6591_p11, %p6585_p9 }
  0x50   : > { %6595 = shalt.err (!%p6592_p12)
}
  0x51   : > { %6015 = dma.hbm_to_vmem [thread:$0]  (!%p6847_p6), %s7971_s2, 16, %s6853_s9, [#allocation6]  }
  0x52   : > { %s6767_s17 = smov [#allocation10]   ;;  %s6768_s25 = smov [#allocation11]  }
  0x53   : > { %s237_s18 = sshll.u32 %s6767_s17, 4  ;;  %s247_s29 = sshll.u32 %s6768_s25, 4  ;;  %s238_s18 = int_to_ptr.vmem [resolvable:$true] %s237_s18  ;;  %s248_s29 = int_to_ptr.vmem [resolvable:$true] %s247_s29 }
  0x54   : > { %s6596_s11 = scalar_lea.hbm %s7973_s4, 16 }
  0x55   : > { %p6597_p13 = scmp.ne.s32.totalorder %s7973_s4, %s6596_s11  ;;  %p6603_p5 = scmp.lt.u32.totalorder %s6596_s11, %s7973_s4 }
  0x57   : > { %p6599_p0 = pnand %p6597_p13, %p6863_p8 }
  0x59   : > { %p6600_p2 = pneg %p6599_p0 }
  0x5b   : > { %p6605_p7 = pnand %p6603_p5, %p6600_p2 }
  0x5d   : > { %6608 = shalt.err (!%p6605_p7)
}
  0x5e   : > { %s6609_s9 = scalar_lea.vmem %s238_s18, 16  ;;  %s6616_s16 = scalar_lea.vmem %s238_s18, 32 }
  0x5f   : > { %p6610_p9 = scmp.ne.s32.totalorder %s238_s18, %s6609_s9  ;;  %p6617_p11 = scmp.lt.s32.totalorder %s238_s18, %s238_s18 }
  0x60   : > { %p6618_p12 = scmp.lt.s32.totalorder %s6616_s16, %s6609_s9 }
  0x61   : > { %p6612_p4 = pnand %p6610_p9, %p6863_p8 }
  0x62   : > { %p6619_p1 = por %p6618_p12, %p6617_p11 }
  0x63   : > { %p6613_p10 = pneg %p6612_p4 }
  0x65   : > { %p6620_p3 = pnand %p6619_p1, %p6613_p10 }
  0x67   : > { %6623 = shalt.err (!%p6620_p3)
}
  0x68   : > { %6021 = dma.hbm_to_vmem [thread:$0]  (!%p6847_p6), %s7973_s4, 16, %s238_s18, [#allocation9]  }
  0x69   : > { %s6624_s10 = scalar_lea.hbm %s7974_s5, 1024 }
  0x6a   : > { %p6625_p13 = scmp.ne.s32.totalorder %s7974_s5, %s6624_s10  ;;  %p6631_p3 = scmp.lt.u32.totalorder %s6624_s10, %s7974_s5 }
  0x6c   : > { %p6627_p0 = pnand %p6625_p13, %p6863_p8 }
  0x6e   : > { %p6628_p1 = pneg %p6627_p0 }
  0x70   : > { %p6633_p2 = pnand %p6631_p3, %p6628_p1 }
  0x72   : > { %6636 = shalt.err (!%p6633_p2)
}
  0x73   : > { %s6637_s14 = scalar_lea.vmem %s248_s29, 1024  ;;  %p6645_p4 = scmp.lt.s32.totalorder %s248_s29, %s248_s29 }
  0x74   : > { %p6638_p5 = scmp.ne.s32.totalorder %s248_s29, %s6637_s14  ;;  %p6646_p10 = scmp.lt.s32.totalorder %s6637_s14, %s6637_s14 }
  0x76   : > { %p6640_p7 = pnand %p6638_p5, %p6863_p8  ;;  %p6647_p11 = por %p6646_p10, %p6645_p4 }
  0x78   : > { %p6641_p9 = pneg %p6640_p7 }
  0x7a   : > { %p6648_p12 = pnand %p6647_p11, %p6641_p9 }
  0x7c   : > { %6651 = shalt.err (!%p6648_p12)
}
  0x7d   : > { %6024 = dma.hbm_to_vmem [thread:$0]  (!%p6847_p6), %s7974_s5, 1024, %s248_s29, [#allocation12], %s6765_s19, %s6765_s19, %s6766_s20  }
  0x7e   : > { %s4565_s7 = sadd.s32 4294967294, %s6760_s24   ;;  %s6978_s15 = sadd.s32 1, %s6760_s24  }
  0x7f   : > { %s32_s16 = sadd.s32 1, %s6756_s23  ;;  %s29_s26 = ssub.s32 %s6760_s24, %s6978_s15 }
  0x80   : > { %p39_p8 = scmp.ne.s32.totalorder %s6756_s23, %s6752_s22  ;;  %p30_p13 = scmp.eq.s32.totalorder %s29_s26, 0 }
  0x81   : > { %p40_p0 = scmp.eq.s32.totalorder %s6760_s24, 0  ;;  %p45_p1 = scmp.ne.s32.totalorder %s6752_s22, %s6748_s21 }
  0x82   : > { %p174_p3 = scmp.eq.s32.totalorder %s6831_s27, 1  ;;  %p7982_p5 = scmp.eq.s32.totalorder %s6831_s27, 0 }
  0x83   : > { %s6990_s17 = scalar_select %p30_p13, %s6756_s23, %s32_s16  }
  0x84   : > { %p41_p2 = por %p40_p0, %p39_p8  ;;  %p6994_p7 = por %p7982_p5, %p45_p1 }
  0x85   : > { %p6998_p6 = por %p174_p3, %p39_p8  ;;  %p180_p9 = scmp.eq.s32.totalorder %s4565_s7, 1 }
  0x86   : > { %p6038_p4 = scmp.lt.s32.totalorder %s6760_s24, 2  ;;  %s261_s20 = sand.u32 1, %s6756_s23  }
  0x87   : > { %s7984_s19 = scalar_select %p6998_p6, 1, 0 }
  0x88   : > { %p7004_p10 = por %p180_p9, %p45_p1  ;;  %s5982_s8 = smul.u32 1664, %s261_s20 }
  0x89   : > { %p7008_p11 = pnand %p6038_p4, %p41_p2  ;;  %s5983_s11 = smul.u32 26624, %s6760_s24 }
  0x8a   : > { %s7985_s29 = scalar_select %p7004_p10, 1, 0 }
  0x8b   : > { %s7016_s30 = scalar_lea.hbm %s7969_s0, %s5983_s11  ;;  %s265_s14 = scalar_lea.vmem [#allocation2], %s5982_s8 }
  0x8c   : > { %s273_s18 = sshll.u32 %s265_s14, 4  ;;  %s7020_s9 = scalar_lea.sflag [#allocation3], %s261_s20  ;;  %s7018_s18 = int_to_ptr.vmem [resolvable:$true] %s273_s18 }
  0x8d   : > { %s6652_s7 = scalar_lea.hbm %s7016_s30, 26624  ;;  %p6654_p8 = pneg %p7008_p11 }
  0x8e   : > { %p6653_p12 = scmp.ne.s32.totalorder %s7016_s30, %s6652_s7  ;;  %s6657_s11 = scalar_lea.hbm %s7969_s0, 53248 }
  0x8f   : > { %p6658_p1 = scmp.lt.u32.totalorder %s7016_s30, %s7969_s0  ;;  %p6659_p3 = scmp.lt.u32.totalorder %s6657_s11, %s6652_s7 }
  0x90   : > { %p6655_p13 = pnand %p6654_p8, %p6653_p12  ;;  %p6661_p5 = scmp.lt.u32.totalorder %s6652_s7, %s7016_s30 }
  0x91   : > { %p6660_p2 = por %p6659_p3, %p6658_p1 }
  0x92   : > { %p6656_p0 = pneg %p6655_p13 }
  0x93   : > { %p6662_p9 = por %p6661_p5, %p6660_p2 }
  0x95   : > { %p6663_p4 = pnand %p6662_p9, %p6656_p0 }
  0x97   : > { %6666 = shalt.err (!%p6663_p4)
}
  0x98   : > { %s6667_s20 = scalar_lea.vmem %s7018_s18, 26624  ;;  %s6769_s8 = smov [#allocation2]  }
  0x99   : > { %p6668_p12 = scmp.ne.s32.totalorder %s7018_s18, %s6667_s20  ;;  %s6672_s14 = sshll.u32 %s6769_s8, 4  ;;  %s6673_s14 = int_to_ptr.vmem [resolvable:$false] %s6672_s14 }
  0x9a   : > { %s6674_s16 = scalar_lea.vmem %s6673_s14, 53248  ;;  %p6675_p6 = scmp.lt.s32.totalorder %s7018_s18, %s6673_s14 }
  0x9b   : > { %p6670_p13 = pnand %p6668_p12, %p6654_p8  ;;  %p6676_p1 = scmp.lt.s32.totalorder %s6674_s16, %s6667_s20 }
  0x9d   : > { %p6671_p10 = pneg %p6670_p13  ;;  %p6677_p3 = por %p6676_p1, %p6675_p6 }
  0x9f   : > { %p6678_p2 = pnand %p6677_p3, %p6671_p10 }
  0xa1   : > { %6681 = shalt.err (!%p6678_p2)
}
  0xa2   : > { %s6770_s7 = smov 832   ;;  %s6771_s26 = smov 52  }
  0xa3   : > { %6028 = dma.hbm_to_vmem [thread:$0]  (!%p7008_p11), %s7016_s30, 26624, %s7018_s18, %s7020_s9, %s6770_s7, %s6770_s7, %s6771_s26  }
  0xa4   : > { %p7987_p8 = scmp.ne.s32.totalorder %s7979_s28, 0 }
  0xa5   : > { %s7051_s11 = sand.u32 (!%p7987_p8), 1, %s6752_s22  }
  0xa6   : > { %285 = sbr.rel (%p7987_p8) target bundleno = 1306 (0x51a), region = 44  ;;  %s288_s13 = scalar_lea.sflag (!%p7987_p8), [#allocation3], %s7051_s11 }
  0xa7   : > { %s5984_s12 = smul.u32 (!%p7987_p8), 1664, %s7051_s11 }
  0xa9   : > { %s7055_s20 = scalar_lea.vmem (!%p7987_p8), [#allocation2], %s5984_s12 }
  0xad   : > { %6727 = dma.done.wait (%p6994_p7), %s288_s13, 26624  }
  0xae   : > { %6729 = vsyncadd (%p6994_p7), %s288_s13, 4294940672  ;;  %p7988_p6 = scmp.eq.s32.totalorder %s6831_s27, 0 }
  0xb0   : > { %6731 = dma.done.wait (%p7988_p6), [#allocation6], 13328   ;;  %p7989_p10 = pmov %p7988_p6 }
  0xb1   : > { %p7990_p11 = pmov %p7988_p6 }
  0xb2   : > { %6733 = vsyncadd (%p7989_p10), [#allocation6], 4294953968 }
  0xb3   : > { %6735 = dma.done.wait (%p7990_p11), [#allocation9], 1040   ;;  %p7991_p0 = pmov %p7988_p6 }
  0xb5   : > { %6737 = vsyncadd (%p7991_p0), [#allocation9], 4294966256  ;;  %p7992_p5 = pmov %p7991_p0 }
  0xb6   : > { %p7993_p9 = pmov %p7991_p0 }
  0xb7   : > { %6739 = dma.done.wait (%p7992_p5), [#allocation12], 1024  }
  0xb8   : > { %6741 = vsyncadd (%p7993_p9), [#allocation12], 4294966272  ;;  %v6088_v0 = vld [vmem:[#allocation5 + $0x40] sm:$0xff]   ;;  %v6090_v2 = vld [vmem:[#allocation5 + $0x48] sm:$0xff]   ;;  %s4582_s28 = sshll.u32 %s7051_s11, 7  ;;  %s4982_s10 = sshll.u32 %s6831_s27, 11 }
  0xb9   : > { %v6089_v1 = vld [vmem:[#allocation5] sm:$0xff]   ;;  %5078 = vmatprep.subr.bf16.mxu0 %v6088_v0  ;;  %5966 = vmatprep.subr.bf16.mxu1 %v6088_v0  ;;  %v6091_v3 = vld [vmem:[#allocation5 + $0x8] sm:$0xff]   ;;  %v6092_v4 = vld [vmem:[#allocation5 + $0x50] sm:$0xff]   ;;  %s7900_s25 = scalar_lea.vmem [#allocation13], %s4582_s28  ;;  %s7921_s8 = scalar_lea.hbm %s7975_s6, %s4982_s10 }
  0xba   : > { %5079 = vmatpush3.bf16.msra.mxu0 %v6089_v1  ;;  %5974 = vmatpush3.bf16.msra.mxu1 %v6089_v1  ;;  %v6093_v5 = vld [vmem:[#allocation5 + $0x10] sm:$0xff]   ;;  %v6094_v6 = vld [vmem:[#allocation5 + $0x58] sm:$0xff]   ;;  %v6096_v8 = vld [vmem:[#allocation5 + $0x60] sm:$0xff]   ;;  %s4444_s30 = sshll.u32 %s7900_s25, 4  ;;  %s4431_s14 = scalar_lea.sflag [#allocation4], %s7051_s11  ;;  %s7923_s30 = int_to_ptr.vmem [resolvable:$true] %s4444_s30 }
  0xbb   : > { %5080 = vmatprep.subr.bf16.mxu0 %v6090_v2  ;;  %5967 = vmatprep.subr.bf16.mxu1 %v6090_v2  ;;  %v6095_v7 = vld [vmem:[#allocation5 + $0x18] sm:$0xff]   ;;  %v6097_v9 = vld [vmem:[#allocation5 + $0x20] sm:$0xff]   ;;  %v6098_v10 = vld [vmem:[#allocation5 + $0x68] sm:$0xff]   ;;  %s6682_s27 = scalar_lea.vmem %s7923_s30, 2048  ;;  %p7994_p4 = scmp.ne.s32.totalorder %s7984_s19, 0 }
  0xbc   : > { %v6106_v11 = vld [vmem:[%s7055_s20 + $0x4] ss:$52 sps:$4 sm:$0xff]   ;;  %v6099_v13 = vld [vmem:[#allocation5 + $0x28] sm:$0xff]   ;;  %v6100_v14 = vld [vmem:[#allocation5 + $0x70] sm:$0xff]   ;;  %p6683_p7 = scmp.ne.s32.totalorder %s7923_s30, %s6682_s27  ;;  %s6772_s16 = smov [#allocation13]  }
  0xbd   : > { %v6109_v12 = vld [vmem:[%s7055_s20 + $0x4e4] ss:$52 sps:$4 sm:$0xff]   ;;  %2494 = vmatprep.mubr.bf16.mxu0 %v6106_v11  ;;  %v6101_v15 = vld [vmem:[#allocation5 + $0x30] sm:$0xff]   ;;  %v6113_v23 = vld [vmem:[#allocation5 + $0xc8] sm:$0xff]   ;;  %s6686_s7 = sshll.u32 %s6772_s16, 4  ;;  %s6687_s7 = int_to_ptr.vmem [resolvable:$false] %s6686_s7 }
  0xbe   : > { %5081 = vmatpush3.bf16.msra.mxu0 %v6091_v3  ;;  %5975 = vmatpush3.bf16.msra.mxu1 %v6091_v3  ;;  %v6102_v16 = vld [vmem:[#allocation5 + $0x78] sm:$0xff]   ;;  %v6110_v18 = vld [vmem:[#allocation5 + $0xc0] sm:$0xff]   ;;  %v6115_v27 = vld [vmem:[#allocation5 + $0x88] sm:$0xff]   ;;  %p6684_p12 = pnand %p6683_p7, %p7994_p4  ;;  %s6688_s26 = scalar_lea.vmem %s6687_s7, 4096 }
  0xbf   : > { %5082 = vmatprep.subr.bf16.mxu0 %v6092_v4  ;;  %5968 = vmatprep.subr.bf16.mxu1 %v6092_v4  ;;  %v6103_v17 = vld [vmem:[#allocation5 + $0x38] sm:$0xff]   ;;  %v6104_v19 = vld [vmem:[%s7055_s20] ss:$52 sps:$4 sm:$0xff]   ;;  %v6130_v28 = vld [vmem:[#allocation5 + $0x148] sm:$0xff]   ;;  %p6689_p1 = scmp.lt.s32.totalorder %s7923_s30, %s6687_s7  ;;  %p6690_p3 = scmp.lt.s32.totalorder %s6688_s26, %s6682_s27 }
  0xc0   : > { %2590 = vmatprep.mubr.bf16.mxu1 %v6109_v12  ;;  %v6107_v20 = vld [vmem:[%s7055_s20 + $0x4e0] ss:$52 sps:$4 sm:$0xff]   ;;  %v6120_v30 = vld [vmem:[%s7055_s20 + $0x68] ss:$52 sps:$4 sm:$0xff]   ;;  %v6131_v38 = vld [vmem:[%s7055_s20 + $0xd0] ss:$52 sps:$4 sm:$0xff]   ;;  %p6685_p13 = pneg %p6684_p12 }
  0xc1   : > { %v6112_v21 = vld [vmem:[#allocation5 + $0x140] sm:$0xff]   ;;  %v6122_v29 = vld [vmem:[#allocation5 + $0xd0] sm:$0xff]   ;;  %v6121_v31 = vld [vmem:[%s7055_s20 + $0x548] ss:$52 sps:$4 sm:$0xff]   ;;  %p6691_p2 = por %p6690_p3, %p6689_p1 }
  0xc2   : > { %5083 = vmatpush3.bf16.msra.mxu0 %v6093_v5  ;;  %5976 = vmatpush3.bf16.msra.mxu1 %v6093_v5  ;;  %v6111_v22 = vld [vmem:[#allocation5 + $0x80] sm:$0xff]   ;;  %v6134_v32 = vld [vmem:[#allocation5 + $0x108] sm:$0xff]   ;;  %v6123_v33 = vld [vmem:[#allocation5 + $0x90] sm:$0xff]  }
  0xc3   : > { %5084 = vmatprep.subr.bf16.mxu0 %v6094_v6  ;;  %5969 = vmatprep.subr.bf16.mxu1 %v6094_v6  ;;  %v6114_v24 = vld [vmem:[#allocation5 + $0x100] sm:$0xff]   ;;  %v6124_v34 = vld [vmem:[#allocation5 + $0xd8] sm:$0xff]   ;;  %v6126_v35 = vld [vmem:[%s7055_s20 + $0xd4] ss:$52 sps:$4 sm:$0xff]   ;;  %p6692_p8 = pnand %p6691_p2, %p6685_p13 }
  0xc4   : > { %v6116_v25 = vld [vmem:[%s7055_s20 + $0x6c] ss:$52 sps:$4 sm:$0xff]   ;;  %v6128_v36 = vld [vmem:[%s7055_s20 + $0x5b4] ss:$52 sps:$4 sm:$0xff]   ;;  %v6125_v37 = vld [vmem:[#allocation5 + $0x98] sm:$0xff]  }
  0xc5   : > { %v6118_v26 = vld [vmem:[%s7055_s20 + $0x54c] ss:$52 sps:$4 sm:$0xff]   ;;  %v6132_v39 = vld [vmem:[%s7055_s20 + $0x5b0] ss:$52 sps:$4 sm:$0xff]   ;;  %v6147_v53 = vld [vmem:[#allocation5 + $0xf8] sm:$0xff]  }
  0xc6   : > { %5085 = vmatpush3.bf16.msra.mxu0 %v6095_v7  ;;  %5977 = vmatpush3.bf16.msra.mxu1 %v6095_v7  ;;  %v6133_v40 = vld [vmem:[#allocation5 + $0xe0] sm:$0xff]   ;;  %v6146_v42 = vld [vmem:[#allocation5 + $0x150] sm:$0xff]   ;;  %v6136_v43 = vld [vmem:[#allocation5 + $0xe8] sm:$0xff]  }
  0xc7   : > { %5086 = vmatprep.subr.bf16.mxu0 %v6096_v8  ;;  %5970 = vmatprep.subr.bf16.mxu1 %v6096_v8  ;;  %v6135_v41 = vld [vmem:[#allocation5 + $0xa0] sm:$0xff]   ;;  %v6138_v44 = vld [vmem:[%s7055_s20 + $0x13c] ss:$52 sps:$4 sm:$0xff]   ;;  %v6137_v47 = vld [vmem:[#allocation5 + $0xa8] sm:$0xff]  }
  0xc8   : > { %v6148_v45 = vld [vmem:[#allocation5 + $0x110] sm:$0xff]   ;;  %v6142_v48 = vld [vmem:[%s7055_s20 + $0x138] ss:$52 sps:$4 sm:$0xff]   ;;  %v6152_v58 = vld [vmem:[%s7055_s20 + $0x8] ss:$52 sps:$4 sm:$0xff]  }
  0xc9   : > { %v6140_v46 = vld [vmem:[%s7055_s20 + $0x61c] ss:$52 sps:$4 sm:$0xff]   ;;  %v6143_v50 = vld [vmem:[%s7055_s20 + $0x618] ss:$52 sps:$4 sm:$0xff]   ;;  %v6155_v59 = vld [vmem:[%s7055_s20 + $0x1a0] ss:$52 sps:$4 sm:$0xff]  }
  0xca   : > { %5087 = vmatpush3.bf16.msra.mxu0 %v6097_v9  ;;  %5978 = vmatpush3.bf16.msra.mxu1 %v6097_v9  ;;  %v6144_v49 = vld [vmem:[#allocation5 + $0xf0] sm:$0xff]   ;;  %v6150_v52 = vld [vmem:[%s7055_s20 + $0x1a4] ss:$52 sps:$4 sm:$0xff]   ;;  %v6154_v54 = vld [vmem:[%s7055_s20 + $0xc] ss:$52 sps:$4 sm:$0xff]  }
  0xcb   : > { %5088 = vmatprep.subr.bf16.mxu0 %v6098_v10  ;;  %5971 = vmatprep.subr.bf16.mxu1 %v6098_v10  ;;  %v6145_v51 = vld [vmem:[#allocation5 + $0xb0] sm:$0xff]   ;;  %v6162_v55 = vld [vmem:[#allocation5 + $0x158] sm:$0xff]   ;;  %v6156_v60 = vld [vmem:[#allocation5 + $0x1c0] sm:$0xff]  }
  0xcc   : > { %v6165_v56 = vld [vmem:[#allocation5 + $0x118] sm:$0xff]   ;;  %v6157_v61 = vld [vmem:[#allocation5 + $0x180] sm:$0xff]   ;;  %v6160_v63 = vld [vmem:[%s7055_s20 + $0x74] ss:$52 sps:$4 sm:$0xff]  }
  0xcd   : > { %v6149_v57 = vld [vmem:[#allocation5 + $0xb8] sm:$0xff]   ;;  %v6158_v62 = vld [vmem:[%s7055_s20 + $0x20c] ss:$52 sps:$4 sm:$0xff]   ;;  %v6164_v5 = vld [vmem:[%s7055_s20 + $0x70] ss:$52 sps:$4 sm:$0xff]  }
  0xce   : > { %5089 = vmatpush3.bf16.msra.mxu0 %v6099_v13  ;;  %5979 = vmatpush3.bf16.msra.mxu1 %v6099_v13  ;;  %v6174_v0 = vld [vmem:[#allocation5 + $0x160] sm:$0xff]   ;;  %v6172_v1 = vld [vmem:[#allocation5 + $0x1c8] sm:$0xff]   ;;  %v6168_v7 = vld [vmem:[%s7055_s20 + $0xdc] ss:$52 sps:$4 sm:$0xff]  }
  0xcf   : > { %5090 = vmatprep.subr.bf16.mxu0 %v6100_v14  ;;  %5972 = vmatprep.subr.bf16.mxu1 %v6100_v14  ;;  %v6175_v2 = vld [vmem:[#allocation5 + $0x120] sm:$0xff]   ;;  %v6173_v3 = vld [vmem:[#allocation5 + $0x188] sm:$0xff]   ;;  %v6190_v10 = vld [vmem:[#allocation5 + $0x1d0] sm:$0xff]  }
  0xd0   : > { %v6163_v4 = vld [vmem:[%s7055_s20 + $0x208] ss:$52 sps:$4 sm:$0xff]   ;;  %v6191_v11 = vld [vmem:[#allocation5 + $0x190] sm:$0xff]   ;;  %v6171_v13 = vld [vmem:[%s7055_s20 + $0xd8] ss:$52 sps:$4 sm:$0xff]  }
  0xd1   : > { %v6166_v6 = vld [vmem:[%s7055_s20 + $0x274] ss:$52 sps:$4 sm:$0xff]   ;;  %v6170_v12 = vld [vmem:[%s7055_s20 + $0x270] ss:$52 sps:$4 sm:$0xff]  }
  0xd2   : > { %5091 = vmatpush3.bf16.msra.mxu0 %v6101_v15  ;;  %5980 = vmatpush3.bf16.msra.mxu1 %v6101_v15  ;;  %v6186_v8 = vld [vmem:[#allocation5 + $0x168] sm:$0xff]   ;;  %v6176_v14 = vld [vmem:[%s7055_s20 + $0x2dc] ss:$52 sps:$4 sm:$0xff]  }
  0xd3   : > { %5092 = vmatprep.subr.bf16.mxu0 %v6102_v16  ;;  %5973 = vmatprep.subr.bf16.mxu1 %v6102_v16  ;;  %v6189_v9 = vld [vmem:[#allocation5 + $0x128] sm:$0xff]   ;;  %v6198_v15 = vld [vmem:[#allocation5 + $0x170] sm:$0xff]  }
  0xd4   : > { %v6199_v16 = vld [vmem:[#allocation5 + $0x130] sm:$0xff]  }
  0xd6   : > { %5093 = vmatpush3.bf16.msra.mxu0 %v6103_v17  ;;  %5981 = vmatpush3.bf16.msra.mxu1 %v6103_v17  ;;  %v6178_v17 = vld [vmem:[%s7055_s20 + $0x144] ss:$52 sps:$4 sm:$0xff]  }
  0xd7   : > { %5190 = vmatprep.subr.bf16.mxu1 %v6110_v18  ;;  %5302 = vmatprep.subr.bf16.mxu0 %v6112_v21  ;;  %v6206_v18 = vld [vmem:[#allocation5 + $0x1d8] sm:$0xff]   ;;  %v6181_v21 = vld [vmem:[%s7055_s20 + $0x140] ss:$52 sps:$4 sm:$0xff]  }
  0xd9   : > { %2495 = vmatmul.mubr.bf16.vlgmr.msra.gmra.mrb[0].mxu0 %v6104_v19  ;;  %2591 = vmatmul.mubr.bf16.vlgmr.msra.gmra.mrb[0].mxu1 %v6107_v20  ;;  %v6207_v19 = vld [vmem:[#allocation5 + $0x198] sm:$0xff]  }
  0xda   : > { %5191 = vmatpush3.bf16.msra.mxu1 %v6111_v22  ;;  %5303 = vmatpush3.bf16.msra.mxu0 %v6114_v24  ;;  %v6180_v20 = vld [vmem:[%s7055_s20 + $0x2d8] ss:$52 sps:$4 sm:$0xff]  }
  0xdb   : > { %5192 = vmatprep.subr.bf16.mxu1 %v6113_v23  ;;  %2502 = vmatprep.mubr.bf16.mxu0 %v6116_v25  ;;  %v6182_v22 = vld [vmem:[%s7055_s20 + $0x344] ss:$52 sps:$4 sm:$0xff]   ;;  %v6184_v23 = vld [vmem:[%s7055_s20 + $0x1ac] ss:$52 sps:$4 sm:$0xff]  }
  0xdc   : > { %2598 = vmatprep.mubr.bf16.mxu1 %v6118_v26  ;;  %5304 = vmatprep.subr.bf16.mxu0 %v6130_v28  ;;  %v6212_v24 = vld [vmem:[#allocation5 + $0x178] sm:$0xff]   ;;  %v6222_v26 = vld [vmem:[#allocation5 + $0x1e0] sm:$0xff]  }
  0xdd   : > { %v6215_v25 = vld [vmem:[#allocation5 + $0x138] sm:$0xff]  }
  0xde   : > { %5193 = vmatpush3.bf16.msra.mxu1 %v6115_v27  ;;  %5305 = vmatpush3.bf16.msra.mxu0 %v6134_v32  ;;  %v6187_v27 = vld [vmem:[%s7055_s20 + $0x340] ss:$52 sps:$4 sm:$0xff]   ;;  %v6188_v28 = vld [vmem:[%s7055_s20 + $0x1a8] ss:$52 sps:$4 sm:$0xff]  }
  0xdf   : > { %5194 = vmatprep.subr.bf16.mxu1 %v6122_v29  ;;  %5306 = vmatprep.subr.bf16.mxu0 %v6146_v42  ;;  %v6223_v29 = vld [vmem:[#allocation5 + $0x1a0] sm:$0xff]   ;;  %v6194_v32 = vld [vmem:[%s7055_s20 + $0x214] ss:$52 sps:$4 sm:$0xff]  }
  0xe0   : > { %v6210_v42 = vld [vmem:[%s7055_s20 + $0x2e4] ss:$52 sps:$4 sm:$0xff]  }
  0xe1   : > { %2503 = vmatmul.mubr.bf16.gmra.mrb[4].mxu0 %v6120_v30  ;;  %2599 = vmatmul.mubr.bf16.gmra.mrb[4].mxu1 %v6121_v31  ;;  %v6224_v30 = vld [vmem:[#allocation5 + $0x240] sm:$0xff]  }
  0xe2   : > { %5195 = vmatpush3.bf16.msra.mxu1 %v6123_v33  ;;  %2510 = vmatprep.mubr.bf16.mxu0 %v6126_v35  ;;  %v6192_v31 = vld [vmem:[%s7055_s20 + $0x3ac] ss:$52 sps:$4 sm:$0xff]   ;;  %v6196_v33 = vld [vmem:[%s7055_s20 + $0x3a8] ss:$52 sps:$4 sm:$0xff]  }
  0xe3   : > { %5196 = vmatprep.subr.bf16.mxu1 %v6124_v34  ;;  %2606 = vmatprep.mubr.bf16.mxu1 %v6128_v36  ;;  %v6197_v34 = vld [vmem:[%s7055_s20 + $0x210] ss:$52 sps:$4 sm:$0xff]   ;;  %v6238_v35 = vld [vmem:[#allocation5 + $0x1e8] sm:$0xff]  }
  0xe4   : > { %5307 = vmatpush3.bf16.msra.mxu0 %v6148_v45  ;;  %v6239_v36 = vld [vmem:[#allocation5 + $0x1a8] sm:$0xff]  }
  0xe5   : > { %5308 = vmatprep.subr.bf16.mxu0 %v6162_v55  ;;  %v6213_v45 = vld [vmem:[%s7055_s20 + $0x478] ss:$52 sps:$4 sm:$0xff]   ;;  %v6228_v55 = vld [vmem:[%s7055_s20 + $0x7c] ss:$52 sps:$4 sm:$0xff]  }
  0xe6   : > { %5197 = vmatpush3.bf16.msra.mxu1 %v6125_v37  ;;  %v6200_v37 = vld [vmem:[%s7055_s20 + $0x414] ss:$52 sps:$4 sm:$0xff]  }
  0xe7   : > { %5198 = vmatprep.subr.bf16.mxu1 %v6133_v40  ;;  %v6205_v40 = vld [vmem:[%s7055_s20 + $0x278] ss:$52 sps:$4 sm:$0xff]  }
  0xe8   : > { %5309 = vmatpush3.bf16.msra.mxu0 %v6165_v56  ;;  %v6240_v56 = vld [vmem:[#allocation5 + $0x248] sm:$0xff]  }
  0xe9   : > { %2511 = vmatmul.mubr.bf16.gmra.mrb[8].mxu0 %v6131_v38  ;;  %2607 = vmatmul.mubr.bf16.gmra.mrb[8].mxu1 %v6132_v39  ;;  %v6202_v38 = vld [vmem:[%s7055_s20 + $0x27c] ss:$52 sps:$4 sm:$0xff]  }
  0xea   : > { %5199 = vmatpush3.bf16.msra.mxu1 %v6135_v41  ;;  %2518 = vmatprep.mubr.bf16.mxu0 %v6138_v44  ;;  %v6204_v39 = vld [vmem:[%s7055_s20 + $0x410] ss:$52 sps:$4 sm:$0xff]  }
  0xeb   : > { %5200 = vmatprep.subr.bf16.mxu1 %v6136_v43  ;;  %2614 = vmatprep.mubr.bf16.mxu1 %v6140_v46  ;;  %v6208_v41 = vld [vmem:[%s7055_s20 + $0x47c] ss:$52 sps:$4 sm:$0xff]   ;;  %v6214_v46 = vld [vmem:[%s7055_s20 + $0x2e0] ss:$52 sps:$4 sm:$0xff]  }
  0xec   : > { %5310 = vmatprep.subr.bf16.mxu0 %v6174_v0  ;;  %v6254_v43 = vld [vmem:[#allocation5 + $0x1f0] sm:$0xff]  }
  0xed   : > { %5311 = vmatpush3.bf16.msra.mxu0 %v6175_v2  ;;  %v6255_v44 = vld [vmem:[#allocation5 + $0x1b0] sm:$0xff]   ;;  %v6236_v2 = vld [vmem:[%s7055_s20 + $0x418] ss:$52 sps:$4 sm:$0xff]  }
  0xee   : > { %5201 = vmatpush3.bf16.msra.mxu1 %v6137_v47  ;;  %5312 = vmatprep.subr.bf16.mxu0 %v6186_v8  ;;  %v6216_v47 = vld [vmem:[%s7055_s20 + $0x34c] ss:$52 sps:$4 sm:$0xff]   ;;  %v6257_v0 = vld [vmem:[#allocation5 + $0x210] sm:$0xff]  }
  0xef   : > { %5202 = vmatprep.subr.bf16.mxu1 %v6144_v49  ;;  %v6270_v49 = vld [vmem:[#allocation5 + $0x1f8] sm:$0xff]   ;;  %v6289_v8 = vld [vmem:[#allocation5 + $0x220] sm:$0xff]  }
  0xf1   : > { %2519 = vmatmul.mubr.bf16.gmra.mrb[12].mxu0 %v6142_v48  ;;  %2615 = vmatmul.mubr.bf16.gmra.mrb[12].mxu1 %v6143_v50  ;;  %v6220_v48 = vld [vmem:[%s7055_s20 + $0x14] ss:$52 sps:$4 sm:$0xff]   ;;  %v6271_v50 = vld [vmem:[#allocation5 + $0x1b8] sm:$0xff]  }
  0xf2   : > { %5203 = vmatpush3.bf16.msra.mxu1 %v6145_v51  ;;  %2526 = vmatprep.mubr.bf16.mxu0 %v6150_v52  ;;  %v6218_v51 = vld [vmem:[%s7055_s20 + $0x10] ss:$52 sps:$4 sm:$0xff]   ;;  %v6221_v52 = vld [vmem:[%s7055_s20 + $0x348] ss:$52 sps:$4 sm:$0xff]  }
  0xf3   : > { %5204 = vmatprep.subr.bf16.mxu1 %v6147_v53  ;;  %2655 = vmatprep.mubr.bf16.mxu1 %v6154_v54  ;;  %v6225_v53 = vld [vmem:[#allocation5 + $0x200] sm:$0xff]   ;;  %v6226_v54 = vld [vmem:[%s7055_s20 + $0x3b4] ss:$52 sps:$4 sm:$0xff]  }
  0xf4   : > { %5313 = vmatpush3.bf16.msra.mxu0 %v6189_v9  ;;  %v6304_v9 = vld [vmem:[#allocation5 + $0x268] sm:$0xff]  }
  0xf5   : > { %5314 = vmatprep.subr.bf16.mxu0 %v6198_v15  ;;  %v6250_v15 = vld [vmem:[%s7055_s20 + $0x1b4] ss:$52 sps:$4 sm:$0xff]  }
  0xf6   : > { %5205 = vmatpush3.bf16.msra.mxu1 %v6149_v57  ;;  %v6286_v57 = vld [vmem:[#allocation5 + $0x2c0] sm:$0xff]  }
  0xf7   : > { %5414 = vmatprep.subr.bf16.mxu1 %v6156_v60  ;;  %v6230_v60 = vld [vmem:[%s7055_s20 + $0x3b0] ss:$52 sps:$4 sm:$0xff]  }
  0xf8   : > { %5315 = vmatpush3.bf16.msra.mxu0 %v6199_v16  ;;  %v6321_v16 = vld [vmem:[#allocation5 + $0x230] sm:$0xff]  }
  0xf9   : > { %2527 = vmatmul.mubr.bf16.gmra.mrb[16].mxu0 %v6155_v59  ;;  %2656 = vmatmul.mubr.bf16.vlgmr.msra.gmra.mrb[16].mxu1 %v6152_v58  ;;  %v6241_v58 = vld [vmem:[#allocation5 + $0x208] sm:$0xff]   ;;  %v6256_v59 = vld [vmem:[#allocation5 + $0x250] sm:$0xff]  }
  0xfa   : > { %5415 = vmatpush3.bf16.msra.mxu1 %v6157_v61  ;;  %2534 = vmatprep.mubr.bf16.mxu0 %v6158_v62  ;;  %v6231_v61 = vld [vmem:[%s7055_s20 + $0x78] ss:$52 sps:$4 sm:$0xff]   ;;  %v6232_v62 = vld [vmem:[%s7055_s20 + $0x41c] ss:$52 sps:$4 sm:$0xff]  }
  0xfb   : > { %2663 = vmatprep.mubr.bf16.mxu1 %v6160_v63  ;;  %5416 = vmatprep.subr.bf16.mxu1 %v6172_v1  ;;  %v6234_v63 = vld [vmem:[%s7055_s20 + $0xe4] ss:$52 sps:$4 sm:$0xff]  }
  0xfc   : > { %5316 = vmatprep.subr.bf16.mxu0 %v6212_v24  ;;  %v6272_v1 = vld [vmem:[#allocation5 + $0x258] sm:$0xff]  }
  0xfd   : > { %5317 = vmatpush3.bf16.msra.mxu0 %v6215_v25  ;;  %v6263_v24 = vld [vmem:[%s7055_s20 + $0x218] ss:$52 sps:$4 sm:$0xff]   ;;  %v6264_v25 = vld [vmem:[%s7055_s20 + $0x5bc] ss:$52 sps:$4 sm:$0xff]  }
  0xfe   : > { %5417 = vmatpush3.bf16.msra.mxu1 %v6173_v3  ;;  %5526 = vmatprep.subr.bf16.mxu0 %v6224_v30  ;;  %v6273_v3 = vld [vmem:[#allocation5 + $0x218] sm:$0xff]  }
  0xff   : > { %5418 = vmatprep.subr.bf16.mxu1 %v6190_v10  ;;  %v6246_v10 = vld [vmem:[%s7055_s20 + $0x480] ss:$52 sps:$4 sm:$0xff]   ;;  %v6274_v30 = vld [vmem:[%s7055_s20 + $0x624] ss:$52 sps:$4 sm:$0xff]  }
 0x101   : > { %2535 = vmatmul.mubr.bf16.gmra.mrb[20].mxu0 %v6163_v4  ;;  %2664 = vmatmul.mubr.bf16.gmra.mrb[20].mxu1 %v6164_v5  ;;  %v6288_v4 = vld [vmem:[#allocation5 + $0x260] sm:$0xff]  }
 0x102   : > { %2542 = vmatprep.mubr.bf16.mxu0 %v6166_v6  ;;  %2671 = vmatprep.mubr.bf16.mxu1 %v6168_v7  ;;  %v6237_v5 = vld [vmem:[%s7055_s20 + $0xe0] ss:$52 sps:$4 sm:$0xff]   ;;  %v6242_v6 = vld [vmem:[%s7055_s20 + $0x484] ss:$52 sps:$4 sm:$0xff]  }
 0x103   : > { %5419 = vmatpush3.bf16.msra.mxu1 %v6191_v11  ;;  %v6244_v7 = vld [vmem:[%s7055_s20 + $0x14c] ss:$52 sps:$4 sm:$0xff]   ;;  %v6247_v11 = vld [vmem:[%s7055_s20 + $0x148] ss:$52 sps:$4 sm:$0xff]  }
 0x104   : > { %5420 = vmatprep.subr.bf16.mxu1 %v6206_v18  ;;  %v6253_v18 = vld [vmem:[%s7055_s20 + $0x1b0] ss:$52 sps:$4 sm:$0xff]  }
 0x107   : > { %5421 = vmatpush3.bf16.msra.mxu1 %v6207_v19  ;;  %v6258_v19 = vld [vmem:[%s7055_s20 + $0x554] ss:$52 sps:$4 sm:$0xff]  }
 0x108   : > { %5422 = vmatprep.subr.bf16.mxu1 %v6222_v26  ;;  %v6266_v26 = vld [vmem:[%s7055_s20 + $0x284] ss:$52 sps:$4 sm:$0xff]  }
 0x109   : > { %2543 = vmatmul.mubr.bf16.gmra.mrb[24].mxu0 %v6170_v12  ;;  %2672 = vmatmul.mubr.bf16.gmra.mrb[24].mxu1 %v6171_v13  ;;  %v6305_v12 = vld [vmem:[#allocation5 + $0x228] sm:$0xff]   ;;  %v6320_v13 = vld [vmem:[#allocation5 + $0x270] sm:$0xff]  }
 0x10a   : > { %2550 = vmatprep.mubr.bf16.mxu0 %v6176_v14  ;;  %2679 = vmatprep.mubr.bf16.mxu1 %v6178_v17  ;;  %v6248_v14 = vld [vmem:[%s7055_s20 + $0x4ec] ss:$52 sps:$4 sm:$0xff]   ;;  %v6252_v17 = vld [vmem:[%s7055_s20 + $0x4e8] ss:$52 sps:$4 sm:$0xff]  }
 0x10b   : > { %5423 = vmatpush3.bf16.msra.mxu1 %v6223_v29  ;;  %v6269_v29 = vld [vmem:[%s7055_s20 + $0x280] ss:$52 sps:$4 sm:$0xff]  }
 0x10c   : > { %5424 = vmatprep.subr.bf16.mxu1 %v6238_v35  ;;  %v6284_v35 = vld [vmem:[%s7055_s20 + $0x1c] ss:$52 sps:$4 sm:$0xff]  }
 0x10f   : > { %5425 = vmatpush3.bf16.msra.mxu1 %v6239_v36  ;;  %v6282_v36 = vld [vmem:[%s7055_s20 + $0x18] ss:$52 sps:$4 sm:$0xff]  }
 0x110   : > { %5426 = vmatprep.subr.bf16.mxu1 %v6254_v43  ;;  %v6318_v43 = vld [vmem:[#allocation5 + $0x2d0] sm:$0xff]  }
 0x111   : > { %2551 = vmatmul.mubr.bf16.gmra.mrb[28].mxu0 %v6180_v20  ;;  %2680 = vmatmul.mubr.bf16.gmra.mrb[28].mxu1 %v6181_v21  ;;  %v6336_v20 = vld [vmem:[#allocation5 + $0x278] sm:$0xff]  }
 0x112   : > { %2558 = vmatprep.mubr.bf16.mxu0 %v6182_v22  ;;  %2687 = vmatprep.mubr.bf16.mxu1 %v6184_v23  ;;  %v6260_v21 = vld [vmem:[%s7055_s20 + $0x21c] ss:$52 sps:$4 sm:$0xff]  }
 0x113   : > { %5427 = vmatpush3.bf16.msra.mxu1 %v6255_v44  ;;  %v6337_v22 = vld [vmem:[#allocation5 + $0x238] sm:$0xff]   ;;  %v6262_v23 = vld [vmem:[%s7055_s20 + $0x550] ss:$52 sps:$4 sm:$0xff]  }
 0x114   : > { %5428 = vmatprep.subr.bf16.mxu1 %v6270_v49  ;;  %v6294_v44 = vld [vmem:[%s7055_s20 + $0x3b8] ss:$52 sps:$4 sm:$0xff]  }
 0x115   : > { %v6334_v49 = vld [vmem:[#allocation5 + $0x2d8] sm:$0xff]  }
 0x117   : > { %5429 = vmatpush3.bf16.msra.mxu1 %v6271_v50  ;;  %v6335_v50 = vld [vmem:[#allocation5 + $0x298] sm:$0xff]  }
 0x118   : > { %5638 = vmatprep.subr.bf16.mxu1 %v6286_v57  ;;  %v6365_v57 = vld [vmem:[#allocation5 + $0x2e8] sm:$0xff]  }
 0x119   : > { %2559 = vmatmul.mubr.bf16.gmra.mrb[32].mxu0 %v6187_v27  ;;  %2688 = vmatmul.mubr.bf16.gmra.mrb[32].mxu1 %v6188_v28  ;;  %v7147_v27 = vld [vmem:[#allocation5 + $0x300] sm:$0xff]   ;;  %v6268_v28 = vld [vmem:[%s7055_s20 + $0x5b8] ss:$52 sps:$4 sm:$0xff]  }
 0x11a   : > { %2566 = vmatprep.mubr.bf16.mxu0 %v6192_v31  ;;  %2695 = vmatprep.mubr.bf16.mxu1 %v6194_v32  ;;  %v6276_v31 = vld [vmem:[%s7055_s20 + $0x2ec] ss:$52 sps:$4 sm:$0xff]  }
 0x11b   : > { %v6278_v32 = vld [vmem:[%s7055_s20 + $0x620] ss:$52 sps:$4 sm:$0xff]  }
 0x121   : > { %2567 = vmatmul.mubr.bf16.gmra.mrb[36].mxu0 %v6196_v33  ;;  %2696 = vmatmul.mubr.bf16.gmra.mrb[36].mxu1 %v6197_v34  ;;  %v6279_v33 = vld [vmem:[%s7055_s20 + $0x2e8] ss:$52 sps:$4 sm:$0xff]  }
 0x122   : > { %2574 = vmatprep.mubr.bf16.mxu0 %v6200_v37  ;;  %2703 = vmatprep.mubr.bf16.mxu1 %v6202_v38  ;;  %v6280_v34 = vld [vmem:[%s7055_s20 + $0x354] ss:$52 sps:$4 sm:$0xff]   ;;  %v6285_v37 = vld [vmem:[%s7055_s20 + $0x350] ss:$52 sps:$4 sm:$0xff]  }
 0x123   : > { %v6287_v38 = vld [vmem:[#allocation5 + $0x280] sm:$0xff]  }
 0x129   : > { %2575 = vmatmul.mubr.bf16.gmra.mrb[40].mxu0 %v6204_v39  ;;  %2704 = vmatmul.mubr.bf16.gmra.mrb[40].mxu1 %v6205_v40  ;;  %v6290_v39 = vld [vmem:[%s7055_s20 + $0x3bc] ss:$52 sps:$4 sm:$0xff]   ;;  %v6292_v40 = vld [vmem:[%s7055_s20 + $0x84] ss:$52 sps:$4 sm:$0xff]  }
 0x12a   : > { %2582 = vmatprep.mubr.bf16.mxu0 %v6208_v41  ;;  %2711 = vmatprep.mubr.bf16.mxu1 %v6210_v42  ;;  %v6302_v41 = vld [vmem:[#allocation5 + $0x2c8] sm:$0xff]  }
 0x12b   : > { %v6303_v42 = vld [vmem:[#allocation5 + $0x288] sm:$0xff]  }
 0x131   : > { %2583 = vmatmul.mubr.bf16.gmra.mrb[44].mxu0 %v6213_v45  ;;  %2712 = vmatmul.mubr.bf16.gmra.mrb[44].mxu1 %v6214_v46  ;;  %v6295_v45 = vld [vmem:[%s7055_s20 + $0x80] ss:$52 sps:$4 sm:$0xff]   ;;  %v6296_v46 = vld [vmem:[%s7055_s20 + $0x424] ss:$52 sps:$4 sm:$0xff]  }
 0x132   : > { %2719 = vmatprep.mubr.bf16.mxu1 %v6216_v47  ;;  %2816 = vmatprep.mubr.bf16.mxu0 %v6220_v48  ;;  %v6298_v47 = vld [vmem:[%s7055_s20 + $0xec] ss:$52 sps:$4 sm:$0xff]   ;;  %v6319_v48 = vld [vmem:[#allocation5 + $0x290] sm:$0xff]  }
 0x139   : > { %2720 = vmatmul.mubr.bf16.gmra.mrb[48].mxu1 %v6221_v52  ;;  %2817 = vmatmul.mubr.bf16.vlgmr.msra.gmra.mrb[48].mxu0 %v6218_v51  ;;  %v6350_v51 = vld [vmem:[#allocation5 + $0x2e0] sm:$0xff]  }
 0x13a   : > { %5527 = vmatpush3.bf16.msra.mxu0 %v6225_v53  ;;  %2727 = vmatprep.mubr.bf16.mxu1 %v6226_v54  ;;  %v6300_v52 = vld [vmem:[%s7055_s20 + $0x420] ss:$52 sps:$4 sm:$0xff]   ;;  %v6301_v53 = vld [vmem:[%s7055_s20 + $0xe8] ss:$52 sps:$4 sm:$0xff]  }
 0x13b   : > { %2824 = vmatprep.mubr.bf16.mxu0 %v6228_v55  ;;  %5528 = vmatprep.subr.bf16.mxu0 %v6240_v56  ;;  %v6306_v54 = vld [vmem:[%s7055_s20 + $0x48c] ss:$52 sps:$4 sm:$0xff]   ;;  %v6308_v55 = vld [vmem:[%s7055_s20 + $0x154] ss:$52 sps:$4 sm:$0xff]  }
 0x13c   : > { %v6351_v56 = vld [vmem:[#allocation5 + $0x2a0] sm:$0xff]  }
 0x13e   : > { %5529 = vmatpush3.bf16.msra.mxu0 %v6241_v58  ;;  %v6366_v58 = vld [vmem:[#allocation5 + $0x2a8] sm:$0xff]  }
 0x13f   : > { %5530 = vmatprep.subr.bf16.mxu0 %v6256_v59  ;;  %v6310_v59 = vld [vmem:[%s7055_s20 + $0x488] ss:$52 sps:$4 sm:$0xff]  }
 0x141   : > { %2728 = vmatmul.mubr.bf16.gmra.mrb[52].mxu1 %v6230_v60  ;;  %2825 = vmatmul.mubr.bf16.gmra.mrb[52].mxu0 %v6231_v61  ;;  %v6311_v60 = vld [vmem:[%s7055_s20 + $0x150] ss:$52 sps:$4 sm:$0xff]  }
 0x142   : > { %2735 = vmatprep.mubr.bf16.mxu1 %v6232_v62  ;;  %2832 = vmatprep.mubr.bf16.mxu0 %v6234_v63  ;;  %v6380_v61 = vld [vmem:[#allocation5 + $0x2f0] sm:$0xff]  }
 0x143   : > { %5531 = vmatpush3.bf16.msra.mxu0 %v6257_v0  ;;  %v6312_v62 = vld [vmem:[%s7055_s20 + $0x4f4] ss:$52 sps:$4 sm:$0xff]   ;;  %v6314_v63 = vld [vmem:[%s7055_s20 + $0x1bc] ss:$52 sps:$4 sm:$0xff]  }
 0x144   : > { %5532 = vmatprep.subr.bf16.mxu0 %v6272_v1  ;;  %v6381_v0 = vld [vmem:[#allocation5 + $0x2b0] sm:$0xff]   ;;  %v6395_v1 = vld [vmem:[#allocation5 + $0x2f8] sm:$0xff]  }
 0x147   : > { %5533 = vmatpush3.bf16.msra.mxu0 %v6273_v3  ;;  %v6316_v3 = vld [vmem:[%s7055_s20 + $0x4f0] ss:$52 sps:$4 sm:$0xff]  }
 0x148   : > { %5534 = vmatprep.subr.bf16.mxu0 %v6288_v4  ;;  %v6317_v4 = vld [vmem:[%s7055_s20 + $0x1b8] ss:$52 sps:$4 sm:$0xff]  }
 0x149   : > { %2736 = vmatmul.mubr.bf16.gmra.mrb[56].mxu1 %v6236_v2  ;;  %2833 = vmatmul.mubr.bf16.gmra.mrb[56].mxu0 %v6237_v5  ;;  %v6396_v2 = vld [vmem:[#allocation5 + $0x2b8] sm:$0xff]  }
 0x14a   : > { %2743 = vmatprep.mubr.bf16.mxu1 %v6242_v6  ;;  %2840 = vmatprep.mubr.bf16.mxu0 %v6244_v7  ;;  %v6322_v5 = vld [vmem:[%s7055_s20 + $0x55c] ss:$52 sps:$4 sm:$0xff]   ;;  %v6324_v6 = vld [vmem:[%s7055_s20 + $0x224] ss:$52 sps:$4 sm:$0xff]  }
 0x14b   : > { %5535 = vmatpush3.bf16.msra.mxu0 %v6289_v8  ;;  %v6326_v7 = vld [vmem:[%s7055_s20 + $0x558] ss:$52 sps:$4 sm:$0xff]   ;;  %v6327_v8 = vld [vmem:[%s7055_s20 + $0x220] ss:$52 sps:$4 sm:$0xff]  }
 0x14c   : > { %5536 = vmatprep.subr.bf16.mxu0 %v6304_v9  ;;  %v6328_v9 = vld [vmem:[%s7055_s20 + $0x5c4] ss:$52 sps:$4 sm:$0xff]  }
 0x14f   : > { %5537 = vmatpush3.bf16.msra.mxu0 %v6305_v12  ;;  %v6333_v12 = vld [vmem:[%s7055_s20 + $0x288] ss:$52 sps:$4 sm:$0xff]  }
 0x150   : > { %5538 = vmatprep.subr.bf16.mxu0 %v6320_v13  ;;  %v6338_v13 = vld [vmem:[%s7055_s20 + $0x62c] ss:$52 sps:$4 sm:$0xff]  }
 0x151   : > { %2744 = vmatmul.mubr.bf16.gmra.mrb[60].mxu1 %v6246_v10  ;;  %2841 = vmatmul.mubr.bf16.gmra.mrb[60].mxu0 %v6247_v11  ;;  %v6330_v10 = vld [vmem:[%s7055_s20 + $0x28c] ss:$52 sps:$4 sm:$0xff]  }
 0x152   : > { %2751 = vmatprep.mubr.bf16.mxu1 %v6248_v14  ;;  %2848 = vmatprep.mubr.bf16.mxu0 %v6250_v15  ;;  %v6332_v11 = vld [vmem:[%s7055_s20 + $0x5c0] ss:$52 sps:$4 sm:$0xff]   ;;  %v6342_v15 = vld [vmem:[%s7055_s20 + $0x628] ss:$52 sps:$4 sm:$0xff]  }
 0x153   : > { %5539 = vmatpush3.bf16.msra.mxu0 %v6321_v16  ;;  %v6340_v14 = vld [vmem:[%s7055_s20 + $0x2f4] ss:$52 sps:$4 sm:$0xff]  }
 0x154   : > { %5540 = vmatprep.subr.bf16.mxu0 %v6336_v20 }
 0x157   : > { %5541 = vmatpush3.bf16.msra.mxu0 %v6337_v22 }
 0x158   : > { %5822 = vmatprep.subr.bf16.mxu0 %v7147_v27 }
 0x159   : > { %2752 = vmatmul.mubr.bf16.gmra.mrb[64].mxu1 %v6252_v17  ;;  %2849 = vmatmul.mubr.bf16.gmra.mrb[64].mxu0 %v6253_v18  ;;  %v6343_v18 = vld [vmem:[%s7055_s20 + $0x2f0] ss:$52 sps:$4 sm:$0xff]  }
 0x15a   : > { %2759 = vmatprep.mubr.bf16.mxu1 %v6258_v19  ;;  %2856 = vmatprep.mubr.bf16.mxu0 %v6260_v21 }
 0x161   : > { %2760 = vmatmul.mubr.bf16.gmra.mrb[68].mxu1 %v6262_v23  ;;  %2857 = vmatmul.mubr.bf16.gmra.mrb[68].mxu0 %v6263_v24 }
 0x162   : > { %2767 = vmatprep.mubr.bf16.mxu1 %v6264_v25  ;;  %2864 = vmatprep.mubr.bf16.mxu0 %v6266_v26  ;;  %v6344_v25 = vld [vmem:[%s7055_s20 + $0x35c] ss:$52 sps:$4 sm:$0xff]   ;;  %v6348_v26 = vld [vmem:[%s7055_s20 + $0x24] ss:$52 sps:$4 sm:$0xff]  }
 0x169   : > { %2768 = vmatmul.mubr.bf16.gmra.mrb[72].mxu1 %v6268_v28  ;;  %2865 = vmatmul.mubr.bf16.gmra.mrb[72].mxu0 %v6269_v29 }
 0x16a   : > { %2775 = vmatprep.mubr.bf16.mxu1 %v6274_v30  ;;  %2872 = vmatprep.mubr.bf16.mxu0 %v6276_v31 }
 0x171   : > { %2776 = vmatmul.mubr.bf16.gmra.mrb[76].mxu1 %v6278_v32  ;;  %2873 = vmatmul.mubr.bf16.gmra.mrb[76].mxu0 %v6279_v33 }
 0x172   : > { %2880 = vmatprep.mubr.bf16.mxu0 %v6280_v34  ;;  %2977 = vmatprep.mubr.bf16.mxu1 %v6284_v35 }
 0x179   : > { %2881 = vmatmul.mubr.bf16.gmra.mrb[80].mxu0 %v6285_v37  ;;  %2978 = vmatmul.mubr.bf16.vlgmr.msra.gmra.mrb[80].mxu1 %v6282_v36  ;;  %v6346_v36 = vld [vmem:[%s7055_s20 + $0x20] ss:$52 sps:$4 sm:$0xff]   ;;  %v6349_v37 = vld [vmem:[%s7055_s20 + $0x358] ss:$52 sps:$4 sm:$0xff]  }
 0x17a   : > { %5639 = vmatpush3.bf16.msra.mxu1 %v6287_v38  ;;  %2888 = vmatprep.mubr.bf16.mxu0 %v6290_v39 }
 0x17b   : > { %2985 = vmatprep.mubr.bf16.mxu1 %v6292_v40  ;;  %5640 = vmatprep.subr.bf16.mxu1 %v6302_v41 }
 0x17e   : > { %5641 = vmatpush3.bf16.msra.mxu1 %v6303_v42  ;;  %v6353_v42 = vld [vmem:[%s7055_s20 + $0x3c4] ss:$52 sps:$4 sm:$0xff]  }
 0x17f   : > { %5642 = vmatprep.subr.bf16.mxu1 %v6318_v43 }
 0x181   : > { %2889 = vmatmul.mubr.bf16.gmra.mrb[84].mxu0 %v6294_v44  ;;  %2986 = vmatmul.mubr.bf16.gmra.mrb[84].mxu1 %v6295_v45  ;;  %v6355_v45 = vld [vmem:[%s7055_s20 + $0x8c] ss:$52 sps:$4 sm:$0xff]  }
 0x182   : > { %2896 = vmatprep.mubr.bf16.mxu0 %v6296_v46  ;;  %2993 = vmatprep.mubr.bf16.mxu1 %v6298_v47  ;;  %v6367_v46 = vld [vmem:[#allocation5 + $0x308] sm:$0xff]  }
 0x183   : > { %5643 = vmatpush3.bf16.msra.mxu1 %v6319_v48 }
 0x184   : > { %5644 = vmatprep.subr.bf16.mxu1 %v6334_v49  ;;  %v6382_v49 = vld [vmem:[#allocation5 + $0x310] sm:$0xff]  }
 0x187   : > { %5645 = vmatpush3.bf16.msra.mxu1 %v6335_v50 }
 0x188   : > { %5646 = vmatprep.subr.bf16.mxu1 %v6350_v51 }
 0x189   : > { %2897 = vmatmul.mubr.bf16.gmra.mrb[88].mxu0 %v6300_v52  ;;  %2994 = vmatmul.mubr.bf16.gmra.mrb[88].mxu1 %v6301_v53 }
 0x18a   : > { %2904 = vmatprep.mubr.bf16.mxu0 %v6306_v54  ;;  %3001 = vmatprep.mubr.bf16.mxu1 %v6308_v55  ;;  %v6357_v54 = vld [vmem:[%s7055_s20 + $0x3c0] ss:$52 sps:$4 sm:$0xff]   ;;  %v6358_v55 = vld [vmem:[%s7055_s20 + $0x88] ss:$52 sps:$4 sm:$0xff]  }
 0x18b   : > { %5647 = vmatpush3.bf16.msra.mxu1 %v6351_v56 }
 0x18c   : > { %5648 = vmatprep.subr.bf16.mxu1 %v6365_v57 }
 0x18f   : > { %5649 = vmatpush3.bf16.msra.mxu1 %v6366_v58 }
 0x190   : > { %5650 = vmatprep.subr.bf16.mxu1 %v6380_v61  ;;  %v6361_v61 = vld [vmem:[%s7055_s20 + $0xf4] ss:$52 sps:$4 sm:$0xff]  }
 0x191   : > { %2905 = vmatmul.mubr.bf16.gmra.mrb[92].mxu0 %v6310_v59  ;;  %3002 = vmatmul.mubr.bf16.gmra.mrb[92].mxu1 %v6311_v60  ;;  %v6359_v60 = vld [vmem:[%s7055_s20 + $0x42c] ss:$52 sps:$4 sm:$0xff]  }
 0x192   : > { %2912 = vmatprep.mubr.bf16.mxu0 %v6312_v62  ;;  %3009 = vmatprep.mubr.bf16.mxu1 %v6314_v63 }
 0x193   : > { %5651 = vmatpush3.bf16.msra.mxu1 %v6381_v0 }
 0x194   : > { %5652 = vmatprep.subr.bf16.mxu1 %v6395_v1  ;;  %v6397_v1 = vld [vmem:[#allocation5 + $0x318] sm:$0xff]  }
 0x197   : > { %5653 = vmatpush3.bf16.msra.mxu1 %v6396_v2 }
 0x199   : > { %2913 = vmatmul.mubr.bf16.gmra.mrb[96].mxu0 %v6316_v3  ;;  %3010 = vmatmul.mubr.bf16.gmra.mrb[96].mxu1 %v6317_v4  ;;  %v6410_v4 = vld [vmem:[#allocation5 + $0x320] sm:$0xff]  }
 0x19a   : > { %2920 = vmatprep.mubr.bf16.mxu0 %v6322_v5  ;;  %3017 = vmatprep.mubr.bf16.mxu1 %v6324_v6 }
 0x1a1   : > { %2921 = vmatmul.mubr.bf16.gmra.mrb[100].mxu0 %v6326_v7  ;;  %3018 = vmatmul.mubr.bf16.gmra.mrb[100].mxu1 %v6327_v8  ;;  %v6363_v7 = vld [vmem:[%s7055_s20 + $0x428] ss:$52 sps:$4 sm:$0xff]   ;;  %v6364_v8 = vld [vmem:[%s7055_s20 + $0xf0] ss:$52 sps:$4 sm:$0xff]  }
 0x1a2   : > { %2928 = vmatprep.mubr.bf16.mxu0 %v6328_v9  ;;  %3025 = vmatprep.mubr.bf16.mxu1 %v6330_v10 }
 0x1a9   : > { %2929 = vmatmul.mubr.bf16.gmra.mrb[104].mxu0 %v6332_v11  ;;  %3026 = vmatmul.mubr.bf16.gmra.mrb[104].mxu1 %v6333_v12 }
 0x1aa   : > { %2936 = vmatprep.mubr.bf16.mxu0 %v6338_v13  ;;  %3033 = vmatprep.mubr.bf16.mxu1 %v6340_v14  ;;  %v6368_v13 = vld [vmem:[%s7055_s20 + $0x494] ss:$52 sps:$4 sm:$0xff]   ;;  %v6370_v14 = vld [vmem:[%s7055_s20 + $0x15c] ss:$52 sps:$4 sm:$0xff]  }
 0x1ac   : > { %v5166_v16 = vpop.f32.mrb[0].mxu1  ;;  %v5094_v17 = vpop.f32.mrb[0].mxu0 }
 0x1ad   : > { %v5167_v19 = vpop.f32.mrb[1].mxu1  ;;  %v5095_v20 = vpop.f32.mrb[1].mxu0 }
 0x1ae   : > { %v7188_v21 = vadd.f32 %v5167_v19, %v5166_v16  ;;  %v7190_v22 = vadd.f32 %v5095_v20, %v5094_v17  ;;  %v5169_v23 = vpop.f32.mrb[2].mxu1  ;;  %v5097_v24 = vpop.f32.mrb[2].mxu0  ;;  %v6423_v19 = vld [vmem:[#allocation5 + $0x328] sm:$0xff]   ;;  %v7235_v20 = vld [vmem:[#allocation7] ss:$0 sm:$0xff] }
 0x1af   : > { %v5170_v28 = vpop.f32.mrb[3].mxu1  ;;  %v5098_v29 = vpop.f32.mrb[3].mxu0 }
 0x1b0   : > { %v7194_v30 = vadd.f32 %v5170_v28, %v5169_v23  ;;  %v7196_v31 = vadd.f32 %v5098_v29, %v5097_v24  ;;  %v6372_v29 = vld [vmem:[%s7055_s20 + $0x490] ss:$52 sps:$4 sm:$0xff]  }
 0x1b1   : > { %2937 = vmatmul.mubr.bf16.gmra.mrb[108].mxu0 %v6342_v15  ;;  %3034 = vmatmul.mubr.bf16.gmra.mrb[108].mxu1 %v6343_v18 }
 0x1b2   : > { %3041 = vmatprep.mubr.bf16.mxu1 %v6344_v25  ;;  %3138 = vmatprep.mubr.bf16.mxu0 %v6348_v26  ;;  %v6436_v25 = vld [vmem:[#allocation5 + $0x330] sm:$0xff]  }
 0x1b4   : > { %v5172_v32 = vpop.f32.mrb[4].mxu1  ;;  %v5100_v33 = vpop.f32.mrb[4].mxu0 }
 0x1b5   : > { %v5173_v34 = vpop.f32.mrb[5].mxu1  ;;  %v5101_v35 = vpop.f32.mrb[5].mxu0 }
 0x1b6   : > { %v7200_v38 = vadd.f32 %v5173_v34, %v5172_v32  ;;  %v7202_v39 = vadd.f32 %v5101_v35, %v5100_v33  ;;  %v5175_v40 = vpop.f32.mrb[6].mxu1  ;;  %v5103_v41 = vpop.f32.mrb[6].mxu0  ;;  %v6373_v32 = vld [vmem:[%s7055_s20 + $0x158] ss:$52 sps:$4 sm:$0xff]   ;;  %v2497_v33 = vadd.f32 %v7190_v22, %v7235_v20 }
 0x1b7   : > { %v5176_v43 = vpop.f32.mrb[7].mxu1  ;;  %v5104_v44 = vpop.f32.mrb[7].mxu0  ;;  %v6449_v22 = vld [vmem:[#allocation5 + $0x338] sm:$0xff]  }
 0x1b8   : > { %v7206_v47 = vadd.f32 %v5176_v43, %v5175_v40  ;;  %v7208_v48 = vadd.f32 %v5104_v44, %v5103_v41  ;;  %v6374_v40 = vld [vmem:[%s7055_s20 + $0x4fc] ss:$52 sps:$4 sm:$0xff]   ;;  %v6376_v41 = vld [vmem:[%s7055_s20 + $0x1c4] ss:$52 sps:$4 sm:$0xff]   ;;  %v2500_v44 = vadd.f32 %v7196_v31, %v7235_v20 }
 0x1b9   : > { %3042 = vmatmul.mubr.bf16.gmra.mrb[112].mxu1 %v6349_v37  ;;  %3139 = vmatmul.mubr.bf16.vlgmr.msra.gmra.mrb[112].mxu0 %v6346_v36 }
 0x1ba   : > { %5823 = vmatpush3.bf16.msra.mxu0 %v7147_v27  ;;  %3049 = vmatprep.mubr.bf16.mxu1 %v6353_v42 }
 0x1bb   : > { %3146 = vmatprep.mubr.bf16.mxu0 %v6355_v45  ;;  %5824 = vmatprep.subr.bf16.mxu0 %v6367_v46 }
 0x1bc   : > { %v5178_v50 = vpop.f32.mrb[8].mxu1  ;;  %v5106_v51 = vpop.f32.mrb[8].mxu0 }
 0x1bd   : > { %v5179_v52 = vpop.f32.mrb[9].mxu1  ;;  %v5107_v53 = vpop.f32.mrb[9].mxu0 }
 0x1be   : > { %v7213_v56 = vadd.f32 %v5179_v52, %v5178_v50  ;;  %v7215_v57 = vadd.f32 %v5107_v53, %v5106_v51  ;;  %v5181_v58 = vpop.f32.mrb[10].mxu1  ;;  %v5109_v59 = vpop.f32.mrb[10].mxu0  ;;  %5825 = vmatpush3.bf16.msra.mxu0 %v6367_v46 }
 0x1bf   : > { %v5182_v27 = vpop.f32.mrb[11].mxu1  ;;  %v5110_v62 = vpop.f32.mrb[11].mxu0  ;;  %5826 = vmatprep.subr.bf16.mxu0 %v6382_v49 }
 0x1c0   : > { %v7219_v63 = vadd.f32 %v5182_v27, %v5181_v58  ;;  %v7221_v0 = vadd.f32 %v5110_v62, %v5109_v59  ;;  %v2505_v58 = vadd.f32 %v7202_v39, %v7235_v20  ;;  %v6383_v62 = vld [vmem:[%s7055_s20 + $0x564] ss:$52 sps:$4 sm:$0xff]  }
 0x1c1   : > { %3050 = vmatmul.mubr.bf16.gmra.mrb[116].mxu1 %v6357_v54  ;;  %3147 = vmatmul.mubr.bf16.gmra.mrb[116].mxu0 %v6358_v55  ;;  %v6378_v54 = vld [vmem:[%s7055_s20 + $0x4f8] ss:$52 sps:$4 sm:$0xff]   ;;  %v6379_v55 = vld [vmem:[%s7055_s20 + $0x1c0] ss:$52 sps:$4 sm:$0xff]  }
 0x1c2   : > { %3057 = vmatprep.mubr.bf16.mxu1 %v6359_v60  ;;  %3154 = vmatprep.mubr.bf16.mxu0 %v6361_v61 }
 0x1c3   : > { %5827 = vmatpush3.bf16.msra.mxu0 %v6382_v49 }
 0x1c4   : > { %v5184_v2 = vpop.f32.mrb[12].mxu1  ;;  %v5112_v3 = vpop.f32.mrb[12].mxu0  ;;  %5828 = vmatprep.subr.bf16.mxu0 %v6397_v1 }
 0x1c5   : > { %v5185_v5 = vpop.f32.mrb[13].mxu1  ;;  %v5113_v6 = vpop.f32.mrb[13].mxu0 }
 0x1c6   : > { %v7225_v9 = vadd.f32 %v5185_v5, %v5184_v2  ;;  %v7227_v10 = vadd.f32 %v5113_v6, %v5112_v3  ;;  %v5187_v11 = vpop.f32.mrb[14].mxu1  ;;  %v5115_v12 = vpop.f32.mrb[14].mxu0 }
 0x1c7   : > { %v5188_v15 = vpop.f32.mrb[15].mxu1  ;;  %v5116_v16 = vpop.f32.mrb[15].mxu0  ;;  %5829 = vmatpush3.bf16.msra.mxu0 %v6397_v1  ;;  %v6385_v1 = vld [vmem:[%s7055_s20 + $0x22c] ss:$52 sps:$4 sm:$0xff]  }
 0x1c8   : > { %v7231_v17 = vadd.f32 %v5188_v15, %v5187_v11  ;;  %v7233_v18 = vadd.f32 %v5116_v16, %v5115_v12  ;;  %5830 = vmatprep.subr.bf16.mxu0 %v6410_v4  ;;  %v6388_v15 = vld [vmem:[%s7055_s20 + $0x228] ss:$52 sps:$4 sm:$0xff]  }
 0x1c9   : > { %3058 = vmatmul.mubr.bf16.gmra.mrb[120].mxu1 %v6363_v7  ;;  %3155 = vmatmul.mubr.bf16.gmra.mrb[120].mxu0 %v6364_v8 }
 0x1ca   : > { %3065 = vmatprep.mubr.bf16.mxu1 %v6368_v13  ;;  %3162 = vmatprep.mubr.bf16.mxu0 %v6370_v14  ;;  %v6387_v14 = vld [vmem:[%s7055_s20 + $0x560] ss:$52 sps:$4 sm:$0xff]  }
 0x1cb   : > { %5831 = vmatpush3.bf16.msra.mxu0 %v6410_v4  ;;  %v2508_v4 = vadd.f32 %v7208_v48, %v7235_v20  ;;  %v2513_v48 = vadd.f32 %v7215_v57, %v7235_v20 }
 0x1cc   : > { %v5206_v23 = vpop.f32.mrb[16].mxu1  ;;  %v5118_v24 = vpop.f32.mrb[16].mxu0  ;;  %5832 = vmatprep.subr.bf16.mxu0 %v6423_v19 }
 0x1cd   : > { %v5207_v26 = vpop.f32.mrb[17].mxu1  ;;  %v5119_v28 = vpop.f32.mrb[17].mxu0 }
 0x1ce   : > { %v5208_v34 = vadd.f32 %v5207_v26, %v5206_v23  ;;  %v7241_v35 = vadd.f32 %v5119_v28, %v5118_v24  ;;  %v5209_v36 = vpop.f32.mrb[18].mxu1  ;;  %v5121_v37 = vpop.f32.mrb[18].mxu0  ;;  %v6391_v26 = vld [vmem:[%s7055_s20 + $0x294] ss:$52 sps:$4 sm:$0xff]  }
 0x1cf   : > { %v5210_v42 = vpop.f32.mrb[19].mxu1  ;;  %v5122_v43 = vpop.f32.mrb[19].mxu0  ;;  %5833 = vmatpush3.bf16.msra.mxu0 %v6423_v19 }
 0x1d0   : > { %v7247_v45 = vadd.f32 %v5208_v34, %v2497_v33  ;;  %v5211_v46 = vadd.f32 %v5210_v42, %v5209_v36  ;;  %v7249_v49 = vadd.f32 %v5122_v43, %v5121_v37  ;;  %5834 = vmatprep.subr.bf16.mxu0 %v6436_v25  ;;  %v6393_v43 = vld [vmem:[%s7055_s20 + $0x5c8] ss:$52 sps:$4 sm:$0xff]  }
 0x1d1   : > { %3066 = vmatmul.mubr.bf16.gmra.mrb[124].mxu1 %v6372_v29  ;;  %3163 = vmatmul.mubr.bf16.gmra.mrb[124].mxu0 %v6373_v32  ;;  %v2516_v32 = vadd.f32 %v7221_v0, %v7235_v20  ;;  %v2521_v0 = vadd.f32 %v7227_v10, %v7235_v20 }
 0x1d2   : > { %v7251_v50 = vadd.f32 %v5211_v46, %v2500_v44  ;;  %3073 = vmatprep.mubr.bf16.mxu1 %v6374_v40  ;;  %3170 = vmatprep.mubr.bf16.mxu0 %v6376_v41  ;;  %v6394_v44 = vld [vmem:[%s7055_s20 + $0x290] ss:$52 sps:$4 sm:$0xff]  }
 0x1d3   : > { %5835 = vmatpush3.bf16.msra.mxu0 %v6436_v25  ;;  %v6389_v25 = vld [vmem:[%s7055_s20 + $0x5cc] ss:$52 sps:$4 sm:$0xff]  }
 0x1d4   : > { %v5212_v51 = vpop.f32.mrb[20].mxu1  ;;  %v5124_v31 = vpop.f32.mrb[20].mxu0  ;;  %5836 = vmatprep.subr.bf16.mxu0 %v6449_v22 }
 0x1d5   : > { %v5213_v52 = vpop.f32.mrb[21].mxu1  ;;  %v5125_v53 = vpop.f32.mrb[21].mxu0 }
 0x1d6   : > { %v5214_v59 = vadd.f32 %v5213_v52, %v5212_v51  ;;  %v7257_v60 = vadd.f32 %v5125_v53, %v5124_v31  ;;  %v5215_v61 = vpop.f32.mrb[22].mxu1  ;;  %v5127_v27 = vpop.f32.mrb[22].mxu0  ;;  %v6398_v52 = vld [vmem:[%s7055_s20 + $0x634] ss:$52 sps:$4 sm:$0xff]   ;;  %v6400_v53 = vld [vmem:[%s7055_s20 + $0x2fc] ss:$52 sps:$4 sm:$0xff]  }
 0x1d7   : > { %v5216_v2 = vpop.f32.mrb[23].mxu1  ;;  %v5128_v3 = vpop.f32.mrb[23].mxu0  ;;  %5837 = vmatpush3.bf16.msra.mxu0 %v6449_v22 }
 0x1d8   : > { %v7263_v5 = vadd.f32 %v5214_v59, %v2505_v58  ;;  %v5217_v6 = vadd.f32 %v5216_v2, %v5215_v61  ;;  %v7265_v7 = vadd.f32 %v5128_v3, %v5127_v27  ;;  %v2524_v58 = vadd.f32 %v7233_v18, %v7235_v20 }
 0x1d9   : > { %3074 = vmatmul.mubr.bf16.gmra.mrb[128].mxu1 %v6378_v54  ;;  %3171 = vmatmul.mubr.bf16.gmra.mrb[128].mxu0 %v6379_v55  ;;  %v2529_v18 = vadd.f32 %v7241_v35, %v7235_v20 }
 0x1da   : > { %v7267_v39 = vadd.f32 %v5217_v6, %v2508_v4  ;;  %3081 = vmatprep.mubr.bf16.mxu1 %v6383_v62  ;;  %3178 = vmatprep.mubr.bf16.mxu0 %v6385_v1  ;;  %v6402_v4 = vld [vmem:[%s7055_s20 + $0x630] ss:$52 sps:$4 sm:$0xff]   ;;  %v6403_v6 = vld [vmem:[%s7055_s20 + $0x2f8] ss:$52 sps:$4 sm:$0xff]  }
 0x1dc   : > { %v5218_v8 = vpop.f32.mrb[24].mxu1  ;;  %v5130_v11 = vpop.f32.mrb[24].mxu0 }
 0x1dd   : > { %v5219_v12 = vpop.f32.mrb[25].mxu1  ;;  %v5131_v13 = vpop.f32.mrb[25].mxu0 }
 0x1de   : > { %v5220_v16 = vadd.f32 %v5219_v12, %v5218_v8  ;;  %v7273_v19 = vadd.f32 %v5131_v13, %v5130_v11  ;;  %v5221_v23 = vpop.f32.mrb[26].mxu1  ;;  %v5133_v24 = vpop.f32.mrb[26].mxu0 }
 0x1df   : > { %v5222_v28 = vpop.f32.mrb[27].mxu1  ;;  %v5134_v29 = vpop.f32.mrb[27].mxu0 }
 0x1e0   : > { %v7279_v33 = vadd.f32 %v5220_v16, %v2513_v48  ;;  %v5223_v34 = vadd.f32 %v5222_v28, %v5221_v23  ;;  %v7281_v36 = vadd.f32 %v5134_v29, %v5133_v24  ;;  %v2532_v23 = vadd.f32 %v7249_v49, %v7235_v20 }
 0x1e1   : > { %3082 = vmatmul.mubr.bf16.gmra.mrb[132].mxu1 %v6387_v14  ;;  %3179 = vmatmul.mubr.bf16.gmra.mrb[132].mxu0 %v6388_v15  ;;  %v6404_v14 = vld [vmem:[%s7055_s20 + $0x364] ss:$52 sps:$4 sm:$0xff]   ;;  %v6408_v15 = vld [vmem:[%s7055_s20 + $0x2c] ss:$52 sps:$4 sm:$0xff]   ;;  %v2537_v49 = vadd.f32 %v7257_v60, %v7235_v20 }
 0x1e2   : > { %v7283_v57 = vadd.f32 %v5223_v34, %v2516_v32  ;;  %3089 = vmatprep.mubr.bf16.mxu1 %v6389_v25  ;;  %3186 = vmatprep.mubr.bf16.mxu0 %v6391_v26 }
 0x1e4   : > { %v5224_v37 = vpop.f32.mrb[28].mxu1  ;;  %v5136_v40 = vpop.f32.mrb[28].mxu0 }
 0x1e5   : > { %v5225_v41 = vpop.f32.mrb[29].mxu1  ;;  %v5137_v42 = vpop.f32.mrb[29].mxu0 }
 0x1e6   : > { %v5226_v46 = vadd.f32 %v5225_v41, %v5224_v37  ;;  %v7289_v22 = vadd.f32 %v5137_v42, %v5136_v40  ;;  %v5227_v51 = vpop.f32.mrb[30].mxu1  ;;  %v5139_v31 = vpop.f32.mrb[30].mxu0  ;;  %v6406_v37 = vld [vmem:[%s7055_s20 + $0x28] ss:$52 sps:$4 sm:$0xff]   ;;  %v6409_v40 = vld [vmem:[%s7055_s20 + $0x360] ss:$52 sps:$4 sm:$0xff]  }
 0x1e7   : > { %v5228_v54 = vpop.f32.mrb[31].mxu1  ;;  %v5140_v55 = vpop.f32.mrb[31].mxu0 }
 0x1e8   : > { %v7295_v59 = vadd.f32 %v5226_v46, %v2521_v0  ;;  %v5229_v61 = vadd.f32 %v5228_v54, %v5227_v51  ;;  %v7297_v27 = vadd.f32 %v5140_v55, %v5139_v31  ;;  %v6411_v0 = vld [vmem:[%s7055_s20 + $0x3cc] ss:$52 sps:$4 sm:$0xff]   ;;  %v6413_v46 = vld [vmem:[%s7055_s20 + $0x94] ss:$52 sps:$4 sm:$0xff]  }
 0x1e9   : > { %3090 = vmatmul.mubr.bf16.gmra.mrb[136].mxu1 %v6393_v43  ;;  %3187 = vmatmul.mubr.bf16.gmra.mrb[136].mxu0 %v6394_v44 }
 0x1ea   : > { %v7299_v10 = vadd.f32 %v5229_v61, %v2524_v58  ;;  %3097 = vmatprep.mubr.bf16.mxu1 %v6398_v52  ;;  %3194 = vmatprep.mubr.bf16.mxu0 %v6400_v53  ;;  %v2540_v52 = vadd.f32 %v7265_v7, %v7235_v20  ;;  %v2545_v7 = vadd.f32 %v7273_v19, %v7235_v20 }
 0x1ec   : > { %v5230_v62 = vpop.f32.mrb[32].mxu1  ;;  %v5142_v1 = vpop.f32.mrb[32].mxu0 }
 0x1ed   : > { %v5231_v2 = vpop.f32.mrb[33].mxu1  ;;  %v5143_v3 = vpop.f32.mrb[33].mxu0 }
 0x1ee   : > { %v5232_v8 = vadd.f32 %v5231_v2, %v5230_v62  ;;  %v7305_v11 = vadd.f32 %v5143_v3, %v5142_v1  ;;  %v5233_v12 = vpop.f32.mrb[34].mxu1  ;;  %v5145_v13 = vpop.f32.mrb[34].mxu0  ;;  %v6415_v2 = vld [vmem:[%s7055_s20 + $0x3c8] ss:$52 sps:$4 sm:$0xff]   ;;  %v6416_v3 = vld [vmem:[%s7055_s20 + $0x90] ss:$52 sps:$4 sm:$0xff]  }
 0x1ef   : > { %v5234_v48 = vpop.f32.mrb[35].mxu1  ;;  %v5146_v16 = vpop.f32.mrb[35].mxu0 }
 0x1f0   : > { %v7311_v24 = vadd.f32 %v5232_v8, %v2529_v18  ;;  %v5235_v25 = vadd.f32 %v5234_v48, %v5233_v12  ;;  %v7313_v26 = vadd.f32 %v5146_v16, %v5145_v13  ;;  %v6417_v12 = vld [vmem:[%s7055_s20 + $0x434] ss:$52 sps:$4 sm:$0xff]   ;;  %v6419_v13 = vld [vmem:[%s7055_s20 + $0xfc] ss:$52 sps:$4 sm:$0xff]   ;;  %v2548_v48 = vadd.f32 %v7281_v36, %v7235_v20 }
 0x1f1   : > { %3098 = vmatmul.mubr.bf16.gmra.mrb[140].mxu1 %v6402_v4  ;;  %3195 = vmatmul.mubr.bf16.gmra.mrb[140].mxu0 %v6403_v6  ;;  %v2553_v36 = vadd.f32 %v7289_v22, %v7235_v20 }
 0x1f2   : > { %v7315_v35 = vadd.f32 %v5235_v25, %v2532_v23  ;;  %3202 = vmatprep.mubr.bf16.mxu0 %v6404_v14  ;;  %3299 = vmatprep.mubr.bf16.mxu1 %v6408_v15 }
 0x1f4   : > { %v5236_v28 = vpop.f32.mrb[36].mxu1  ;;  %v5148_v29 = vpop.f32.mrb[36].mxu0 }
 0x1f5   : > { %v5237_v32 = vpop.f32.mrb[37].mxu1  ;;  %v5149_v34 = vpop.f32.mrb[37].mxu0 }
 0x1f6   : > { %v5238_v41 = vadd.f32 %v5237_v32, %v5236_v28  ;;  %v7321_v42 = vadd.f32 %v5149_v34, %v5148_v29  ;;  %v5239_v43 = vpop.f32.mrb[38].mxu1  ;;  %v5151_v44 = vpop.f32.mrb[38].mxu0 }
 0x1f7   : > { %v5240_v51 = vpop.f32.mrb[39].mxu1  ;;  %v5152_v31 = vpop.f32.mrb[39].mxu0 }
 0x1f8   : > { %v7327_v53 = vadd.f32 %v5238_v41, %v2537_v49  ;;  %v5241_v54 = vadd.f32 %v5240_v51, %v5239_v43  ;;  %v7329_v55 = vadd.f32 %v5152_v31, %v5151_v44 }
 0x1f9   : > { %3203 = vmatmul.mubr.bf16.gmra.mrb[144].mxu0 %v6409_v40  ;;  %3300 = vmatmul.mubr.bf16.vlgmr.msra.gmra.mrb[144].mxu1 %v6406_v37  ;;  %v6421_v37 = vld [vmem:[%s7055_s20 + $0x430] ss:$52 sps:$4 sm:$0xff]   ;;  %v6422_v40 = vld [vmem:[%s7055_s20 + $0xf8] ss:$52 sps:$4 sm:$0xff]  }
 0x1fa   : > { %v7331_v60 = vadd.f32 %v5241_v54, %v2540_v52  ;;  %3210 = vmatprep.mubr.bf16.mxu0 %v6411_v0  ;;  %3307 = vmatprep.mubr.bf16.mxu1 %v6413_v46  ;;  %v6424_v0 = vld [vmem:[%s7055_s20 + $0x49c] ss:$52 sps:$4 sm:$0xff]   ;;  %v6426_v46 = vld [vmem:[%s7055_s20 + $0x164] ss:$52 sps:$4 sm:$0xff]   ;;  %v2556_v52 = vadd.f32 %v7297_v27, %v7235_v20  ;;  %v2561_v27 = vadd.f32 %v7305_v11, %v7235_v20 }
 0x1fc   : > { %v5242_v58 = vpop.f32.mrb[40].mxu1  ;;  %v5154_v61 = vpop.f32.mrb[40].mxu0 }
 0x1fd   : > { %v5243_v62 = vpop.f32.mrb[41].mxu1  ;;  %v5155_v1 = vpop.f32.mrb[41].mxu0 }
 0x1fe   : > { %v5244_v4 = vadd.f32 %v5243_v62, %v5242_v58  ;;  %v7337_v6 = vadd.f32 %v5155_v1, %v5154_v61  ;;  %v5245_v18 = vpop.f32.mrb[42].mxu1  ;;  %v5157_v8 = vpop.f32.mrb[42].mxu0 }
 0x1ff   : > { %v5246_v14 = vpop.f32.mrb[43].mxu1  ;;  %v5158_v15 = vpop.f32.mrb[43].mxu0 }
 0x200   : > { %v7343_v16 = vadd.f32 %v5244_v4, %v2545_v7  ;;  %v5247_v23 = vadd.f32 %v5246_v14, %v5245_v18  ;;  %v7345_v25 = vadd.f32 %v5158_v15, %v5157_v8  ;;  %v6428_v7 = vld [vmem:[%s7055_s20 + $0x498] ss:$52 sps:$4 sm:$0xff]   ;;  %v6429_v4 = vld [vmem:[%s7055_s20 + $0x160] ss:$52 sps:$4 sm:$0xff]  }
 0x201   : > { %3211 = vmatmul.mubr.bf16.gmra.mrb[148].mxu0 %v6415_v2  ;;  %3308 = vmatmul.mubr.bf16.gmra.mrb[148].mxu1 %v6416_v3  ;;  %v6430_v14 = vld [vmem:[%s7055_s20 + $0x504] ss:$52 sps:$4 sm:$0xff]   ;;  %v6432_v15 = vld [vmem:[%s7055_s20 + $0x1cc] ss:$52 sps:$4 sm:$0xff]  }
 0x202   : > { %v7347_v19 = vadd.f32 %v5247_v23, %v2548_v48  ;;  %3218 = vmatprep.mubr.bf16.mxu0 %v6417_v12  ;;  %3315 = vmatprep.mubr.bf16.mxu1 %v6419_v13  ;;  %v2564_v48 = vadd.f32 %v7313_v26, %v7235_v20 }
 0x204   : > { %v5248_v28 = vpop.f32.mrb[44].mxu1  ;;  %v5160_v29 = vpop.f32.mrb[44].mxu0 }
 0x205   : > { %v5249_v32 = vpop.f32.mrb[45].mxu1  ;;  %v5161_v34 = vpop.f32.mrb[45].mxu0 }
 0x206   : > { %v5250_v49 = vadd.f32 %v5249_v32, %v5248_v28  ;;  %v7353_v41 = vadd.f32 %v5161_v34, %v5160_v29  ;;  %v5251_v43 = vpop.f32.mrb[46].mxu1  ;;  %v5163_v44 = vpop.f32.mrb[46].mxu0 }
 0x207   : > { %v5252_v51 = vpop.f32.mrb[47].mxu1  ;;  %v5164_v31 = vpop.f32.mrb[47].mxu0 }
 0x208   : > { %v7359_v54 = vadd.f32 %v5250_v49, %v2553_v36  ;;  %v5253_v58 = vadd.f32 %v5252_v51, %v5251_v43  ;;  %v7361_v61 = vadd.f32 %v5164_v31, %v5163_v44  ;;  %v6434_v44 = vld [vmem:[%s7055_s20 + $0x500] ss:$52 sps:$4 sm:$0xff]  }
 0x209   : > { %3219 = vmatmul.mubr.bf16.gmra.mrb[152].mxu0 %v6421_v37  ;;  %3316 = vmatmul.mubr.bf16.gmra.mrb[152].mxu1 %v6422_v40 }
 0x20a   : > { %v7363_v22 = vadd.f32 %v5253_v58, %v2556_v52  ;;  %3226 = vmatprep.mubr.bf16.mxu0 %v6424_v0  ;;  %3323 = vmatprep.mubr.bf16.mxu1 %v6426_v46  ;;  %v2569_v0 = vadd.f32 %v7321_v42, %v7235_v20  ;;  %v6437_v58 = vld [vmem:[%s7055_s20 + $0x56c] ss:$52 sps:$4 sm:$0xff]  }
 0x20c   : > { %v5254_v62 = vpop.f32.mrb[48].mxu1  ;;  %v5318_v1 = vpop.f32.mrb[48].mxu0 }
 0x20d   : > { %v5255_v2 = vpop.f32.mrb[49].mxu1  ;;  %v5319_v3 = vpop.f32.mrb[49].mxu0 }
 0x20e   : > { %v5256_v18 = vadd.f32 %v5255_v2, %v5254_v62  ;;  %v5320_v8 = vadd.f32 %v5319_v3, %v5318_v1  ;;  %v5257_v12 = vpop.f32.mrb[50].mxu1  ;;  %v5321_v13 = vpop.f32.mrb[50].mxu0  ;;  %v6439_v62 = vld [vmem:[%s7055_s20 + $0x234] ss:$52 sps:$4 sm:$0xff]  }
 0x20f   : > { %v5258_v23 = vpop.f32.mrb[51].mxu1  ;;  %v5322_v28 = vpop.f32.mrb[51].mxu0 }
 0x210   : > { %v7373_v29 = vadd.f32 %v5256_v18, %v2561_v27  ;;  %v7376_v32 = vadd.f32 %v5320_v8, %v7247_v45  ;;  %v5259_v34 = vadd.f32 %v5258_v23, %v5257_v12  ;;  %v5323_v11 = vadd.f32 %v5322_v28, %v5321_v13  ;;  %v6435_v45 = vld [vmem:[%s7055_s20 + $0x1c8] ss:$52 sps:$4 sm:$0xff]  }
 0x211   : > { %3227 = vmatmul.mubr.bf16.gmra.mrb[156].mxu0 %v6428_v7  ;;  %3324 = vmatmul.mubr.bf16.gmra.mrb[156].mxu1 %v6429_v4 }
 0x212   : > { %v7378_v37 = vadd.f32 %v5259_v34, %v2564_v48  ;;  %v7381_v40 = vadd.f32 %v5323_v11, %v7251_v50  ;;  %3234 = vmatprep.mubr.bf16.mxu0 %v6430_v14  ;;  %3331 = vmatprep.mubr.bf16.mxu1 %v6432_v15  ;;  %v2572_v50 = vadd.f32 %v7329_v55, %v7235_v20  ;;  %v6496_v55 = vld [vmem:[#allocation8] sm:$0xff]  }
 0x213   : > { %5870 = vmatprep.subr.bf16.mxu1 %v6496_v55  ;;  %v6441_v14 = vld [vmem:[%s7055_s20 + $0x568] ss:$52 sps:$4 sm:$0xff]   ;;  %v6442_v15 = vld [vmem:[%s7055_s20 + $0x230] ss:$52 sps:$4 sm:$0xff]   ;;  %v2577_v48 = vadd.f32 %v7337_v6, %v7235_v20 }
 0x214   : > { %v5260_v26 = vpop.f32.mrb[52].mxu1  ;;  %v5324_v36 = vpop.f32.mrb[52].mxu0  ;;  %5871 = vmatpush3.bf16.msra.mxu1 %v6496_v55  ;;  %v6443_v11 = vld [vmem:[%s7055_s20 + $0x5d4] ss:$52 sps:$4 sm:$0xff]   ;;  %v6450_v55 = vld [vmem:[%s7055_s20 + $0x63c] ss:$52 sps:$4 sm:$0xff]  }
 0x215   : > { %v5261_v49 = vpop.f32.mrb[53].mxu1  ;;  %v5325_v43 = vpop.f32.mrb[53].mxu0 }
 0x216   : > { %v5262_v46 = vadd.f32 %v5261_v49, %v5260_v26  ;;  %v5326_v51 = vadd.f32 %v5325_v43, %v5324_v36  ;;  %v5263_v31 = vpop.f32.mrb[54].mxu1  ;;  %v5327_v52 = vpop.f32.mrb[54].mxu0  ;;  %v6445_v26 = vld [vmem:[%s7055_s20 + $0x29c] ss:$52 sps:$4 sm:$0xff]   ;;  %v2580_v36 = vadd.f32 %v7345_v25, %v7235_v20 }
 0x217   : > { %v5264_v1 = vpop.f32.mrb[55].mxu1  ;;  %v5328_v2 = vpop.f32.mrb[55].mxu0 }
 0x218   : > { %v7391_v3 = vadd.f32 %v5262_v46, %v2569_v0  ;;  %v7394_v7 = vadd.f32 %v5326_v51, %v7263_v5  ;;  %v5265_v4 = vadd.f32 %v5264_v1, %v5263_v31  ;;  %v5329_v42 = vadd.f32 %v5328_v2, %v5327_v52 }
 0x219   : > { %3235 = vmatmul.mubr.bf16.gmra.mrb[160].mxu0 %v6434_v44  ;;  %3332 = vmatmul.mubr.bf16.gmra.mrb[160].mxu1 %v6435_v45 }
 0x21a   : > { %v7396_v27 = vadd.f32 %v5265_v4, %v2572_v50  ;;  %v7399_v18 = vadd.f32 %v5329_v42, %v7267_v39  ;;  %3242 = vmatprep.mubr.bf16.mxu0 %v6437_v58  ;;  %3339 = vmatprep.mubr.bf16.mxu1 %v6439_v62  ;;  %v6447_v62 = vld [vmem:[%s7055_s20 + $0x5d0] ss:$52 sps:$4 sm:$0xff]   ;;  %v2585_v50 = vadd.f32 %v7353_v41, %v7235_v20 }
 0x21c   : > { %v5266_v8 = vpop.f32.mrb[56].mxu1  ;;  %v5330_v12 = vpop.f32.mrb[56].mxu0 }
 0x21d   : > { %v5267_v5 = vpop.f32.mrb[57].mxu1  ;;  %v5331_v13 = vpop.f32.mrb[57].mxu0 }
 0x21e   : > { %v5268_v23 = vadd.f32 %v5267_v5, %v5266_v8  ;;  %v5332_v28 = vadd.f32 %v5331_v13, %v5330_v12  ;;  %v5269_v39 = vpop.f32.mrb[58].mxu1  ;;  %v5333_v34 = vpop.f32.mrb[58].mxu0  ;;  %v6452_v8 = vld [vmem:[%s7055_s20 + $0x304] ss:$52 sps:$4 sm:$0xff]  }
 0x21f   : > { %v5270_v49 = vpop.f32.mrb[59].mxu1  ;;  %v5334_v43 = vpop.f32.mrb[59].mxu0 }
 0x220   : > { %v7409_v44 = vadd.f32 %v5268_v23, %v2577_v48  ;;  %v7412_v45 = vadd.f32 %v5332_v28, %v7279_v33  ;;  %v5271_v0 = vadd.f32 %v5270_v49, %v5269_v39  ;;  %v5335_v6 = vadd.f32 %v5334_v43, %v5333_v34  ;;  %v6448_v33 = vld [vmem:[%s7055_s20 + $0x298] ss:$52 sps:$4 sm:$0xff]  }
 0x221   : > { %3243 = vmatmul.mubr.bf16.gmra.mrb[164].mxu0 %v6441_v14  ;;  %3340 = vmatmul.mubr.bf16.gmra.mrb[164].mxu1 %v6442_v15 }
 0x222   : > { %v7414_v46 = vadd.f32 %v5271_v0, %v2580_v36  ;;  %v7417_v51 = vadd.f32 %v5335_v6, %v7283_v57  ;;  %3250 = vmatprep.mubr.bf16.mxu0 %v6443_v11  ;;  %3347 = vmatprep.mubr.bf16.mxu1 %v6445_v26  ;;  %v2588_v57 = vadd.f32 %v7361_v61, %v7235_v20  ;;  %v6497_v61 = vld [vmem:[#allocation8 + $0x8] sm:$0xff]   ;;  %v6455_v26 = vld [vmem:[%s7055_s20 + $0x300] ss:$52 sps:$4 sm:$0xff]  }
 0x223   : > { %5872 = vmatprep.subr.bf16.mxu1 %v6497_v61  ;;  %v6454_v11 = vld [vmem:[%s7055_s20 + $0x638] ss:$52 sps:$4 sm:$0xff]   ;;  %v2593_v36 = vadd.f32 %v7188_v21, %v7235_v20 }
 0x224   : > { %v5272_v25 = vpop.f32.mrb[60].mxu1  ;;  %v5336_v31 = vpop.f32.mrb[60].mxu0  ;;  %5873 = vmatpush3.bf16.msra.mxu1 %v6497_v61  ;;  %v6456_v6 = vld [vmem:[%s7055_s20 + $0x36c] ss:$52 sps:$4 sm:$0xff]   ;;  %v6461_v61 = vld [vmem:[%s7055_s20 + $0x3d4] ss:$52 sps:$4 sm:$0xff]  }
 0x225   : > { %v5273_v52 = vpop.f32.mrb[61].mxu1  ;;  %v5337_v58 = vpop.f32.mrb[61].mxu0 }
 0x226   : > { %v5274_v1 = vadd.f32 %v5273_v52, %v5272_v25  ;;  %v5338_v2 = vadd.f32 %v5337_v58, %v5336_v31  ;;  %v5275_v4 = vpop.f32.mrb[62].mxu1  ;;  %v5339_v42 = vpop.f32.mrb[62].mxu0  ;;  %v6458_v25 = vld [vmem:[%s7055_s20 + $0x30] ss:$52 sps:$4 sm:$0xff]   ;;  %v2596_v31 = vadd.f32 %v7194_v30, %v7235_v20 }
 0x227   : > { %v5276_v12 = vpop.f32.mrb[63].mxu1  ;;  %v5340_v5 = vpop.f32.mrb[63].mxu0 }
 0x228   : > { %v7427_v13 = vadd.f32 %v5274_v1, %v2585_v50  ;;  %v7430_v14 = vadd.f32 %v5338_v2, %v7295_v59  ;;  %v5277_v15 = vadd.f32 %v5276_v12, %v5275_v4  ;;  %v5341_v41 = vadd.f32 %v5340_v5, %v5339_v42 }
 0x229   : > { %3251 = vmatmul.mubr.bf16.gmra.mrb[168].mxu0 %v6447_v62  ;;  %3348 = vmatmul.mubr.bf16.gmra.mrb[168].mxu1 %v6448_v33 }
 0x22a   : > { %v7432_v48 = vadd.f32 %v5277_v15, %v2588_v57  ;;  %v7435_v23 = vadd.f32 %v5341_v41, %v7299_v10  ;;  %3258 = vmatprep.mubr.bf16.mxu0 %v6450_v55  ;;  %3355 = vmatprep.mubr.bf16.mxu1 %v6452_v8  ;;  %v6459_v8 = vld [vmem:[%s7055_s20 + $0x368] ss:$52 sps:$4 sm:$0xff]   ;;  %v2601_v57 = vadd.f32 %v7200_v38, %v7235_v20 }
 0x22c   : > { %v5278_v28 = vpop.f32.mrb[64].mxu1  ;;  %v5342_v39 = vpop.f32.mrb[64].mxu0 }
 0x22d   : > { %v5279_v59 = vpop.f32.mrb[65].mxu1  ;;  %v5343_v34 = vpop.f32.mrb[65].mxu0 }
 0x22e   : > { %v5280_v49 = vadd.f32 %v5279_v59, %v5278_v28  ;;  %v5344_v43 = vadd.f32 %v5343_v34, %v5342_v39  ;;  %v5281_v10 = vpop.f32.mrb[66].mxu1  ;;  %v5345_v0 = vpop.f32.mrb[66].mxu0  ;;  %v6463_v28 = vld [vmem:[%s7055_s20 + $0x100] ss:$52 sps:$4 sm:$0xff]  }
 0x22f   : > { %v5282_v52 = vpop.f32.mrb[67].mxu1  ;;  %v5346_v58 = vpop.f32.mrb[67].mxu0 }
 0x230   : > { %v7445_v62 = vadd.f32 %v5280_v49, %v2593_v36  ;;  %v7448_v33 = vadd.f32 %v5344_v43, %v7311_v24  ;;  %v5283_v50 = vadd.f32 %v5282_v52, %v5281_v10  ;;  %v5347_v21 = vadd.f32 %v5346_v58, %v5345_v0  ;;  %v6460_v24 = vld [vmem:[%s7055_s20 + $0x98] ss:$52 sps:$4 sm:$0xff]  }
 0x231   : > { %3259 = vmatmul.mubr.bf16.gmra.mrb[172].mxu0 %v6454_v11  ;;  %3356 = vmatmul.mubr.bf16.gmra.mrb[172].mxu1 %v6455_v26 }
 0x232   : > { %v7450_v1 = vadd.f32 %v5283_v50, %v2596_v31  ;;  %v7453_v2 = vadd.f32 %v5347_v21, %v7315_v35  ;;  %3363 = vmatprep.mubr.bf16.mxu1 %v6456_v6  ;;  %5838 = vmatprep.mubr.bf16.mxu0 %v6458_v25  ;;  %v2604_v35 = vadd.f32 %v7206_v47, %v7235_v20  ;;  %v6498_v47 = vld [vmem:[#allocation8 + $0x10] sm:$0xff]   ;;  %v6465_v25 = vld [vmem:[%s7055_s20 + $0x168] ss:$52 sps:$4 sm:$0xff]  }
 0x233   : > { %5874 = vmatprep.subr.bf16.mxu1 %v6498_v47  ;;  %v6464_v6 = vld [vmem:[%s7055_s20 + $0x3d0] ss:$52 sps:$4 sm:$0xff]   ;;  %v2609_v31 = vadd.f32 %v7213_v56, %v7235_v20 }
 0x234   : > { %v5284_v30 = vpop.f32.mrb[68].mxu1  ;;  %v5348_v4 = vpop.f32.mrb[68].mxu0  ;;  %5875 = vmatpush3.bf16.msra.mxu1 %v6498_v47  ;;  %v6466_v21 = vld [vmem:[%s7055_s20 + $0x43c] ss:$52 sps:$4 sm:$0xff]   ;;  %v6471_v47 = vld [vmem:[%s7055_s20 + $0x4a4] ss:$52 sps:$4 sm:$0xff]  }
 0x235   : > { %v5285_v42 = vpop.f32.mrb[69].mxu1  ;;  %v5349_v55 = vpop.f32.mrb[69].mxu0 }
 0x236   : > { %v5286_v12 = vadd.f32 %v5285_v42, %v5284_v30  ;;  %v5350_v5 = vadd.f32 %v5349_v55, %v5348_v4  ;;  %v5287_v15 = vpop.f32.mrb[70].mxu1  ;;  %v5351_v41 = vpop.f32.mrb[70].mxu0  ;;  %v6468_v30 = vld [vmem:[%s7055_s20 + $0x1d0] ss:$52 sps:$4 sm:$0xff]   ;;  %v2612_v4 = vadd.f32 %v7219_v63, %v7235_v20 }
 0x237   : > { %v5288_v39 = vpop.f32.mrb[71].mxu1  ;;  %v5352_v59 = vpop.f32.mrb[71].mxu0 }
 0x238   : > { %v7463_v34 = vadd.f32 %v5286_v12, %v2601_v57  ;;  %v7466_v11 = vadd.f32 %v5350_v5, %v7327_v53  ;;  %v5289_v26 = vadd.f32 %v5288_v39, %v5287_v15  ;;  %v5353_v38 = vadd.f32 %v5352_v59, %v5351_v41 }
 0x239   : > { %3364 = vmatmul.mubr.bf16.gmra.mrb[176].mxu1 %v6459_v8  ;;  %5839 = vmatmul.mubr.bf16.vlgmr.msra.gmra.mrb[176].mxu0 %v6460_v24 }
 0x23a   : > { %v7468_v36 = vadd.f32 %v5289_v26, %v2604_v35  ;;  %v7471_v49 = vadd.f32 %v5353_v38, %v7331_v60  ;;  %3371 = vmatprep.mubr.bf16.mxu1 %v6461_v61  ;;  %5842 = vmatprep.mubr.bf16.mxu0 %v6463_v28  ;;  %v6469_v28 = vld [vmem:[%s7055_s20 + $0x438] ss:$52 sps:$4 sm:$0xff]   ;;  %v2617_v35 = vadd.f32 %v7225_v9, %v7235_v20 }
 0x23c   : > { %v5290_v43 = vpop.f32.mrb[72].mxu1  ;;  %v5354_v10 = vpop.f32.mrb[72].mxu0 }
 0x23d   : > { %v5291_v53 = vpop.f32.mrb[73].mxu1  ;;  %v5355_v0 = vpop.f32.mrb[73].mxu0 }
 0x23e   : > { %v5292_v52 = vadd.f32 %v5291_v53, %v5290_v43  ;;  %v5356_v58 = vadd.f32 %v5355_v0, %v5354_v10  ;;  %v5293_v60 = vpop.f32.mrb[74].mxu1  ;;  %v5357_v50 = vpop.f32.mrb[74].mxu0  ;;  %v6473_v43 = vld [vmem:[%s7055_s20 + $0x2a0] ss:$52 sps:$4 sm:$0xff]  }
 0x23f   : > { %v5294_v42 = vpop.f32.mrb[75].mxu1  ;;  %v5358_v55 = vpop.f32.mrb[75].mxu0 }
 0x240   : > { %v7481_v8 = vadd.f32 %v5292_v52, %v2609_v31  ;;  %v7484_v24 = vadd.f32 %v5356_v58, %v7343_v16  ;;  %v5295_v57 = vadd.f32 %v5294_v42, %v5293_v60  ;;  %v5359_v56 = vadd.f32 %v5358_v55, %v5357_v50  ;;  %v6470_v16 = vld [vmem:[%s7055_s20 + $0x238] ss:$52 sps:$4 sm:$0xff]   ;;  %v6474_v50 = vld [vmem:[%s7055_s20 + $0x4a0] ss:$52 sps:$4 sm:$0xff]  }
 0x241   : > { %3372 = vmatmul.mubr.bf16.gmra.mrb[180].mxu1 %v6464_v6  ;;  %5843 = vmatmul.mubr.bf16.gmra.mrb[180].mxu0 %v6465_v25 }
 0x242   : > { %v7486_v12 = vadd.f32 %v5295_v57, %v2612_v4  ;;  %v7489_v5 = vadd.f32 %v5359_v56, %v7347_v19  ;;  %3379 = vmatprep.mubr.bf16.mxu1 %v6466_v21  ;;  %5846 = vmatprep.mubr.bf16.mxu0 %v6468_v30  ;;  %v2620_v19 = vadd.f32 %v7231_v17, %v7235_v20  ;;  %v6499_v17 = vld [vmem:[#allocation8 + $0x18] sm:$0xff]  }
 0x243   : > { %5876 = vmatprep.subr.bf16.mxu1 %v6499_v17  ;;  %v6475_v21 = vld [vmem:[%s7055_s20 + $0x308] ss:$52 sps:$4 sm:$0xff]   ;;  %v6476_v57 = vld [vmem:[%s7055_s20 + $0x50c] ss:$52 sps:$4 sm:$0xff]  }
 0x244   : > { %v5296_v63 = vpop.f32.mrb[76].mxu1  ;;  %v5360_v15 = vpop.f32.mrb[76].mxu0  ;;  %5877 = vmatpush3.bf16.msra.mxu1 %v6499_v17 }
 0x245   : > { %v5297_v41 = vpop.f32.mrb[77].mxu1  ;;  %v5361_v61 = vpop.f32.mrb[77].mxu0 }
 0x246   : > { %v5298_v39 = vadd.f32 %v5297_v41, %v5296_v63  ;;  %v5362_v59 = vadd.f32 %v5361_v61, %v5360_v15  ;;  %v5299_v26 = vpop.f32.mrb[78].mxu1  ;;  %v5363_v38 = vpop.f32.mrb[78].mxu0 }
 0x247   : > { %v5300_v10 = vpop.f32.mrb[79].mxu1  ;;  %v5364_v53 = vpop.f32.mrb[79].mxu0 }
 0x248   : > { %v7499_v0 = vadd.f32 %v5298_v39, %v2617_v35  ;;  %v7502_v6 = vadd.f32 %v5362_v59, %v7359_v54  ;;  %v5301_v25 = vadd.f32 %v5300_v10, %v5299_v26  ;;  %v5365_v9 = vadd.f32 %v5364_v53, %v5363_v38  ;;  %v6480_v38 = vld [vmem:[%s7055_s20 + $0x3d8] ss:$52 sps:$4 sm:$0xff]   ;;  %v6481_v53 = vld [vmem:[%s7055_s20 + $0x574] ss:$52 sps:$4 sm:$0xff]  }
 0x249   : > { %3380 = vmatmul.mubr.bf16.gmra.mrb[184].mxu1 %v6469_v28  ;;  %5847 = vmatmul.mubr.bf16.gmra.mrb[184].mxu0 %v6470_v16 }
 0x24a   : > { %v7504_v31 = vadd.f32 %v5301_v25, %v2620_v19  ;;  %v7507_v52 = vadd.f32 %v5365_v9, %v7363_v22  ;;  %3387 = vmatprep.mubr.bf16.mxu1 %v6471_v47  ;;  %5850 = vmatprep.mubr.bf16.mxu0 %v6473_v43  ;;  %v6478_v22 = vld [vmem:[%s7055_s20 + $0x370] ss:$52 sps:$4 sm:$0xff]   ;;  %v6483_v25 = vld [vmem:[%s7055_s20 + $0x440] ss:$52 sps:$4 sm:$0xff]  }
 0x24c   : > { %v5366_v20 = vpop.f32.mrb[80].mxu0  ;;  %v5430_v58 = vpop.f32.mrb[80].mxu1 }
 0x24d   : > { %v5367_v54 = vpop.f32.mrb[81].mxu0  ;;  %v5431_v60 = vpop.f32.mrb[81].mxu1 }
 0x24e   : > { %v5368_v30 = vadd.f32 %v5367_v54, %v5366_v20  ;;  %v5432_v4 = vadd.f32 %v5431_v60, %v5430_v58  ;;  %v5369_v42 = vpop.f32.mrb[82].mxu0  ;;  %v5433_v55 = vpop.f32.mrb[82].mxu1 }
 0x24f   : > { %v5370_v56 = vpop.f32.mrb[83].mxu0  ;;  %v5434_v63 = vpop.f32.mrb[83].mxu1 }
 0x250   : > { %v7514_v15 = vadd.f32 %v5368_v30, %v7373_v29  ;;  %v7517_v41 = vadd.f32 %v5432_v4, %v7376_v32  ;;  %v5371_v61 = vadd.f32 %v5370_v56, %v5369_v42  ;;  %v5435_v28 = vadd.f32 %v5434_v63, %v5433_v55  ;;  %v6479_v32 = vld [vmem:[%s7055_s20 + $0x508] ss:$52 sps:$4 sm:$0xff]   ;;  %v6484_v4 = vld [vmem:[%s7055_s20 + $0x570] ss:$52 sps:$4 sm:$0xff]  }
 0x251   : > { %3388 = vmatmul.mubr.bf16.gmra.mrb[188].mxu1 %v6474_v50  ;;  %5851 = vmatmul.mubr.bf16.gmra.mrb[188].mxu0 %v6475_v21  ;;  %v6485_v42 = vld [vmem:[%s7055_s20 + $0x4a8] ss:$52 sps:$4 sm:$0xff]  }
 0x252   : > { %v7520_v16 = vadd.f32 %v5371_v61, %v7378_v37  ;;  %v7523_v35 = vadd.f32 %v5435_v28, %v7381_v40  ;;  %3395 = vmatprep.mubr.bf16.mxu1 %v6476_v57  ;;  %5854 = vmatprep.mubr.bf16.mxu0 %v6478_v22  ;;  %v6486_v56 = vld [vmem:[%s7055_s20 + $0x5dc] ss:$52 sps:$4 sm:$0xff]  }
 0x254   : > { %v5372_v39 = vpop.f32.mrb[84].mxu0  ;;  %v5436_v29 = vpop.f32.mrb[84].mxu1 }
 0x255   : > { %v5373_v59 = vpop.f32.mrb[85].mxu0  ;;  %v5437_v26 = vpop.f32.mrb[85].mxu1 }
 0x256   : > { %v5374_v47 = vadd.f32 %v5373_v59, %v5372_v39  ;;  %v5438_v43 = vadd.f32 %v5437_v26, %v5436_v29  ;;  %v5375_v19 = vpop.f32.mrb[86].mxu0  ;;  %v5439_v10 = vpop.f32.mrb[86].mxu1 }
 0x257   : > { %v5376_v9 = vpop.f32.mrb[87].mxu0  ;;  %v5440_v37 = vpop.f32.mrb[87].mxu1 }
 0x258   : > { %v7530_v17 = vadd.f32 %v5374_v47, %v7391_v3  ;;  %v7533_v40 = vadd.f32 %v5438_v43, %v7394_v7  ;;  %v5377_v20 = vadd.f32 %v5376_v9, %v5375_v19  ;;  %v5441_v58 = vadd.f32 %v5440_v37, %v5439_v10  ;;  %v6500_v3 = vld [vmem:[#allocation8 + $0x20] sm:$0xff]   ;;  %v6490_v19 = vld [vmem:[%s7055_s20 + $0x578] ss:$52 sps:$4 sm:$0xff]  }
 0x259   : > { %3396 = vmatmul.mubr.bf16.gmra.mrb[192].mxu1 %v6479_v32  ;;  %5855 = vmatmul.mubr.bf16.gmra.mrb[192].mxu0 %v6480_v38  ;;  %v6491_v37 = vld [vmem:[%s7055_s20 + $0x644] ss:$52 sps:$4 sm:$0xff]  }
 0x25a   : > { %v7536_v54 = vadd.f32 %v5377_v20, %v7396_v27  ;;  %v7539_v60 = vadd.f32 %v5441_v58, %v7399_v18  ;;  %3403 = vmatprep.mubr.bf16.mxu1 %v6481_v53  ;;  %5858 = vmatprep.mubr.bf16.mxu0 %v6483_v25  ;;  %v6488_v18 = vld [vmem:[%s7055_s20 + $0x510] ss:$52 sps:$4 sm:$0xff]   ;;  %v6493_v20 = vld [vmem:[%s7055_s20 + $0x5e0] ss:$52 sps:$4 sm:$0xff]  }
 0x25b   : > { %5878 = vmatprep.subr.bf16.mxu1 %v6500_v3 }
 0x25c   : > { %v5378_v50 = vpop.f32.mrb[88].mxu0  ;;  %v5442_v21 = vpop.f32.mrb[88].mxu1  ;;  %5879 = vmatpush3.bf16.msra.mxu1 %v6500_v3 }
 0x25d   : > { %v5379_v7 = vpop.f32.mrb[89].mxu0  ;;  %v5443_v30 = vpop.f32.mrb[89].mxu1 }
 0x25e   : > { %v5380_v55 = vadd.f32 %v5379_v7, %v5378_v50  ;;  %v5444_v57 = vadd.f32 %v5443_v30, %v5442_v21  ;;  %v5381_v27 = vpop.f32.mrb[90].mxu0  ;;  %v5445_v22 = vpop.f32.mrb[90].mxu1 }
 0x25f   : > { %v5382_v63 = vpop.f32.mrb[91].mxu0  ;;  %v5446_v61 = vpop.f32.mrb[91].mxu1 }
 0x260   : > { %v7546_v28 = vadd.f32 %v5380_v55, %v7409_v44  ;;  %v7549_v39 = vadd.f32 %v5444_v57, %v7412_v45  ;;  %v5383_v29 = vadd.f32 %v5382_v63, %v5381_v27  ;;  %v5447_v59 = vadd.f32 %v5446_v61, %v5445_v22  ;;  %v6489_v45 = vld [vmem:[%s7055_s20 + $0x5d8] ss:$52 sps:$4 sm:$0xff]   ;;  %v6494_v57 = vld [vmem:[%s7055_s20 + $0x640] ss:$52 sps:$4 sm:$0xff]   ;;  %v6495_v27 = vld [vmem:[%s7055_s20 + $0x648] ss:$52 sps:$4 sm:$0xff]  }
 0x261   : > { %3404 = vmatmul.mubr.bf16.gmra.mrb[196].mxu1 %v6484_v4  ;;  %5859 = vmatmul.mubr.bf16.gmra.mrb[196].mxu0 %v6485_v42  ;;  %v6501_v4 = vld [vmem:[#allocation8 + $0x28] sm:$0xff]  }
 0x262   : > { %v7552_v26 = vadd.f32 %v5383_v29, %v7414_v46  ;;  %v7555_v32 = vadd.f32 %v5447_v59, %v7417_v51  ;;  %3411 = vmatprep.mubr.bf16.mxu1 %v6486_v56  ;;  %5862 = vmatprep.mubr.bf16.mxu0 %v6488_v18 }
 0x263   : > { %5880 = vmatprep.subr.bf16.mxu1 %v6501_v4 }
 0x264   : > { %v5384_v38 = vpop.f32.mrb[92].mxu0  ;;  %v5448_v44 = vpop.f32.mrb[92].mxu1  ;;  %5881 = vmatpush3.bf16.msra.mxu1 %v6501_v4 }
 0x265   : > { %v5385_v47 = vpop.f32.mrb[93].mxu0  ;;  %v5449_v43 = vpop.f32.mrb[93].mxu1 }
 0x266   : > { %v5386_v10 = vadd.f32 %v5385_v47, %v5384_v38  ;;  %v5450_v53 = vadd.f32 %v5449_v43, %v5448_v44  ;;  %v5387_v25 = vpop.f32.mrb[94].mxu0  ;;  %v5451_v9 = vpop.f32.mrb[94].mxu1 }
 0x267   : > { %v5388_v58 = vpop.f32.mrb[95].mxu0  ;;  %v5452_v46 = vpop.f32.mrb[95].mxu1 }
 0x268   : > { %v7562_v3 = vadd.f32 %v5386_v10, %v7427_v13  ;;  %v7565_v51 = vadd.f32 %v5450_v53, %v7430_v14  ;;  %v5389_v50 = vadd.f32 %v5388_v58, %v5387_v25  ;;  %v5453_v21 = vadd.f32 %v5452_v46, %v5451_v9 }
 0x269   : > { %3412 = vmatmul.mubr.bf16.gmra.mrb[200].mxu1 %v6489_v45  ;;  %5863 = vmatmul.mubr.bf16.gmra.mrb[200].mxu0 %v6490_v19 }
 0x26a   : > { %v7568_v7 = vadd.f32 %v5389_v50, %v7432_v48  ;;  %v7571_v30 = vadd.f32 %v5453_v21, %v7435_v23  ;;  %3419 = vmatprep.mubr.bf16.mxu1 %v6491_v37  ;;  %5866 = vmatprep.mubr.bf16.mxu0 %v6493_v20  ;;  %v6502_v21 = vld [vmem:[#allocation8 + $0x30] sm:$0xff]  }
 0x26b   : > { %5882 = vmatprep.subr.bf16.mxu1 %v6502_v21 }
 0x26c   : > { %v5390_v13 = vpop.f32.mrb[96].mxu0  ;;  %v5454_v42 = vpop.f32.mrb[96].mxu1  ;;  %5883 = vmatpush3.bf16.msra.mxu1 %v6502_v21 }
 0x26d   : > { %v5391_v55 = vpop.f32.mrb[97].mxu0  ;;  %v5455_v14 = vpop.f32.mrb[97].mxu1 }
 0x26e   : > { %v5392_v22 = vadd.f32 %v5391_v55, %v5390_v13  ;;  %v5456_v56 = vadd.f32 %v5455_v14, %v5454_v42  ;;  %v5393_v18 = vpop.f32.mrb[98].mxu0  ;;  %v5457_v63 = vpop.f32.mrb[98].mxu1 }
 0x26f   : > { %v5394_v48 = vpop.f32.mrb[99].mxu0  ;;  %v5458_v61 = vpop.f32.mrb[99].mxu1 }
 0x270   : > { %v7576_v23 = vadd.f32 %v5392_v22, %v7445_v62  ;;  %v7579_v29 = vadd.f32 %v5456_v56, %v7448_v33  ;;  %v5395_v59 = vadd.f32 %v5394_v48, %v5393_v18  ;;  %v5459_v38 = vadd.f32 %v5458_v61, %v5457_v63 }
 0x271   : > { %3420 = vmatmul.mubr.bf16.gmra.mrb[204].mxu1 %v6494_v57  ;;  %5867 = vmatmul.mubr.bf16.gmra.mrb[204].mxu0 %v6495_v27 }
 0x272   : > { %v7582_v44 = vadd.f32 %v5395_v59, %v7450_v1  ;;  %v7585_v47 = vadd.f32 %v5459_v38, %v7453_v2 }
 0x274   : > { %v5396_v43 = vpop.f32.mrb[100].mxu0  ;;  %v5460_v45 = vpop.f32.mrb[100].mxu1 }
 0x275   : > { %v5397_v19 = vpop.f32.mrb[101].mxu0  ;;  %v5461_v10 = vpop.f32.mrb[101].mxu1 }
 0x276   : > { %v5398_v53 = vadd.f32 %v5397_v19, %v5396_v43  ;;  %v5462_v62 = vadd.f32 %v5461_v10, %v5460_v45  ;;  %v5399_v25 = vpop.f32.mrb[102].mxu0  ;;  %v5463_v9 = vpop.f32.mrb[102].mxu1 }
 0x277   : > { %v5400_v33 = vpop.f32.mrb[103].mxu0  ;;  %v5464_v37 = vpop.f32.mrb[103].mxu1 }
 0x278   : > { %v7588_v20 = vadd.f32 %v5398_v53, %v7463_v34  ;;  %v7591_v58 = vadd.f32 %v5462_v62, %v7466_v11  ;;  %v5401_v1 = vadd.f32 %v5400_v33, %v5399_v25  ;;  %v5465_v46 = vadd.f32 %v5464_v37, %v5463_v9  ;;  %v6503_v37 = vld [vmem:[#allocation8 + $0x38] sm:$0xff]  }
 0x279   : > { %5884 = vmatprep.subr.bf16.mxu1 %v6503_v37 }
 0x27a   : > { %v7594_v2 = vadd.f32 %v5401_v1, %v7468_v36  ;;  %v7597_v50 = vadd.f32 %v5465_v46, %v7471_v49  ;;  %5885 = vmatpush3.bf16.msra.mxu1 %v6503_v37 }
 0x27c   : > { %v5402_v4 = vpop.f32.mrb[104].mxu0  ;;  %v5466_v13 = vpop.f32.mrb[104].mxu1 }
 0x27d   : > { %v5403_v42 = vpop.f32.mrb[105].mxu0  ;;  %v5467_v55 = vpop.f32.mrb[105].mxu1 }
 0x27e   : > { %v5404_v34 = vadd.f32 %v5403_v42, %v5402_v4  ;;  %v5468_v14 = vadd.f32 %v5467_v55, %v5466_v13  ;;  %v5405_v57 = vpop.f32.mrb[106].mxu0  ;;  %v5469_v11 = vpop.f32.mrb[106].mxu1 }
 0x27f   : > { %v5406_v27 = vpop.f32.mrb[107].mxu0  ;;  %v5470_v22 = vpop.f32.mrb[107].mxu1 }
 0x280   : > { %v7600_v56 = vadd.f32 %v5404_v34, %v7481_v8  ;;  %v7603_v36 = vadd.f32 %v5468_v14, %v7484_v24  ;;  %v5407_v49 = vadd.f32 %v5406_v27, %v5405_v57  ;;  %v5471_v18 = vadd.f32 %v5470_v22, %v5469_v11 }
 0x282   : > { %v7606_v63 = vadd.f32 %v5407_v49, %v7486_v12  ;;  %v7609_v48 = vadd.f32 %v5471_v18, %v7489_v5 }
 0x284   : > { %v5408_v61 = vpop.f32.mrb[108].mxu0  ;;  %v5472_v59 = vpop.f32.mrb[108].mxu1 }
 0x285   : > { %v5409_v38 = vpop.f32.mrb[109].mxu0  ;;  %v5473_v43 = vpop.f32.mrb[109].mxu1 }
 0x286   : > { %v5410_v45 = vadd.f32 %v5409_v38, %v5408_v61  ;;  %v5474_v19 = vadd.f32 %v5473_v43, %v5472_v59  ;;  %v5411_v10 = vpop.f32.mrb[110].mxu0  ;;  %v5475_v8 = vpop.f32.mrb[110].mxu1 }
 0x287   : > { %v5412_v53 = vpop.f32.mrb[111].mxu0  ;;  %v5476_v62 = vpop.f32.mrb[111].mxu1 }
 0x288   : > { %v7612_v24 = vadd.f32 %v5410_v45, %v7499_v0  ;;  %v7615_v25 = vadd.f32 %v5474_v19, %v7502_v6  ;;  %v5413_v12 = vadd.f32 %v5412_v53, %v5411_v10  ;;  %v5477_v9 = vadd.f32 %v5476_v62, %v5475_v8 }
 0x28a   : > { %v7618_v5 = vadd.f32 %v5413_v12, %v7504_v31  ;;  %v7621_v33 = vadd.f32 %v5477_v9, %v7507_v52 }
 0x28c   : > { %v5478_v1 = vpop.f32.mrb[112].mxu1  ;;  %v5542_v46 = vpop.f32.mrb[112].mxu0 }
 0x28d   : > { %v5479_v21 = vpop.f32.mrb[113].mxu1  ;;  %v5543_v4 = vpop.f32.mrb[113].mxu0 }
 0x28e   : > { %v5480_v0 = vadd.f32 %v5479_v21, %v5478_v1  ;;  %v5544_v13 = vadd.f32 %v5543_v4, %v5542_v46  ;;  %v5481_v42 = vpop.f32.mrb[114].mxu1  ;;  %v5545_v6 = vpop.f32.mrb[114].mxu0 }
 0x28f   : > { %v5482_v55 = vpop.f32.mrb[115].mxu1  ;;  %v5546_v34 = vpop.f32.mrb[115].mxu0 }
 0x290   : > { %v7624_v14 = vadd.f32 %v5480_v0, %v7514_v15  ;;  %v7627_v31 = vadd.f32 %v5544_v13, %v7517_v41  ;;  %v5483_v52 = vadd.f32 %v5482_v55, %v5481_v42  ;;  %v5547_v57 = vadd.f32 %v5546_v34, %v5545_v6 }
 0x292   : > { %v7630_v11 = vadd.f32 %v5483_v52, %v7520_v16  ;;  %v7633_v27 = vadd.f32 %v5547_v57, %v7523_v35 }
 0x294   : > { %v5484_v22 = vpop.f32.mrb[116].mxu1  ;;  %v5548_v49 = vpop.f32.mrb[116].mxu0 }
 0x295   : > { %v5485_v18 = vpop.f32.mrb[117].mxu1  ;;  %v5549_v61 = vpop.f32.mrb[117].mxu0 }
 0x296   : > { %v5486_v59 = vadd.f32 %v5485_v18, %v5484_v22  ;;  %v5550_v38 = vadd.f32 %v5549_v61, %v5548_v49  ;;  %v5487_v43 = vpop.f32.mrb[118].mxu1  ;;  %v5551_v15 = vpop.f32.mrb[118].mxu0 }
 0x297   : > { %v5488_v45 = vpop.f32.mrb[119].mxu1  ;;  %v5552_v19 = vpop.f32.mrb[119].mxu0 }
 0x298   : > { %v7636_v41 = vadd.f32 %v5486_v59, %v7530_v17  ;;  %v7639_v10 = vadd.f32 %v5550_v38, %v7533_v40  ;;  %v5489_v16 = vadd.f32 %v5488_v45, %v5487_v43  ;;  %v5553_v8 = vadd.f32 %v5552_v19, %v5551_v15 }
 0x29a   : > { %v7642_v35 = vadd.f32 %v5489_v16, %v7536_v54  ;;  %v7645_v53 = vadd.f32 %v5553_v8, %v7539_v60 }
 0x29c   : > { %v5490_v62 = vpop.f32.mrb[120].mxu1  ;;  %v5554_v12 = vpop.f32.mrb[120].mxu0 }
 0x29d   : > { %v5491_v9 = vpop.f32.mrb[121].mxu1  ;;  %v5555_v37 = vpop.f32.mrb[121].mxu0 }
 0x29e   : > { %v5492_v1 = vadd.f32 %v5491_v9, %v5490_v62  ;;  %v5556_v46 = vadd.f32 %v5555_v37, %v5554_v12  ;;  %v5493_v21 = vpop.f32.mrb[122].mxu1  ;;  %v5557_v17 = vpop.f32.mrb[122].mxu0 }
 0x29f   : > { %v5494_v4 = vpop.f32.mrb[123].mxu1  ;;  %v5558_v0 = vpop.f32.mrb[123].mxu0 }
 0x2a0   : > { %v7648_v40 = vadd.f32 %v5492_v1, %v7546_v28  ;;  %v7651_v13 = vadd.f32 %v5556_v46, %v7549_v39  ;;  %v5495_v54 = vadd.f32 %v5494_v4, %v5493_v21  ;;  %v5559_v42 = vadd.f32 %v5558_v0, %v5557_v17 }
 0x2a2   : > { %v7654_v60 = vadd.f32 %v5495_v54, %v7552_v26  ;;  %v7657_v6 = vadd.f32 %v5559_v42, %v7555_v32 }
 0x2a4   : > { %v5496_v55 = vpop.f32.mrb[124].mxu1  ;;  %v5560_v34 = vpop.f32.mrb[124].mxu0 }
 0x2a5   : > { %v5497_v52 = vpop.f32.mrb[125].mxu1  ;;  %v5561_v57 = vpop.f32.mrb[125].mxu0 }
 0x2a6   : > { %v5498_v22 = vadd.f32 %v5497_v52, %v5496_v55  ;;  %v5562_v49 = vadd.f32 %v5561_v57, %v5560_v34  ;;  %v5499_v18 = vpop.f32.mrb[126].mxu1  ;;  %v5563_v28 = vpop.f32.mrb[126].mxu0 }
 0x2a7   : > { %v5500_v61 = vpop.f32.mrb[127].mxu1  ;;  %v5564_v59 = vpop.f32.mrb[127].mxu0 }
 0x2a8   : > { %v7660_v39 = vadd.f32 %v5498_v22, %v7562_v3  ;;  %v7663_v38 = vadd.f32 %v5562_v49, %v7565_v51  ;;  %v5501_v26 = vadd.f32 %v5500_v61, %v5499_v18  ;;  %v5565_v43 = vadd.f32 %v5564_v59, %v5563_v28 }
 0x2aa   : > { %v7666_v32 = vadd.f32 %v5501_v26, %v7568_v7  ;;  %v7669_v15 = vadd.f32 %v5565_v43, %v7571_v30 }
 0x2ac   : > { %v5502_v45 = vpop.f32.mrb[128].mxu1  ;;  %v5566_v19 = vpop.f32.mrb[128].mxu0 }
 0x2ad   : > { %v5503_v16 = vpop.f32.mrb[129].mxu1  ;;  %v5567_v8 = vpop.f32.mrb[129].mxu0 }
 0x2ae   : > { %v5504_v62 = vadd.f32 %v5503_v16, %v5502_v45  ;;  %v5568_v12 = vadd.f32 %v5567_v8, %v5566_v19  ;;  %v5505_v9 = vpop.f32.mrb[130].mxu1  ;;  %v5569_v3 = vpop.f32.mrb[130].mxu0 }
 0x2af   : > { %v5506_v37 = vpop.f32.mrb[131].mxu1  ;;  %v5570_v1 = vpop.f32.mrb[131].mxu0 }
 0x2b0   : > { %v7672_v51 = vadd.f32 %v5504_v62, %v7576_v23  ;;  %v7675_v46 = vadd.f32 %v5568_v12, %v7579_v29  ;;  %v5507_v7 = vadd.f32 %v5506_v37, %v5505_v9  ;;  %v5571_v21 = vadd.f32 %v5570_v1, %v5569_v3 }
 0x2b2   : > { %v7678_v30 = vadd.f32 %v5507_v7, %v7582_v44  ;;  %v7681_v17 = vadd.f32 %v5571_v21, %v7585_v47 }
 0x2b4   : > { %v5508_v4 = vpop.f32.mrb[132].mxu1  ;;  %v5572_v0 = vpop.f32.mrb[132].mxu0 }
 0x2b5   : > { %v5509_v54 = vpop.f32.mrb[133].mxu1  ;;  %v5573_v42 = vpop.f32.mrb[133].mxu0 }
 0x2b6   : > { %v5510_v55 = vadd.f32 %v5509_v54, %v5508_v4  ;;  %v5574_v34 = vadd.f32 %v5573_v42, %v5572_v0  ;;  %v5511_v52 = vpop.f32.mrb[134].mxu1  ;;  %v5575_v23 = vpop.f32.mrb[134].mxu0 }
 0x2b7   : > { %v5512_v57 = vpop.f32.mrb[135].mxu1  ;;  %v5576_v22 = vpop.f32.mrb[135].mxu0 }
 0x2b8   : > { %v7684_v29 = vadd.f32 %v5510_v55, %v7588_v20  ;;  %v7687_v49 = vadd.f32 %v5574_v34, %v7591_v58  ;;  %v5513_v44 = vadd.f32 %v5512_v57, %v5511_v52  ;;  %v5577_v18 = vadd.f32 %v5576_v22, %v5575_v23 }
 0x2ba   : > { %v7690_v47 = vadd.f32 %v5513_v44, %v7594_v2  ;;  %v7693_v28 = vadd.f32 %v5577_v18, %v7597_v50 }
 0x2bc   : > { %v5514_v61 = vpop.f32.mrb[136].mxu1  ;;  %v5578_v59 = vpop.f32.mrb[136].mxu0 }
 0x2bd   : > { %v5515_v26 = vpop.f32.mrb[137].mxu1  ;;  %v5579_v43 = vpop.f32.mrb[137].mxu0 }
 0x2be   : > { %v5516_v45 = vadd.f32 %v5515_v26, %v5514_v61  ;;  %v5580_v19 = vadd.f32 %v5579_v43, %v5578_v59  ;;  %v5517_v16 = vpop.f32.mrb[138].mxu1  ;;  %v5581_v20 = vpop.f32.mrb[138].mxu0 }
 0x2bf   : > { %v5518_v8 = vpop.f32.mrb[139].mxu1  ;;  %v5582_v62 = vpop.f32.mrb[139].mxu0 }
 0x2c0   : > { %v7696_v58 = vadd.f32 %v5516_v45, %v7600_v56  ;;  %v7699_v12 = vadd.f32 %v5580_v19, %v7603_v36  ;;  %v5519_v2 = vadd.f32 %v5518_v8, %v5517_v16  ;;  %v5583_v9 = vadd.f32 %v5582_v62, %v5581_v20  ;;  %v6504_v8 = vld [vmem:[#allocation11] sm:$0xff]   ;;  %v6505_v62 = vld [vmem:[#allocation11 + $0x8] sm:$0xff]  }
 0x2c1   : > { %5918 = vmatprep.subr.bf16.mxu0 %v6504_v8 }
 0x2c2   : > { %v7702_v50 = vadd.f32 %v5519_v2, %v7606_v63  ;;  %v7705_v3 = vadd.f32 %v5583_v9, %v7609_v48  ;;  %5919 = vmatpush3.bf16.msra.mxu0 %v6504_v8 }
 0x2c3   : > { %5920 = vmatprep.subr.bf16.mxu0 %v6505_v62 }
 0x2c4   : > { %v5520_v37 = vpop.f32.mrb[140].mxu1  ;;  %v5584_v1 = vpop.f32.mrb[140].mxu0 }
 0x2c5   : > { %v5521_v7 = vpop.f32.mrb[141].mxu1  ;;  %v5585_v21 = vpop.f32.mrb[141].mxu0 }
 0x2c6   : > { %v5522_v4 = vadd.f32 %v5521_v7, %v5520_v37  ;;  %v5586_v0 = vadd.f32 %v5585_v21, %v5584_v1  ;;  %v5523_v54 = vpop.f32.mrb[142].mxu1  ;;  %v5587_v56 = vpop.f32.mrb[142].mxu0  ;;  %5921 = vmatpush3.bf16.msra.mxu0 %v6505_v62  ;;  %v6509_v62 = vld [vmem:[#allocation11 + $0x28] sm:$0xff]  }
 0x2c7   : > { %v5524_v42 = vpop.f32.mrb[143].mxu1  ;;  %v5588_v55 = vpop.f32.mrb[143].mxu0 }
 0x2c8   : > { %v7708_v36 = vadd.f32 %v5522_v4, %v7612_v24  ;;  %v7711_v34 = vadd.f32 %v5586_v0, %v7615_v25  ;;  %v5525_v63 = vadd.f32 %v5524_v42, %v5523_v54  ;;  %v5589_v52 = vadd.f32 %v5588_v55, %v5587_v56 }
 0x2ca   : > { %v7714_v48 = vadd.f32 %v5525_v63, %v7618_v5  ;;  %v7717_v23 = vadd.f32 %v5589_v52, %v7621_v33  ;;  %v6507_v52 = vld [vmem:[#allocation11 + $0x18] sm:$0xff]  }
 0x2cc   : > { %v5590_v57 = vpop.f32.mrb[144].mxu0  ;;  %v5654_v22 = vpop.f32.mrb[144].mxu1 }
 0x2cd   : > { %v5591_v44 = vpop.f32.mrb[145].mxu0  ;;  %v5655_v18 = vpop.f32.mrb[145].mxu1 }
 0x2ce   : > { %v5592_v61 = vadd.f32 %v5591_v44, %v5590_v57  ;;  %v5656_v59 = vadd.f32 %v5655_v18, %v5654_v22  ;;  %v5593_v26 = vpop.f32.mrb[146].mxu0  ;;  %v5657_v24 = vpop.f32.mrb[146].mxu1 }
 0x2cf   : > { %v5594_v43 = vpop.f32.mrb[147].mxu0  ;;  %v5658_v45 = vpop.f32.mrb[147].mxu1 }
 0x2d0   : > { %v7720_v25 = vadd.f32 %v5592_v61, %v7624_v14  ;;  %v5595_v19 = vadd.f32 %v5594_v43, %v5593_v26  ;;  %v5659_v16 = vadd.f32 %v5658_v45, %v5657_v24  ;;  %v7723_v5 = vadd.f32 %v5656_v59, %v7627_v31 }
 0x2d2   : > { %v7726_v33 = vadd.f32 %v5595_v19, %v7630_v11  ;;  %v7729_v20 = vadd.f32 %v5659_v16, %v7633_v27  ;;  %v6506_v11 = vld [vmem:[#allocation11 + $0x10] sm:$0xff]  }
 0x2d3   : > { %5922 = vmatprep.subr.bf16.mxu0 %v6506_v11 }
 0x2d4   : > { %v5596_v2 = vpop.f32.mrb[148].mxu0  ;;  %v5660_v9 = vpop.f32.mrb[148].mxu1  ;;  %5923 = vmatpush3.bf16.msra.mxu0 %v6506_v11 }
 0x2d5   : > { %v5597_v37 = vpop.f32.mrb[149].mxu0  ;;  %v5661_v1 = vpop.f32.mrb[149].mxu1  ;;  %5924 = vmatprep.subr.bf16.mxu0 %v6507_v52 }
 0x2d6   : > { %v5598_v14 = vadd.f32 %v5597_v37, %v5596_v2  ;;  %v5662_v7 = vadd.f32 %v5661_v1, %v5660_v9  ;;  %v5599_v21 = vpop.f32.mrb[150].mxu0  ;;  %v5663_v4 = vpop.f32.mrb[150].mxu1 }
 0x2d7   : > { %v5600_v31 = vpop.f32.mrb[151].mxu0  ;;  %v5664_v0 = vpop.f32.mrb[151].mxu1 }
 0x2d8   : > { %v7732_v54 = vadd.f32 %v5598_v14, %v7636_v41  ;;  %v5601_v27 = vadd.f32 %v5600_v31, %v5599_v21  ;;  %v5665_v56 = vadd.f32 %v5664_v0, %v5663_v4  ;;  %v7735_v42 = vadd.f32 %v5662_v7, %v7639_v10  ;;  %5925 = vmatpush3.bf16.msra.mxu0 %v6507_v52 }
 0x2da   : > { %v7738_v55 = vadd.f32 %v5601_v27, %v7642_v35  ;;  %v7741_v63 = vadd.f32 %v5665_v56, %v7645_v53  ;;  %v6508_v35 = vld [vmem:[#allocation11 + $0x20] sm:$0xff]  }
 0x2db   : > { %5926 = vmatprep.subr.bf16.mxu0 %v6508_v35 }
 0x2dc   : > { %v5602_v57 = vpop.f32.mrb[152].mxu0  ;;  %v5666_v22 = vpop.f32.mrb[152].mxu1  ;;  %5927 = vmatpush3.bf16.msra.mxu0 %v6508_v35 }
 0x2dd   : > { %v5603_v44 = vpop.f32.mrb[153].mxu0  ;;  %v5667_v18 = vpop.f32.mrb[153].mxu1  ;;  %5928 = vmatprep.subr.bf16.mxu0 %v6509_v62 }
 0x2de   : > { %v5604_v41 = vadd.f32 %v5603_v44, %v5602_v57  ;;  %v5668_v61 = vadd.f32 %v5667_v18, %v5666_v22  ;;  %v5605_v59 = vpop.f32.mrb[154].mxu0  ;;  %v5669_v26 = vpop.f32.mrb[154].mxu1 }
 0x2df   : > { %v5606_v10 = vpop.f32.mrb[155].mxu0  ;;  %v5670_v24 = vpop.f32.mrb[155].mxu1 }
 0x2e0   : > { %v7744_v43 = vadd.f32 %v5604_v41, %v7648_v40  ;;  %v5607_v53 = vadd.f32 %v5606_v10, %v5605_v59  ;;  %v5671_v45 = vadd.f32 %v5670_v24, %v5669_v26  ;;  %v7747_v19 = vadd.f32 %v5668_v61, %v7651_v13  ;;  %5929 = vmatpush3.bf16.msra.mxu0 %v6509_v62 }
 0x2e2   : > { %v7750_v16 = vadd.f32 %v5607_v53, %v7654_v60  ;;  %v7753_v8 = vadd.f32 %v5671_v45, %v7657_v6  ;;  %v6510_v60 = vld [vmem:[#allocation11 + $0x30] sm:$0xff]  }
 0x2e3   : > { %5930 = vmatprep.subr.bf16.mxu0 %v6510_v60 }
 0x2e4   : > { %v5608_v2 = vpop.f32.mrb[156].mxu0  ;;  %v5672_v9 = vpop.f32.mrb[156].mxu1  ;;  %5931 = vmatpush3.bf16.msra.mxu0 %v6510_v60 }
 0x2e5   : > { %v5609_v37 = vpop.f32.mrb[157].mxu0  ;;  %v5673_v1 = vpop.f32.mrb[157].mxu1 }
 0x2e6   : > { %v5610_v40 = vadd.f32 %v5609_v37, %v5608_v2  ;;  %v5674_v14 = vadd.f32 %v5673_v1, %v5672_v9  ;;  %v5611_v7 = vpop.f32.mrb[158].mxu0  ;;  %v5675_v21 = vpop.f32.mrb[158].mxu1 }
 0x2e7   : > { %v5612_v13 = vpop.f32.mrb[159].mxu0  ;;  %v5676_v4 = vpop.f32.mrb[159].mxu1 }
 0x2e8   : > { %v7756_v31 = vadd.f32 %v5610_v40, %v7660_v39  ;;  %v5613_v6 = vadd.f32 %v5612_v13, %v5611_v7  ;;  %v5677_v0 = vadd.f32 %v5676_v4, %v5675_v21  ;;  %v7759_v11 = vadd.f32 %v5674_v14, %v7663_v38 }
 0x2ea   : > { %v7762_v27 = vadd.f32 %v5613_v6, %v7666_v32  ;;  %v7765_v56 = vadd.f32 %v5677_v0, %v7669_v15 }
 0x2ec   : > { %v5614_v52 = vpop.f32.mrb[160].mxu0  ;;  %v5678_v57 = vpop.f32.mrb[160].mxu1 }
 0x2ed   : > { %v5615_v22 = vpop.f32.mrb[161].mxu0  ;;  %v5679_v44 = vpop.f32.mrb[161].mxu1 }
 0x2ee   : > { %v5616_v18 = vadd.f32 %v5615_v22, %v5614_v52  ;;  %v5680_v39 = vadd.f32 %v5679_v44, %v5678_v57  ;;  %v5617_v41 = vpop.f32.mrb[162].mxu0  ;;  %v5681_v61 = vpop.f32.mrb[162].mxu1 }
 0x2ef   : > { %v5618_v59 = vpop.f32.mrb[163].mxu0  ;;  %v5682_v38 = vpop.f32.mrb[163].mxu1 }
 0x2f0   : > { %v7768_v26 = vadd.f32 %v5616_v18, %v7672_v51  ;;  %v5619_v32 = vadd.f32 %v5618_v59, %v5617_v41  ;;  %v5683_v10 = vadd.f32 %v5682_v38, %v5681_v61  ;;  %v7771_v15 = vadd.f32 %v5680_v39, %v7675_v46 }
 0x2f2   : > { %v7774_v24 = vadd.f32 %v5619_v32, %v7678_v30  ;;  %v7777_v35 = vadd.f32 %v5683_v10, %v7681_v17 }
 0x2f4   : > { %v5620_v53 = vpop.f32.mrb[164].mxu0  ;;  %v5684_v45 = vpop.f32.mrb[164].mxu1 }
 0x2f5   : > { %v5621_v62 = vpop.f32.mrb[165].mxu0  ;;  %v5685_v2 = vpop.f32.mrb[165].mxu1 }
 0x2f6   : > { %v5622_v9 = vadd.f32 %v5621_v62, %v5620_v53  ;;  %v5686_v37 = vadd.f32 %v5685_v2, %v5684_v45  ;;  %v5623_v1 = vpop.f32.mrb[166].mxu0  ;;  %v5687_v51 = vpop.f32.mrb[166].mxu1 }
 0x2f7   : > { %v5624_v40 = vpop.f32.mrb[167].mxu0  ;;  %v5688_v14 = vpop.f32.mrb[167].mxu1 }
 0x2f8   : > { %v7780_v7 = vadd.f32 %v5622_v9, %v7684_v29  ;;  %v5625_v46 = vadd.f32 %v5624_v40, %v5623_v1  ;;  %v5689_v21 = vadd.f32 %v5688_v14, %v5687_v51  ;;  %v7783_v30 = vadd.f32 %v5686_v37, %v7687_v49 }
 0x2fa   : > { %v7786_v17 = vadd.f32 %v5625_v46, %v7690_v47  ;;  %v7789_v13 = vadd.f32 %v5689_v21, %v7693_v28 }
 0x2fc   : > { %v5626_v4 = vpop.f32.mrb[168].mxu0  ;;  %v5690_v60 = vpop.f32.mrb[168].mxu1 }
 0x2fd   : > { %v5627_v6 = vpop.f32.mrb[169].mxu0  ;;  %v5691_v0 = vpop.f32.mrb[169].mxu1 }
 0x2fe   : > { %v5628_v52 = vadd.f32 %v5627_v6, %v5626_v4  ;;  %v5692_v57 = vadd.f32 %v5691_v0, %v5690_v60  ;;  %v5629_v22 = vpop.f32.mrb[170].mxu0  ;;  %v5693_v29 = vpop.f32.mrb[170].mxu1 }
 0x2ff   : > { %v5630_v44 = vpop.f32.mrb[171].mxu0  ;;  %v5694_v18 = vpop.f32.mrb[171].mxu1 }
 0x300   : > { %v7792_v39 = vadd.f32 %v5628_v52, %v7696_v58  ;;  %v5631_v49 = vadd.f32 %v5630_v44, %v5629_v22  ;;  %v5695_v41 = vadd.f32 %v5694_v18, %v5693_v29  ;;  %v7795_v47 = vadd.f32 %v5692_v57, %v7699_v12 }
 0x302   : > { %v7798_v28 = vadd.f32 %v5631_v49, %v7702_v50  ;;  %v7801_v61 = vadd.f32 %v5695_v41, %v7705_v3 }
 0x304   : > { %v5632_v59 = vpop.f32.mrb[172].mxu0  ;;  %v5696_v38 = vpop.f32.mrb[172].mxu1 }
 0x305   : > { %v5633_v32 = vpop.f32.mrb[173].mxu0  ;;  %v5697_v10 = vpop.f32.mrb[173].mxu1 }
 0x306   : > { %v5634_v53 = vadd.f32 %v5633_v32, %v5632_v59  ;;  %v5698_v45 = vadd.f32 %v5697_v10, %v5696_v38  ;;  %v5635_v62 = vpop.f32.mrb[174].mxu0  ;;  %v5699_v58 = vpop.f32.mrb[174].mxu1 }
 0x307   : > { %v5636_v2 = vpop.f32.mrb[175].mxu0  ;;  %v5700_v9 = vpop.f32.mrb[175].mxu1 }
 0x308   : > { %v7804_v37 = vadd.f32 %v5634_v53, %v7708_v36  ;;  %v5637_v12 = vadd.f32 %v5636_v2, %v5635_v62  ;;  %v5701_v1 = vadd.f32 %v5700_v9, %v5699_v58  ;;  %v7807_v50 = vadd.f32 %v5698_v45, %v7711_v34 }
 0x30a   : > { %v7810_v3 = vadd.f32 %v5637_v12, %v7714_v48  ;;  %v7813_v51 = vadd.f32 %v5701_v1, %v7717_v23 }
 0x30c   : > { %v5702_v40 = vpop.f32.mrb[176].mxu1  ;;  %v5840_v14 = vpop.f32.mrb[176].mxu0 }
 0x30d   : > { %v3471_v46 = vadd.f32 %v5840_v14, %v7735_v42  ;;  %v5703_v21 = vpop.f32.mrb[177].mxu1  ;;  %v3462_v4 = vpop.f32.mrb[177].mxu0 }
 0x30e   : > { %v5704_v60 = vadd.f32 %v5703_v21, %v5702_v40  ;;  %v3463_v36 = vadd.f32 %v3462_v4, %v7723_v5  ;;  %v5705_v6 = vpop.f32.mrb[178].mxu1  ;;  %v5841_v0 = vpop.f32.mrb[178].mxu0 }
 0x30f   : > { %v3623_v52 = vmul.f32 0.01, %v3471_v46  ;;  %v3474_v34 = vadd.f32 %v5841_v0, %v7741_v63  ;;  %v5706_v57 = vpop.f32.mrb[179].mxu1  ;;  %v3465_v48 = vpop.f32.mrb[179].mxu0  ;;  %vm3591_vm0 = vcmp.gt.f32.partialorder %v3471_v46, 0.0 }
 0x310   : > { %v3621_v22 = vmul.f32 0.01, %v3463_v36  ;;  %v5707_v23 = vadd.f32 %v5706_v57, %v5705_v6  ;;  %v3466_v29 = vadd.f32 %v3465_v48, %v7729_v20  ;;  %vm3589_vm1 = vcmp.gt.f32.partialorder %v3463_v36, 0.0 }
 0x311   : > { %vm3592_vm2 = vcmp.gt.f32.partialorder %v3474_v34, 0.0  ;;  %v3624_v42 = vmul.f32 0.01, %v3474_v34  ;;  %v7820_v44 = vadd.f32 %v5704_v60, %v7720_v25  ;;  %v3655_v49 = vsel %vm3591_vm0, %v3471_v46, %v3623_v52 }
 0x312   : > { %vm3590_vm3 = vcmp.gt.f32.partialorder %v3466_v29, 0.0  ;;  %v3622_v5 = vmul.f32 0.01, %v3466_v29  ;;  %v7823_v18 = vadd.f32 %v5707_v23, %v7726_v33  ;;  %v3653_v32 = vsel %vm3589_vm1, %v3463_v36, %v3621_v22 }
 0x313   : > { %v3656_v63 = vsel %vm3592_vm2, %v3474_v34, %v3624_v42 }
 0x314   : > { %v3686_v41 = vpack.c.bf16 %v3656_v63, %v3655_v49  ;;  %v5708_v59 = vpop.f32.mrb[180].mxu1  ;;  %v5844_v38 = vpop.f32.mrb[180].mxu0  ;;  %v3654_v10 = vsel %vm3590_vm3, %v3466_v29, %v3622_v5 }
 0x315   : > { %v3487_v20 = vadd.f32 %v5844_v38, %v7759_v11  ;;  %v5709_v53 = vpop.f32.mrb[181].mxu1  ;;  %v3478_v45 = vpop.f32.mrb[181].mxu0  ;;  %v3685_v62 = vpack.c.bf16 %v3654_v10, %v3653_v32 }
 0x316   : > { %v5710_v58 = vadd.f32 %v5709_v53, %v5708_v59  ;;  %v3479_v25 = vadd.f32 %v3478_v45, %v7747_v19  ;;  %v5711_v2 = vpop.f32.mrb[182].mxu1  ;;  %v5845_v9 = vpop.f32.mrb[182].mxu0 }
 0x317   : > { %v3627_v12 = vmul.f32 0.01, %v3487_v20  ;;  %v3490_v33 = vadd.f32 %v5845_v9, %v7765_v56  ;;  %v5712_v1 = vpop.f32.mrb[183].mxu1  ;;  %v3481_v40 = vpop.f32.mrb[183].mxu0  ;;  %5886 = vmatprep.mubr.bf16.mxu1 %v3685_v62  ;;  %vm3595_vm4 = vcmp.gt.f32.partialorder %v3487_v20, 0.0 }
 0x318   : > { %v3625_v14 = vmul.f32 0.01, %v3479_v25  ;;  %v5713_v46 = vadd.f32 %v5712_v1, %v5711_v2  ;;  %v3482_v21 = vadd.f32 %v3481_v40, %v7753_v8  ;;  %5887 = vmatmul.mubr.bf16.vlgmr.msra.gmra.mrb[208].mxu1 %v3686_v41  ;;  %vm3593_vm5 = vcmp.gt.f32.partialorder %v3479_v25, 0.0 }
 0x319   : > { %vm3596_vm6 = vcmp.gt.f32.partialorder %v3490_v33, 0.0  ;;  %v3628_v11 = vmul.f32 0.01, %v3490_v33  ;;  %v7830_v4 = vadd.f32 %v5710_v58, %v7732_v54  ;;  %v3659_v56 = vsel %vm3595_vm4, %v3487_v20, %v3627_v12 }
 0x31a   : > { %vm3594_vm7 = vcmp.gt.f32.partialorder %v3482_v21, 0.0  ;;  %v3626_v19 = vmul.f32 0.01, %v3482_v21  ;;  %v7833_v60 = vadd.f32 %v5713_v46, %v7738_v55  ;;  %v3657_v52 = vsel %vm3593_vm5, %v3479_v25, %v3625_v14 }
 0x31b   : > { %v3660_v36 = vsel %vm3596_vm6, %v3490_v33, %v3628_v11 }
 0x31c   : > { %v5714_v6 = vpop.f32.mrb[184].mxu1  ;;  %v5848_v0 = vpop.f32.mrb[184].mxu0  ;;  %v3658_v34 = vsel %vm3594_vm7, %v3482_v21, %v3626_v19  ;;  %v3688_v57 = vpack.c.bf16 %v3660_v36, %v3659_v56 }
 0x31d   : > { %v3503_v8 = vadd.f32 %v5848_v0, %v7783_v30  ;;  %v5715_v48 = vpop.f32.mrb[185].mxu1  ;;  %v3494_v22 = vpop.f32.mrb[185].mxu0  ;;  %v3687_v23 = vpack.c.bf16 %v3658_v34, %v3657_v52 }
 0x31e   : > { %v5716_v29 = vadd.f32 %v5715_v48, %v5714_v6  ;;  %v3495_v54 = vadd.f32 %v3494_v22, %v7771_v15  ;;  %v5717_v42 = vpop.f32.mrb[186].mxu1  ;;  %v5849_v5 = vpop.f32.mrb[186].mxu0 }
 0x31f   : > { %v3631_v49 = vmul.f32 0.01, %v3503_v8  ;;  %v3506_v55 = vadd.f32 %v5849_v5, %v7789_v13  ;;  %v5718_v63 = vpop.f32.mrb[187].mxu1  ;;  %v3497_v41 = vpop.f32.mrb[187].mxu0  ;;  %5890 = vmatprep.mubr.bf16.mxu1 %v3687_v23  ;;  %vm3599_vm8 = vcmp.gt.f32.partialorder %v3503_v8, 0.0 }
 0x320   : > { %v3629_v59 = vmul.f32 0.01, %v3495_v54  ;;  %v5719_v38 = vadd.f32 %v5718_v63, %v5717_v42  ;;  %v3498_v32 = vadd.f32 %v3497_v41, %v7777_v35  ;;  %5891 = vmatmul.mubr.bf16.gmra.mrb[212].mxu1 %v3688_v57  ;;  %vm3597_vm9 = vcmp.gt.f32.partialorder %v3495_v54, 0.0 }
 0x321   : > { %vm3600_vm10 = vcmp.gt.f32.partialorder %v3506_v55, 0.0  ;;  %v3632_v30 = vmul.f32 0.01, %v3506_v55  ;;  %v7840_v10 = vadd.f32 %v5716_v29, %v7744_v43  ;;  %v3663_v13 = vsel %vm3599_vm8, %v3503_v8, %v3631_v49 }
 0x322   : > { %vm3598_vm11 = vcmp.gt.f32.partialorder %v3498_v32, 0.0  ;;  %v3630_v15 = vmul.f32 0.01, %v3498_v32  ;;  %v7843_v20 = vadd.f32 %v5719_v38, %v7750_v16  ;;  %v3661_v58 = vsel %vm3597_vm9, %v3495_v54, %v3629_v59 }
 0x323   : > { %v3664_v53 = vsel %vm3600_vm10, %v3506_v55, %v3632_v30 }
 0x324   : > { %v5720_v45 = vpop.f32.mrb[188].mxu1  ;;  %v5852_v62 = vpop.f32.mrb[188].mxu0  ;;  %v3662_v25 = vsel %vm3598_vm11, %v3498_v32, %v3630_v15  ;;  %v3690_v2 = vpack.c.bf16 %v3664_v53, %v3663_v13 }
 0x325   : > { %v3519_v35 = vadd.f32 %v5852_v62, %v7807_v50  ;;  %v5721_v9 = vpop.f32.mrb[189].mxu1  ;;  %v3510_v12 = vpop.f32.mrb[189].mxu0  ;;  %v3689_v33 = vpack.c.bf16 %v3662_v25, %v3661_v58 }
 0x326   : > { %v5722_v1 = vadd.f32 %v5721_v9, %v5720_v45  ;;  %v3511_v43 = vadd.f32 %v3510_v12, %v7795_v47  ;;  %v5723_v40 = vpop.f32.mrb[190].mxu1  ;;  %v5853_v14 = vpop.f32.mrb[190].mxu0 }
 0x327   : > { %v3635_v46 = vmul.f32 0.01, %v3519_v35  ;;  %v3522_v16 = vadd.f32 %v5853_v14, %v7813_v51  ;;  %v5724_v21 = vpop.f32.mrb[191].mxu1  ;;  %v3513_v11 = vpop.f32.mrb[191].mxu0  ;;  %5894 = vmatprep.mubr.bf16.mxu1 %v3689_v33  ;;  %vm3603_vm12 = vcmp.gt.f32.partialorder %v3519_v35, 0.0 }
 0x328   : > { %v3633_v19 = vmul.f32 0.01, %v3511_v43  ;;  %v5725_v56 = vadd.f32 %v5724_v21, %v5723_v40  ;;  %v3514_v36 = vadd.f32 %v3513_v11, %v7801_v61  ;;  %5895 = vmatmul.mubr.bf16.gmra.mrb[216].mxu1 %v3690_v2  ;;  %vm3601_vm13 = vcmp.gt.f32.partialorder %v3511_v43, 0.0 }
 0x329   : > { %vm3604_vm14 = vcmp.gt.f32.partialorder %v3522_v16, 0.0  ;;  %v3636_v50 = vmul.f32 0.01, %v3522_v16  ;;  %v3390_v6 = vadd.f32 %v5722_v1, %v7756_v31  ;;  %v3667_v52 = vsel %vm3603_vm12, %v3519_v35, %v3635_v46 }
 0x32a   : > { %vm3602_vm15 = vcmp.gt.f32.partialorder %v3514_v36, 0.0  ;;  %v3634_v47 = vmul.f32 0.01, %v3514_v36  ;;  %v3393_v0 = vadd.f32 %v5725_v56, %v7762_v27  ;;  %v3665_v8 = vsel %vm3601_vm13, %v3511_v43, %v3633_v19 }
 0x32b   : > { %v3668_v51 = vsel %vm3604_vm14, %v3522_v16, %v3636_v50 }
 0x32c   : > { %v5726_v34 = vpop.f32.mrb[192].mxu1  ;;  %v5856_v57 = vpop.f32.mrb[192].mxu0  ;;  %v3666_v48 = vsel %vm3602_vm15, %v3514_v36, %v3634_v47  ;;  %v3692_v22 = vpack.c.bf16 %v3668_v51, %v3667_v52 }
 0x32d   : > { %v3535_v23 = vadd.f32 %v5856_v57, %v7830_v4  ;;  %v5727_v61 = vpop.f32.mrb[193].mxu1  ;;  %v3526_v29 = vpop.f32.mrb[193].mxu0  ;;  %v3691_v54 = vpack.c.bf16 %v3666_v48, %v3665_v8 }
 0x32e   : > { %v5728_v42 = vadd.f32 %v5727_v61, %v5726_v34  ;;  %v3527_v5 = vadd.f32 %v3526_v29, %v7820_v44  ;;  %v5729_v31 = vpop.f32.mrb[194].mxu1  ;;  %v5857_v49 = vpop.f32.mrb[194].mxu0 }
 0x32f   : > { %v3639_v55 = vmul.f32 0.01, %v3535_v23  ;;  %v3538_v27 = vadd.f32 %v5857_v49, %v7833_v60  ;;  %v5730_v63 = vpop.f32.mrb[195].mxu1  ;;  %v3529_v41 = vpop.f32.mrb[195].mxu0  ;;  %5898 = vmatprep.mubr.bf16.mxu1 %v3691_v54  ;;  %vm3607_vm0 = vcmp.gt.f32.partialorder %v3535_v23, 0.0 }
 0x330   : > { %v3637_v59 = vmul.f32 0.01, %v3527_v5  ;;  %v5731_v38 = vadd.f32 %v5730_v63, %v5729_v31  ;;  %v3530_v32 = vadd.f32 %v3529_v41, %v7823_v18  ;;  %5899 = vmatmul.mubr.bf16.gmra.mrb[220].mxu1 %v3692_v22  ;;  %vm3605_vm1 = vcmp.gt.f32.partialorder %v3527_v5, 0.0 }
 0x331   : > { %vm3608_vm2 = vcmp.gt.f32.partialorder %v3538_v27, 0.0  ;;  %v3640_v4 = vmul.f32 0.01, %v3538_v27  ;;  %v3398_v30 = vadd.f32 %v5728_v42, %v7768_v26  ;;  %v3671_v13 = vsel %vm3607_vm0, %v3535_v23, %v3639_v55 }
 0x332   : > { %vm3606_vm3 = vcmp.gt.f32.partialorder %v3530_v32, 0.0  ;;  %v3638_v44 = vmul.f32 0.01, %v3530_v32  ;;  %v3401_v15 = vadd.f32 %v5731_v38, %v7774_v24  ;;  %v3669_v62 = vsel %vm3605_vm1, %v3527_v5, %v3637_v59 }
 0x333   : > { %v3672_v60 = vsel %vm3608_vm2, %v3538_v27, %v3640_v4 }
 0x334   : > { %v5732_v53 = vpop.f32.mrb[196].mxu1  ;;  %v5860_v45 = vpop.f32.mrb[196].mxu0  ;;  %v3670_v58 = vsel %vm3606_vm3, %v3530_v32, %v3638_v44  ;;  %v3694_v25 = vpack.c.bf16 %v3672_v60, %v3671_v13 }
 0x335   : > { %v3551_v2 = vadd.f32 %v5860_v45, %v3390_v6  ;;  %v5733_v35 = vpop.f32.mrb[197].mxu1  ;;  %v3542_v18 = vpop.f32.mrb[197].mxu0  ;;  %v3693_v9 = vpack.c.bf16 %v3670_v58, %v3669_v62 }
 0x336   : > { %v5734_v12 = vadd.f32 %v5733_v35, %v5732_v53  ;;  %v3543_v33 = vadd.f32 %v3542_v18, %v7840_v10  ;;  %v5735_v1 = vpop.f32.mrb[198].mxu1  ;;  %v5861_v26 = vpop.f32.mrb[198].mxu0 }
 0x337   : > { %v3643_v43 = vmul.f32 0.01, %v3551_v2  ;;  %v3554_v40 = vadd.f32 %v5861_v26, %v3393_v0  ;;  %v5736_v14 = vpop.f32.mrb[199].mxu1  ;;  %v3545_v24 = vpop.f32.mrb[199].mxu0  ;;  %5902 = vmatprep.mubr.bf16.mxu1 %v3693_v9  ;;  %vm3611_vm4 = vcmp.gt.f32.partialorder %v3551_v2, 0.0 }
 0x338   : > { %v3641_v46 = vmul.f32 0.01, %v3543_v33  ;;  %v5737_v16 = vadd.f32 %v5736_v14, %v5735_v1  ;;  %v3546_v21 = vadd.f32 %v3545_v24, %v7843_v20  ;;  %5903 = vmatmul.mubr.bf16.gmra.mrb[224].mxu1 %v3694_v25  ;;  %vm3609_vm5 = vcmp.gt.f32.partialorder %v3543_v33, 0.0 }
 0x339   : > { %vm3612_vm6 = vcmp.gt.f32.partialorder %v3554_v40, 0.0  ;;  %v3644_v11 = vmul.f32 0.01, %v3554_v40  ;;  %v3406_v19 = vadd.f32 %v5734_v12, %v7780_v7  ;;  %v3675_v36 = vsel %vm3611_vm4, %v3551_v2, %v3643_v43 }
 0x33a   : > { %vm3610_vm7 = vcmp.gt.f32.partialorder %v3546_v21, 0.0  ;;  %v3642_v10 = vmul.f32 0.01, %v3546_v21  ;;  %v3409_v56 = vadd.f32 %v5737_v16, %v7786_v17  ;;  %v3673_v0 = vsel %vm3609_vm5, %v3543_v33, %v3641_v46 }
 0x33b   : > { %v3676_v50 = vsel %vm3612_vm6, %v3554_v40, %v3644_v11  ;;  %v7865_v11 = vld [vmem:[#allocation10] ss:$0 sm:$0xff] }
 0x33c   : > { %v5738_v6 = vpop.f32.mrb[200].mxu1  ;;  %v5864_v47 = vpop.f32.mrb[200].mxu0  ;;  %v3674_v52 = vsel %vm3610_vm7, %v3546_v21, %v3642_v10  ;;  %v3696_v51 = vpack.c.bf16 %v3676_v50, %v3675_v36  ;;  %v6511_v21 = vld [vmem:[#allocation11 + $0x38] sm:$0xff]  }
 0x33d   : > { %v3567_v34 = vadd.f32 %v5864_v47, %v3406_v19  ;;  %v5739_v57 = vpop.f32.mrb[201].mxu1  ;;  %v3558_v20 = vpop.f32.mrb[201].mxu0  ;;  %v3695_v8 = vpack.c.bf16 %v3674_v52, %v3673_v0  ;;  %5932 = vmatprep.subr.bf16.mxu0 %v6511_v21 }
 0x33e   : > { %v5740_v48 = vadd.f32 %v5739_v57, %v5738_v6  ;;  %v3559_v22 = vadd.f32 %v3558_v20, %v3398_v30  ;;  %v5741_v23 = vpop.f32.mrb[202].mxu1  ;;  %v5865_v61 = vpop.f32.mrb[202].mxu0  ;;  %5933 = vmatpush3.bf16.msra.mxu0 %v6511_v21 }
 0x33f   : > { %v3647_v7 = vmul.f32 0.01, %v3567_v34  ;;  %v3570_v29 = vadd.f32 %v5865_v61, %v3409_v56  ;;  %v5742_v54 = vpop.f32.mrb[203].mxu1  ;;  %v3561_v42 = vpop.f32.mrb[203].mxu0  ;;  %5906 = vmatprep.mubr.bf16.mxu1 %v3695_v8  ;;  %vm3615_vm8 = vcmp.gt.f32.partialorder %v3567_v34, 0.0 }
 0x340   : > { %v3645_v17 = vmul.f32 0.01, %v3559_v22  ;;  %v5743_v5 = vadd.f32 %v5742_v54, %v5741_v23  ;;  %v3562_v31 = vadd.f32 %v3561_v42, %v3401_v15  ;;  %5907 = vmatmul.mubr.bf16.gmra.mrb[228].mxu1 %v3696_v51  ;;  %vm3613_vm9 = vcmp.gt.f32.partialorder %v3559_v22, 0.0 }
 0x341   : > { %vm3616_vm10 = vcmp.gt.f32.partialorder %v3570_v29, 0.0  ;;  %v3648_v49 = vmul.f32 0.01, %v3570_v29  ;;  %v3414_v55 = vadd.f32 %v5740_v48, %v7792_v39  ;;  %v3679_v41 = vsel %vm3615_vm8, %v3567_v34, %v3647_v7 }
 0x342   : > { %vm3614_vm11 = vcmp.gt.f32.partialorder %v3562_v31, 0.0  ;;  %v3646_v27 = vmul.f32 0.01, %v3562_v31  ;;  %v3417_v63 = vadd.f32 %v5743_v5, %v7798_v28  ;;  %v3677_v4 = vsel %vm3613_vm9, %v3559_v22, %v3645_v17 }
 0x343   : > { %v3680_v59 = vsel %vm3616_vm10, %v3570_v29, %v3648_v49 }
 0x344   : > { %v5744_v38 = vpop.f32.mrb[204].mxu1  ;;  %v5868_v32 = vpop.f32.mrb[204].mxu0  ;;  %v3678_v30 = vsel %vm3614_vm11, %v3562_v31, %v3646_v27  ;;  %v3698_v44 = vpack.c.bf16 %v3680_v59, %v3679_v41 }
 0x345   : > { %v5745_v13 = vpop.f32.mrb[205].mxu1  ;;  %v3574_v60 = vpop.f32.mrb[205].mxu0  ;;  %v3697_v15 = vpack.c.bf16 %v3678_v30, %v3677_v4 }
 0x346   : > { %v5746_v53 = vadd.f32 %v5745_v13, %v5744_v38  ;;  %v3575_v45 = vadd.f32 %v3574_v60, %v3414_v55  ;;  %v5747_v62 = vpop.f32.mrb[206].mxu1  ;;  %v5869_v58 = vpop.f32.mrb[206].mxu0 }
 0x347   : > { %v5748_v25 = vpop.f32.mrb[207].mxu1  ;;  %v3577_v39 = vpop.f32.mrb[207].mxu0  ;;  %5910 = vmatprep.mubr.bf16.mxu1 %v3697_v15 }
 0x348   : > { %v3422_v2 = vadd.f32 %v5746_v53, %v7804_v37  ;;  %v5749_v28 = vadd.f32 %v5748_v25, %v5747_v62  ;;  %5911 = vmatmul.mubr.bf16.gmra.mrb[232].mxu1 %v3698_v44  ;;  %v3649_v35 = vmul.f32 0.01, %v3575_v45  ;;  %v3578_v18 = vadd.f32 %v3577_v39, %v3417_v63 }
 0x349   : > { %vm3617_vm12 = vcmp.gt.f32.partialorder %v3575_v45, 0.0 }
 0x34a   : > { %v3583_v9 = vadd.f32 %v5868_v32, %v3422_v2  ;;  %v3425_v12 = vadd.f32 %v5749_v28, %v7810_v3  ;;  %vm3618_vm13 = vcmp.gt.f32.partialorder %v3578_v18, 0.0  ;;  %v3650_v33 = vmul.f32 0.01, %v3578_v18 }
 0x34b   : > { %v3681_v43 = vsel %vm3617_vm12, %v3575_v45, %v3649_v35 }
 0x34c   : > { %v3651_v1 = vmul.f32 0.01, %v3583_v9  ;;  %v3586_v26 = vadd.f32 %v5869_v58, %v3425_v12  ;;  %v3682_v40 = vsel %vm3618_vm13, %v3578_v18, %v3650_v33  ;;  %vm3619_vm14 = vcmp.gt.f32.partialorder %v3583_v9, 0.0 }
 0x34d   : > { %v3699_v24 = vpack.c.bf16 %v3682_v40, %v3681_v43 }
 0x34e   : > { %v3652_v14 = vmul.f32 0.01, %v3586_v26  ;;  %vm3620_vm15 = vcmp.gt.f32.partialorder %v3586_v26, 0.0  ;;  %v3683_v37 = vsel %vm3619_vm14, %v3583_v9, %v3651_v1 }
 0x34f   : > { %5914 = vmatprep.mubr.bf16.mxu1 %v3699_v24 }
 0x350   : > { %v3684_v46 = vsel %vm3620_vm15, %v3586_v26, %v3652_v14 }
 0x351   : > { %v3700_v16 = vpack.c.bf16 %v3684_v46, %v3683_v37 }
 0x353   : > { %5915 = vmatmul.mubr.bf16.gmra.mrb[236].mxu1 %v3700_v16 }
 0x3eb   : > { %v5888_v3 = vpop.f32.mrb[208].mxu1 }
 0x3ec   : > { %v3815_v19 = vadd.f32 %v5888_v3, %v7865_v11  ;;  %v3806_v10 = vpop.f32.mrb[209].mxu1 }
 0x3ed   : > { %v3807_v56 = vadd.f32 %v7865_v11, %v3806_v10  ;;  %v5889_v36 = vpop.f32.mrb[210].mxu1 }
 0x3ee   : > { %v3967_v50 = vmul.f32 0.01, %v3815_v19  ;;  %v3818_v6 = vadd.f32 %v5889_v36, %v7865_v11  ;;  %v3809_v47 = vpop.f32.mrb[211].mxu1  ;;  %vm3935_vm0 = vcmp.gt.f32.partialorder %v3815_v19, 0.0 }
 0x3ef   : > { %v3965_v0 = vmul.f32 0.01, %v3807_v56  ;;  %v3810_v52 = vadd.f32 %v7865_v11, %v3809_v47  ;;  %vm3933_vm1 = vcmp.gt.f32.partialorder %v3807_v56, 0.0 }
 0x3f0   : > { %vm3936_vm2 = vcmp.gt.f32.partialorder %v3818_v6, 0.0  ;;  %v3968_v51 = vmul.f32 0.01, %v3818_v6  ;;  %v3999_v57 = vsel %vm3935_vm0, %v3815_v19, %v3967_v50 }
 0x3f1   : > { %vm3934_vm3 = vcmp.gt.f32.partialorder %v3810_v52, 0.0  ;;  %v3966_v34 = vmul.f32 0.01, %v3810_v52  ;;  %v3997_v22 = vsel %vm3933_vm1, %v3807_v56, %v3965_v0 }
 0x3f2   : > { %v4000_v20 = vsel %vm3936_vm2, %v3818_v6, %v3968_v51 }
 0x3f3   : > { %v4030_v8 = vpack.c.bf16 %v4000_v20, %v3999_v57  ;;  %v5892_v48 = vpop.f32.mrb[212].mxu1  ;;  %v3998_v23 = vsel %vm3934_vm3, %v3810_v52, %v3966_v34 }
 0x3f4   : > { %v3831_v61 = vadd.f32 %v5892_v48, %v7865_v11  ;;  %v3822_v7 = vpop.f32.mrb[213].mxu1  ;;  %v4029_v29 = vpack.c.bf16 %v3998_v23, %v3997_v22 }
 0x3f5   : > { %v3823_v54 = vadd.f32 %v7865_v11, %v3822_v7  ;;  %v5893_v42 = vpop.f32.mrb[214].mxu1 }
 0x3f6   : > { %v3971_v17 = vmul.f32 0.01, %v3831_v61  ;;  %v3834_v5 = vadd.f32 %v5893_v42, %v7865_v11  ;;  %v3825_v31 = vpop.f32.mrb[215].mxu1  ;;  %5934 = vmatprep.mubr.bf16.mxu0 %v4029_v29  ;;  %vm3939_vm4 = vcmp.gt.f32.partialorder %v3831_v61, 0.0 }
 0x3f7   : > { %v3969_v49 = vmul.f32 0.01, %v3823_v54  ;;  %v3826_v55 = vadd.f32 %v7865_v11, %v3825_v31  ;;  %5935 = vmatmul.mubr.bf16.vlgmr.msra.gmra.mrb[208].mxu0 %v4030_v8  ;;  %vm3937_vm5 = vcmp.gt.f32.partialorder %v3823_v54, 0.0 }
 0x3f8   : > { %vm3940_vm6 = vcmp.gt.f32.partialorder %v3834_v5, 0.0  ;;  %v3972_v27 = vmul.f32 0.01, %v3834_v5  ;;  %v4003_v41 = vsel %vm3939_vm4, %v3831_v61, %v3971_v17 }
 0x3f9   : > { %vm3938_vm7 = vcmp.gt.f32.partialorder %v3826_v55, 0.0  ;;  %v3970_v63 = vmul.f32 0.01, %v3826_v55  ;;  %v4001_v32 = vsel %vm3937_vm5, %v3823_v54, %v3969_v49 }
 0x3fa   : > { %v4004_v59 = vsel %vm3940_vm6, %v3834_v5, %v3972_v27 }
 0x3fb   : > { %v5896_v38 = vpop.f32.mrb[216].mxu1  ;;  %v4002_v4 = vsel %vm3938_vm7, %v3826_v55, %v3970_v63  ;;  %v4032_v30 = vpack.c.bf16 %v4004_v59, %v4003_v41 }
 0x3fc   : > { %v3847_v44 = vadd.f32 %v5896_v38, %v7865_v11  ;;  %v3838_v13 = vpop.f32.mrb[217].mxu1  ;;  %v4031_v60 = vpack.c.bf16 %v4002_v4, %v4001_v32 }
 0x3fd   : > { %v3839_v15 = vadd.f32 %v7865_v11, %v3838_v13  ;;  %v5897_v53 = vpop.f32.mrb[218].mxu1 }
 0x3fe   : > { %v3975_v45 = vmul.f32 0.01, %v3847_v44  ;;  %v3850_v62 = vadd.f32 %v5897_v53, %v7865_v11  ;;  %v3841_v58 = vpop.f32.mrb[219].mxu1  ;;  %5938 = vmatprep.mubr.bf16.mxu0 %v4031_v60  ;;  %vm3943_vm8 = vcmp.gt.f32.partialorder %v3847_v44, 0.0 }
 0x3ff   : > { %v3973_v25 = vmul.f32 0.01, %v3839_v15  ;;  %v3842_v39 = vadd.f32 %v7865_v11, %v3841_v58  ;;  %5939 = vmatmul.mubr.bf16.gmra.mrb[212].mxu0 %v4032_v30  ;;  %vm3941_vm9 = vcmp.gt.f32.partialorder %v3839_v15, 0.0 }
 0x400   : > { %vm3944_vm10 = vcmp.gt.f32.partialorder %v3850_v62, 0.0  ;;  %v3976_v2 = vmul.f32 0.01, %v3850_v62  ;;  %v4007_v35 = vsel %vm3943_vm8, %v3847_v44, %v3975_v45 }
 0x401   : > { %vm3942_vm11 = vcmp.gt.f32.partialorder %v3842_v39, 0.0  ;;  %v3974_v28 = vmul.f32 0.01, %v3842_v39  ;;  %v4005_v12 = vsel %vm3941_vm9, %v3839_v15, %v3973_v25 }
 0x402   : > { %v4008_v18 = vsel %vm3944_vm10, %v3850_v62, %v3976_v2 }
 0x403   : > { %v5900_v9 = vpop.f32.mrb[220].mxu1  ;;  %v4006_v33 = vsel %vm3942_vm11, %v3842_v39, %v3974_v28  ;;  %v4034_v1 = vpack.c.bf16 %v4008_v18, %v4007_v35 }
 0x404   : > { %v3863_v26 = vadd.f32 %v5900_v9, %v7865_v11  ;;  %v3854_v43 = vpop.f32.mrb[221].mxu1  ;;  %v4033_v40 = vpack.c.bf16 %v4006_v33, %v4005_v12 }
 0x405   : > { %v3855_v14 = vadd.f32 %v7865_v11, %v3854_v43  ;;  %v5901_v24 = vpop.f32.mrb[222].mxu1 }
 0x406   : > { %v3979_v37 = vmul.f32 0.01, %v3863_v26  ;;  %v3866_v46 = vadd.f32 %v5901_v24, %v7865_v11  ;;  %v3857_v16 = vpop.f32.mrb[223].mxu1  ;;  %5942 = vmatprep.mubr.bf16.mxu0 %v4033_v40  ;;  %vm3947_vm12 = vcmp.gt.f32.partialorder %v3863_v26, 0.0 }
 0x407   : > { %v3977_v21 = vmul.f32 0.01, %v3855_v14  ;;  %v3858_v3 = vadd.f32 %v7865_v11, %v3857_v16  ;;  %5943 = vmatmul.mubr.bf16.gmra.mrb[216].mxu0 %v4034_v1  ;;  %vm3945_vm13 = vcmp.gt.f32.partialorder %v3855_v14, 0.0 }
 0x408   : > { %vm3948_vm14 = vcmp.gt.f32.partialorder %v3866_v46, 0.0  ;;  %v3980_v19 = vmul.f32 0.01, %v3866_v46  ;;  %v4011_v56 = vsel %vm3947_vm12, %v3863_v26, %v3979_v37 }
 0x409   : > { %vm3946_vm15 = vcmp.gt.f32.partialorder %v3858_v3, 0.0  ;;  %v3978_v10 = vmul.f32 0.01, %v3858_v3  ;;  %v4009_v6 = vsel %vm3945_vm13, %v3855_v14, %v3977_v21 }
 0x40a   : > { %v4012_v36 = vsel %vm3948_vm14, %v3866_v46, %v3980_v19 }
 0x40b   : > { %v5904_v50 = vpop.f32.mrb[224].mxu1  ;;  %v4010_v47 = vsel %vm3946_vm15, %v3858_v3, %v3978_v10  ;;  %v4036_v0 = vpack.c.bf16 %v4012_v36, %v4011_v56 }
 0x40c   : > { %v3879_v52 = vadd.f32 %v5904_v50, %v7865_v11  ;;  %v3870_v51 = vpop.f32.mrb[225].mxu1  ;;  %v4035_v34 = vpack.c.bf16 %v4010_v47, %v4009_v6 }
 0x40d   : > { %v3871_v57 = vadd.f32 %v7865_v11, %v3870_v51  ;;  %v5905_v20 = vpop.f32.mrb[226].mxu1 }
 0x40e   : > { %v3983_v8 = vmul.f32 0.01, %v3879_v52  ;;  %v3882_v48 = vadd.f32 %v5905_v20, %v7865_v11  ;;  %v3873_v22 = vpop.f32.mrb[227].mxu1  ;;  %5946 = vmatprep.mubr.bf16.mxu0 %v4035_v34  ;;  %vm3951_vm0 = vcmp.gt.f32.partialorder %v3879_v52, 0.0 }
 0x40f   : > { %v3981_v23 = vmul.f32 0.01, %v3871_v57  ;;  %v3874_v61 = vadd.f32 %v7865_v11, %v3873_v22  ;;  %5947 = vmatmul.mubr.bf16.gmra.mrb[220].mxu0 %v4036_v0  ;;  %vm3949_vm1 = vcmp.gt.f32.partialorder %v3871_v57, 0.0 }
 0x410   : > { %vm3952_vm2 = vcmp.gt.f32.partialorder %v3882_v48, 0.0  ;;  %v3984_v7 = vmul.f32 0.01, %v3882_v48  ;;  %v4015_v54 = vsel %vm3951_vm0, %v3879_v52, %v3983_v8 }
 0x411   : > { %vm3950_vm3 = vcmp.gt.f32.partialorder %v3874_v61, 0.0  ;;  %v3982_v29 = vmul.f32 0.01, %v3874_v61  ;;  %v4013_v5 = vsel %vm3949_vm1, %v3871_v57, %v3981_v23 }
 0x412   : > { %v4016_v42 = vsel %vm3952_vm2, %v3882_v48, %v3984_v7 }
 0x413   : > { %v5908_v17 = vpop.f32.mrb[228].mxu1  ;;  %v4014_v31 = vsel %vm3950_vm3, %v3874_v61, %v3982_v29  ;;  %v4038_v49 = vpack.c.bf16 %v4016_v42, %v4015_v54 }
 0x414   : > { %v3895_v55 = vadd.f32 %v5908_v17, %v7865_v11  ;;  %v3886_v27 = vpop.f32.mrb[229].mxu1  ;;  %v4037_v63 = vpack.c.bf16 %v4014_v31, %v4013_v5 }
 0x415   : > { %v3887_v41 = vadd.f32 %v7865_v11, %v3886_v27  ;;  %v5909_v59 = vpop.f32.mrb[230].mxu1 }
 0x416   : > { %v3987_v38 = vmul.f32 0.01, %v3895_v55  ;;  %v3898_v32 = vadd.f32 %v5909_v59, %v7865_v11  ;;  %v3889_v4 = vpop.f32.mrb[231].mxu1  ;;  %5950 = vmatprep.mubr.bf16.mxu0 %v4037_v63  ;;  %vm3955_vm4 = vcmp.gt.f32.partialorder %v3895_v55, 0.0 }
 0x417   : > { %v3985_v30 = vmul.f32 0.01, %v3887_v41  ;;  %v3890_v44 = vadd.f32 %v7865_v11, %v3889_v4  ;;  %5951 = vmatmul.mubr.bf16.gmra.mrb[224].mxu0 %v4038_v49  ;;  %vm3953_vm5 = vcmp.gt.f32.partialorder %v3887_v41, 0.0 }
 0x418   : > { %vm3956_vm6 = vcmp.gt.f32.partialorder %v3898_v32, 0.0  ;;  %v3988_v13 = vmul.f32 0.01, %v3898_v32  ;;  %v4019_v15 = vsel %vm3955_vm4, %v3895_v55, %v3987_v38 }
 0x419   : > { %vm3954_vm7 = vcmp.gt.f32.partialorder %v3890_v44, 0.0  ;;  %v3986_v60 = vmul.f32 0.01, %v3890_v44  ;;  %v4017_v62 = vsel %vm3953_vm5, %v3887_v41, %v3985_v30 }
 0x41a   : > { %v4020_v53 = vsel %vm3956_vm6, %v3898_v32, %v3988_v13 }
 0x41b   : > { %v5912_v45 = vpop.f32.mrb[232].mxu1  ;;  %v4018_v58 = vsel %vm3954_vm7, %v3890_v44, %v3986_v60  ;;  %v4040_v25 = vpack.c.bf16 %v4020_v53, %v4019_v15 }
 0x41c   : > { %v3911_v39 = vadd.f32 %v5912_v45, %v7865_v11  ;;  %v3902_v2 = vpop.f32.mrb[233].mxu1  ;;  %v4039_v28 = vpack.c.bf16 %v4018_v58, %v4017_v62 }
 0x41d   : > { %v3903_v35 = vadd.f32 %v7865_v11, %v3902_v2  ;;  %v5913_v18 = vpop.f32.mrb[234].mxu1 }
 0x41e   : > { %v3991_v9 = vmul.f32 0.01, %v3911_v39  ;;  %v3914_v12 = vadd.f32 %v5913_v18, %v7865_v11  ;;  %v3905_v33 = vpop.f32.mrb[235].mxu1  ;;  %5954 = vmatprep.mubr.bf16.mxu0 %v4039_v28  ;;  %vm3959_vm8 = vcmp.gt.f32.partialorder %v3911_v39, 0.0 }
 0x41f   : > { %v3989_v1 = vmul.f32 0.01, %v3903_v35  ;;  %v3906_v26 = vadd.f32 %v7865_v11, %v3905_v33  ;;  %5955 = vmatmul.mubr.bf16.gmra.mrb[228].mxu0 %v4040_v25  ;;  %vm3957_vm9 = vcmp.gt.f32.partialorder %v3903_v35, 0.0 }
 0x420   : > { %vm3960_vm10 = vcmp.gt.f32.partialorder %v3914_v12, 0.0  ;;  %v3992_v43 = vmul.f32 0.01, %v3914_v12  ;;  %v4023_v14 = vsel %vm3959_vm8, %v3911_v39, %v3991_v9 }
 0x421   : > { %vm3958_vm11 = vcmp.gt.f32.partialorder %v3906_v26, 0.0  ;;  %v3990_v40 = vmul.f32 0.01, %v3906_v26  ;;  %v4021_v37 = vsel %vm3957_vm9, %v3903_v35, %v3989_v1 }
 0x422   : > { %v4024_v24 = vsel %vm3960_vm10, %v3914_v12, %v3992_v43 }
 0x423   : > { %v4022_v46 = vsel %vm3958_vm11, %v3906_v26, %v3990_v40  ;;  %v4042_v16 = vpack.c.bf16 %v4024_v24, %v4023_v14 }
 0x424   : > { %v4041_v21 = vpack.c.bf16 %v4022_v46, %v4021_v37 }
 0x426   : > { %v5916_v3 = vpop.f32.mrb[236].mxu1  ;;  %5958 = vmatprep.mubr.bf16.mxu0 %v4041_v21 }
 0x427   : > { %v3927_v19 = vadd.f32 %v5916_v3, %v7865_v11  ;;  %v3918_v10 = vpop.f32.mrb[237].mxu1  ;;  %5959 = vmatmul.mubr.bf16.gmra.mrb[232].mxu0 %v4042_v16 }
 0x428   : > { %v3919_v56 = vadd.f32 %v7865_v11, %v3918_v10  ;;  %v5917_v36 = vpop.f32.mrb[238].mxu1 }
 0x429   : > { %v3995_v50 = vmul.f32 0.01, %v3927_v19  ;;  %v3930_v6 = vadd.f32 %v5917_v36, %v7865_v11  ;;  %v3921_v47 = vpop.f32.mrb[239].mxu1  ;;  %vm3963_vm12 = vcmp.gt.f32.partialorder %v3927_v19, 0.0 }
 0x42a   : > { %v3993_v0 = vmul.f32 0.01, %v3919_v56  ;;  %v3922_v52 = vadd.f32 %v7865_v11, %v3921_v47  ;;  %vm3961_vm13 = vcmp.gt.f32.partialorder %v3919_v56, 0.0 }
 0x42b   : > { %vm3964_vm14 = vcmp.gt.f32.partialorder %v3930_v6, 0.0  ;;  %v3996_v51 = vmul.f32 0.01, %v3930_v6  ;;  %v4027_v57 = vsel %vm3963_vm12, %v3927_v19, %v3995_v50 }
 0x42c   : > { %vm3962_vm15 = vcmp.gt.f32.partialorder %v3922_v52, 0.0  ;;  %v3994_v34 = vmul.f32 0.01, %v3922_v52  ;;  %v4025_v8 = vsel %vm3961_vm13, %v3919_v56, %v3993_v0 }
 0x42d   : > { %v4028_v20 = vsel %vm3964_vm14, %v3930_v6, %v3996_v51 }
 0x42e   : > { %v4026_v48 = vsel %vm3962_vm15, %v3922_v52, %v3994_v34  ;;  %v4044_v22 = vpack.c.bf16 %v4028_v20, %v4027_v57 }
 0x42f   : > { %v4043_v23 = vpack.c.bf16 %v4026_v48, %v4025_v8 }
 0x431   : > { %5962 = vmatprep.mubr.bf16.mxu0 %v4043_v23 }
 0x432   : > { %5963 = vmatmul.mubr.bf16.gmra.mrb[236].mxu0 %v4044_v22 }
 0x4ca   : > { %v5936_v61 = vpop.f32.mrb[208].mxu0 }
 0x4cb   : > { %v4143_v7 = vpop.f32.mrb[209].mxu0 }
 0x4cc   : > { %v5937_v29 = vpop.f32.mrb[210].mxu0 }
 0x4cd   : > { %v4991_v54 = vpack.c.bf16 %v5937_v29, %v5936_v61  ;;  %v4146_v42 = vpop.f32.mrb[211].mxu0 }
 0x4ce   : > { %v4986_v11 = vpack.c.bf16 %v4146_v42, %v4143_v7 }
 0x4cf   : > { %5063 = vst [vmem:[%s7900_s25 + $0x8] sm:$0xff] %v4991_v54  }
 0x4d0   : > { %4987 = vst [vmem:[%s7900_s25] sm:$0xff] %v4986_v11  }
 0x4d2   : > { %v5940_v17 = vpop.f32.mrb[212].mxu0 }
 0x4d3   : > { %v4159_v5 = vpop.f32.mrb[213].mxu0 }
 0x4d4   : > { %v5941_v31 = vpop.f32.mrb[214].mxu0 }
 0x4d5   : > { %v5001_v49 = vpack.c.bf16 %v5941_v31, %v5940_v17  ;;  %v4162_v55 = vpop.f32.mrb[215].mxu0 }
 0x4d6   : > { %v4996_v27 = vpack.c.bf16 %v4162_v55, %v4159_v5 }
 0x4d7   : > { %5065 = vst [vmem:[%s7900_s25 + $0x18] sm:$0xff] %v5001_v49  }
 0x4d8   : > { %5064 = vst [vmem:[%s7900_s25 + $0x10] sm:$0xff] %v4996_v27  }
 0x4da   : > { %v5944_v63 = vpop.f32.mrb[216].mxu0 }
 0x4db   : > { %v4175_v41 = vpop.f32.mrb[217].mxu0 }
 0x4dc   : > { %v5945_v59 = vpop.f32.mrb[218].mxu0 }
 0x4dd   : > { %v5011_v38 = vpack.c.bf16 %v5945_v59, %v5944_v63  ;;  %v4178_v32 = vpop.f32.mrb[219].mxu0 }
 0x4de   : > { %v5006_v4 = vpack.c.bf16 %v4178_v32, %v4175_v41 }
 0x4df   : > { %5067 = vst [vmem:[%s7900_s25 + $0x28] sm:$0xff] %v5011_v38  }
 0x4e0   : > { %5066 = vst [vmem:[%s7900_s25 + $0x20] sm:$0xff] %v5006_v4  }
 0x4e2   : > { %v5948_v30 = vpop.f32.mrb[220].mxu0 }
 0x4e3   : > { %v4191_v44 = vpop.f32.mrb[221].mxu0 }
 0x4e4   : > { %v5949_v13 = vpop.f32.mrb[222].mxu0 }
 0x4e5   : > { %v5021_v60 = vpack.c.bf16 %v5949_v13, %v5948_v30  ;;  %v4194_v15 = vpop.f32.mrb[223].mxu0 }
 0x4e6   : > { %v5016_v53 = vpack.c.bf16 %v4194_v15, %v4191_v44 }
 0x4e7   : > { %5069 = vst [vmem:[%s7900_s25 + $0x38] sm:$0xff] %v5021_v60  }
 0x4e8   : > { %5068 = vst [vmem:[%s7900_s25 + $0x30] sm:$0xff] %v5016_v53  }
 0x4ea   : > { %v5952_v45 = vpop.f32.mrb[224].mxu0 }
 0x4eb   : > { %v4207_v62 = vpop.f32.mrb[225].mxu0 }
 0x4ec   : > { %v5953_v58 = vpop.f32.mrb[226].mxu0 }
 0x4ed   : > { %v5031_v25 = vpack.c.bf16 %v5953_v58, %v5952_v45  ;;  %v4210_v39 = vpop.f32.mrb[227].mxu0 }
 0x4ee   : > { %v5026_v2 = vpack.c.bf16 %v4210_v39, %v4207_v62 }
 0x4ef   : > { %5071 = vst [vmem:[%s7900_s25 + $0x48] sm:$0xff] %v5031_v25  }
 0x4f0   : > { %5070 = vst [vmem:[%s7900_s25 + $0x40] sm:$0xff] %v5026_v2  }
 0x4f2   : > { %v5956_v28 = vpop.f32.mrb[228].mxu0 }
 0x4f3   : > { %v4223_v35 = vpop.f32.mrb[229].mxu0 }
 0x4f4   : > { %v5957_v18 = vpop.f32.mrb[230].mxu0 }
 0x4f5   : > { %v5041_v9 = vpack.c.bf16 %v5957_v18, %v5956_v28  ;;  %v4226_v12 = vpop.f32.mrb[231].mxu0 }
 0x4f6   : > { %v5036_v33 = vpack.c.bf16 %v4226_v12, %v4223_v35 }
 0x4f7   : > { %5073 = vst [vmem:[%s7900_s25 + $0x58] sm:$0xff] %v5041_v9  }
 0x4f8   : > { %5072 = vst [vmem:[%s7900_s25 + $0x50] sm:$0xff] %v5036_v33  }
 0x4fa   : > { %v5960_v1 = vpop.f32.mrb[232].mxu0 }
 0x4fb   : > { %v4239_v26 = vpop.f32.mrb[233].mxu0 }
 0x4fc   : > { %v5961_v43 = vpop.f32.mrb[234].mxu0 }
 0x4fd   : > { %v5051_v40 = vpack.c.bf16 %v5961_v43, %v5960_v1  ;;  %v4242_v14 = vpop.f32.mrb[235].mxu0 }
 0x4fe   : > { %v5046_v24 = vpack.c.bf16 %v4242_v14, %v4239_v26 }
 0x4ff   : > { %5075 = vst [vmem:[%s7900_s25 + $0x68] sm:$0xff] %v5051_v40  }
 0x500   : > { %5074 = vst [vmem:[%s7900_s25 + $0x60] sm:$0xff] %v5046_v24  }
 0x505   : > { %v5964_v37 = vpop.f32.mrb[236].mxu0 }
 0x506   : > { %v4255_v46 = vpop.f32.mrb[237].mxu0 }
 0x507   : > { %v5965_v16 = vpop.f32.mrb[238].mxu0 }
 0x508   : > { %v5061_v21 = vpack.c.bf16 %v5965_v16, %v5964_v37  ;;  %v4258_v3 = vpop.f32.mrb[239].mxu0 }
 0x509   : > { %v5056_v19 = vpack.c.bf16 %v4258_v3, %v4255_v46 }
 0x50a   : > { %5077 = vst [vmem:[%s7900_s25 + $0x78] sm:$0xff] %v5061_v21  }
 0x50b   : > { %5076 = vst [vmem:[%s7900_s25 + $0x70] sm:$0xff] %v5056_v19  }
 0x50c   : > { %6695 = shalt.err (!%p6692_p8)
}
 0x50d   : > { %s6696_s12 = scalar_lea.hbm %s7921_s8, 2048  ;;  %s6700_s28 = scalar_lea.hbm %s7975_s6, 4096 }
 0x50e   : > { %p6697_p6 = scmp.ne.s32.totalorder %s7921_s8, %s6696_s12  ;;  %p6701_p0 = scmp.lt.u32.totalorder %s7921_s8, %s7975_s6 }
 0x50f   : > { %p6702_p5 = scmp.lt.u32.totalorder %s6700_s28, %s6696_s12  ;;  %p6704_p7 = scmp.lt.u32.totalorder %s6696_s12, %s7921_s8 }
 0x510   : > { %p6698_p10 = pnand %p6697_p6, %p7994_p4 }
 0x511   : > { %p6703_p9 = por %p6702_p5, %p6701_p0 }
 0x512   : > { %p6699_p11 = pneg %p6698_p10 }
 0x513   : > { %p6705_p12 = por %p6704_p7, %p6703_p9 }
 0x515   : > { %p6706_p13 = pnand %p6705_p12, %p6699_p11 }
 0x517   : > { %6709 = shalt.err (!%p6706_p13)
}
 0x518   : > { %s6773_s18 = smov 64   ;;  %s6774_s9 = smov 4  }
 0x519   : > { %6007 = dma.vmem_to_hbm [thread:$0]  (%p7994_p4), %s7923_s30, 2048, %s7921_s8, %s4431_s14, %s6773_s18, %s6773_s18, %s6774_s9  }
 0x51a PF: > { %s4459_s27 = sand.u32 1, %s6748_s21   ;;  %p7995_p1 = scmp.ne.s32.totalorder %s7985_s29, 0 }
 0x51b   : > { %p7996_p3 = scmp.ge.s32.totalorder %s6760_s24, 2  ;;  %s4460_s16 = scalar_lea.sflag [#allocation4], %s4459_s27 }
 0x51d   : > { %p6030_p2 = pnand %p7996_p3, %p7995_p1 }
 0x51f   : > { %6743 = dma.done.wait (!%p6030_p2), %s4460_s16, 2048  }
 0x520   : > { %6745 = vsyncadd (!%p6030_p2), %s4460_s16, 4294965248  ;;  %p22_p8 = scmp.ge.s32.totalorder %s6978_s15, 4   ;;  %s7997_s21 = smov %s6752_s22 }
 0x521   : > { %s7998_s22 = smov %s6756_s23  ;;  %s7999_s23 = smov %s6990_s17 }
 0x522   : > { %s8000_s24 = smov %s6978_s15  ;;  %24 = sbr.rel (!%p22_p8) target bundleno = 8 (0x8), region = 109 }
 0x529   :  { %4465 = vsyncpa [#allocation3], 1 }
 0x52a   :  { %4467 = vsyncpa [#allocation3 + $0x1], 1 }
 0x52b   :  { %4468 = vsyncpa [#allocation6], 1 }
 0x52c   :  { %4469 = vsyncpa [#allocation9], 1 }
 0x52d   :  { %4470 = vsyncpa [#allocation12], 1 }
 0x52e   :  { %4471 = vsyncpa [#allocation4], 1 }
 0x52f   :  { %4473 = vsyncpa [#allocation4 + $0x1], 1 }

</bundles_post_ra>
